<compile_context>
chip_gen: v7x
topology: tpu7x:2x2x1
jax: 0.10.0
libtpu: 0.0.40
codegen_flags: <defaults>
</compile_context>

<pallas_src>
import functools

import jax
import jax.numpy as jnp
from jax.experimental import pallas as pl
from jax.experimental.pallas import tpu as pltpu


def _choose_tn(n, k, max_rows=2048):
    """Pick the N-tile size: TN*K rows per grid step, lane-aligned when tiling."""
    if n * k <= max_rows:
        return n
    best = None
    t = 128
    while t <= n and t * k <= max_rows:
        if n % t == 0:
            best = t
        t += 128
    if best is not None:
        return best
    # TODO(synk): pad N to a multiple of 128 for large N with no aligned divisor.
    return n


# ----------------------------------------------------------------------------
# Kernel 1: fc_xyz + (split) attention fc + softmax over K + weighted sum over K
#           + (split) mlp, emitting a lane-dense (d_out, TN) tile and per-tile
#           BatchNorm moments.
# ----------------------------------------------------------------------------
def _att_pool_kernel(xyz_ref, feat_ref, w_xyz_ref, b_xyz_ref,
                     w_att_xx_ref, w_att_fx_ref, w_att_xf_ref, w_att_ff_ref,
                     w_mlp_x_ref, w_mlp_f_ref, b_mlp_ref,
                     out_ref, psum_ref, psq_ref, *, tn, k):
    xyz_cf = xyz_ref[0]                    # (10, tn*k)   channel-first, lane dense
    feat_cf = feat_ref[0]                  # (d_in, tn*k)
    d_in = feat_cf.shape[0]

    # fc_xyz as a channel-first 1x1 conv (plain matmul), bias added channel-first.
    fxyz_cf = jnp.dot(w_xyz_ref[...], xyz_cf,
                      preferred_element_type=jnp.float32) + b_xyz_ref[...]  # (64, tn*k)

    # Transpose the two feature groups to channel-last (rows = points) so the
    # softmax / weighted sum over K are plain second-minor-axis reductions.
    fxyz = fxyz_cf.T                       # (tn*k, 64)
    feat = feat_cf.T                       # (tn*k, d_in)

    # Attention logits; w_fc was split in the wrapper -> no concat, no lane slicing.
    att_x = (jnp.dot(fxyz, w_att_xx_ref[...], preferred_element_type=jnp.float32)
             + jnp.dot(feat, w_att_fx_ref[...], preferred_element_type=jnp.float32))
    att_f = (jnp.dot(fxyz, w_att_xf_ref[...], preferred_element_type=jnp.float32)
             + jnp.dot(feat, w_att_ff_ref[...], preferred_element_type=jnp.float32))

    def softmax_over_k(a):                 # softmax along the K (neighbor) axis
        a = a.reshape(tn, k, a.shape[-1])
        m = jnp.max(a, axis=1, keepdims=True)
        e = jnp.exp(a - m)
        return e * pl.reciprocal(jnp.sum(e, axis=1, keepdims=True), approx=True)

    sc_x = softmax_over_k(att_x)                                       # (tn, k, 64)
    sc_f = softmax_over_k(att_f)                                       # (tn, k, d_in)

    agg_x = jnp.sum(fxyz.reshape(tn, k, fxyz.shape[-1]) * sc_x, axis=1)  # (tn, 64)
    agg_f = jnp.sum(feat.reshape(tn, k, d_in) * sc_f, axis=1)            # (tn, d_in)

    # mlp 1x1 conv, computed directly in (d_out, tn) orientation (lane-dense
    # output, N on lanes) via A @ B^T dot_generals -- no output transpose.
    nt_dims = (((1,), (1,)), ((), ()))
    out_t = (jax.lax.dot_general(w_mlp_x_ref[...], agg_x, nt_dims,
                                 preferred_element_type=jnp.float32)
             + jax.lax.dot_general(w_mlp_f_ref[...], agg_f, nt_dims,
                                   preferred_element_type=jnp.float32)
             + b_mlp_ref[...])                                         # (d_out, tn)

    out_ref[0] = out_t
    # Per-tile moments for BatchNorm (saves a full stats pass over HBM).
    psum_ref[0, 0] = jnp.sum(out_t, axis=1, keepdims=True)             # (d_out, 1)
    psq_ref[0, 0] = jnp.sum(out_t * out_t, axis=1, keepdims=True)      # (d_out, 1)


# ----------------------------------------------------------------------------
# Kernel 2: folded BatchNorm (scale/shift) + LeakyReLU, tiled like kernel 1.
# ----------------------------------------------------------------------------
def _bn_lrelu_kernel(x_ref, scale_ref, shift_ref, o_ref, *, slope):
    y = x_ref[0] * scale_ref[...] + shift_ref[...]     # (d_out, tn) * (d_out, 1)
    o_ref[0] = jnp.where(y >= 0.0, y, slope * y)


def att_pooling_forward(feature_set, xyz_set, params, *, eps=1e-5, slope=0.01):
    """feature_set: (B, d_in, N, K), xyz_set: (B, 10, N, K) -- NCHW like PyTorch.

    Returns (B, d_out, N, 1) NCHW, matching Att_pooling.forward (training-mode BN).
    """
    b, d_in, n, k = feature_set.shape
    assert xyz_set.shape == (b, 10, n, k)
    d_out = params["w_mlp"].shape[0]

    tn = _choose_tn(n, k)
    nt = n // tn

    # Free reshapes (merge trailing dims) -- no HBM transpose passes.
    xyz_flat = xyz_set.reshape(b, 10, n * k)
    feat_flat = feature_set.reshape(b, d_in, n * k)

    # Weight prep (tiny, once, in the wrapper): split the concat-channel axis.
    b_xyz_cf = params["b_xyz"].reshape(64, 1)
    w_fc_t = params["w_fc"].T                       # (C_in, C_out), C = 64 + d_in
    w_att_xx = w_fc_t[:64, :64]
    w_att_fx = w_fc_t[64:, :64]
    w_att_xf = w_fc_t[:64, 64:]
    w_att_ff = w_fc_t[64:, 64:]
    w_mlp_x = params["w_mlp"][:, :64]               # (d_out, 64)
    w_mlp_f = params["w_mlp"][:, 64:]               # (d_out, d_in)
    b_mlp_cf = params["b_mlp"].reshape(d_out, 1)

    def full(shape):
        return pl.BlockSpec(shape, lambda bi, ti: (0,) * len(shape))

    cparams = pltpu.CompilerParams(
        dimension_semantics=("parallel", "parallel"),
        vmem_limit_bytes=32 * 1024 * 1024)

    out_pre, psum, psq = pl.pallas_call(
        functools.partial(_att_pool_kernel, tn=tn, k=k),
        grid=(b, nt),
        in_specs=[
            pl.BlockSpec((1, 10, tn * k), lambda bi, ti: (bi, 0, ti)),
            pl.BlockSpec((1, d_in, tn * k), lambda bi, ti: (bi, 0, ti)),
            full((64, 10)), full((64, 1)),
            full((64, 64)), full((d_in, 64)), full((64, d_in)), full((d_in, d_in)),
            full((d_out, 64)), full((d_out, d_in)), full((d_out, 1)),
        ],
        out_specs=[
            pl.BlockSpec((1, d_out, tn), lambda bi, ti: (bi, 0, ti)),
            pl.BlockSpec((1, 1, d_out, 1), lambda bi, ti: (bi, ti, 0, 0)),
            pl.BlockSpec((1, 1, d_out, 1), lambda bi, ti: (bi, ti, 0, 0)),
        ],
        out_shape=[
            jax.ShapeDtypeStruct((b, d_out, n), jnp.float32),
            jax.ShapeDtypeStruct((b, nt, d_out, 1), jnp.float32),
            jax.ShapeDtypeStruct((b, nt, d_out, 1), jnp.float32),
        ],
        compiler_params=cparams,
    )(xyz_flat, feat_flat, params["w_xyz"], b_xyz_cf, w_att_xx, w_att_fx,
      w_att_xf, w_att_ff, w_mlp_x, w_mlp_f, b_mlp_cf)

    # Fold training-mode BatchNorm into a per-channel scale/shift (tiny math).
    cnt = b * n
    mean = jnp.sum(psum, axis=(0, 1, 3)) / cnt
    var = jnp.maximum(jnp.sum(psq, axis=(0, 1, 3)) / cnt - mean * mean, 0.0)
    inv = jax.lax.rsqrt(var + eps)
    scale = (params["bn_gamma"] * inv).reshape(d_out, 1)
    shift = (params["bn_beta"] - mean * params["bn_gamma"] * inv).reshape(d_out, 1)
    # TODO(synk): eval-mode BatchNorm (running stats) would feed running
    # mean/var here instead of the batch moments.

    out = pl.pallas_call(
        functools.partial(_bn_lrelu_kernel, slope=slope),
        grid=(b, nt),
        in_specs=[
            pl.BlockSpec((1, d_out, tn), lambda bi, ti: (bi, 0, ti)),
            full((d_out, 1)), full((d_out, 1)),
        ],
        out_specs=pl.BlockSpec((1, d_out, tn), lambda bi, ti: (bi, 0, ti)),
        out_shape=jax.ShapeDtypeStruct((b, d_out, n), jnp.float32),
        compiler_params=cparams,
    )(out_pre, scale, shift)

    return out[..., None]                           # (B, d_out, N, 1) NCHW


def init_params(key, d_in, d_out):
    c = d_in + 64
    ks = jax.random.split(key, 5)
    s = 0.1
    return {
        # PyTorch Conv2d orientation: (out_channels, in_channels)
        "w_xyz": s * jax.random.normal(ks[0], (64, 10), jnp.float32),
        "b_xyz": s * jax.random.normal(ks[1], (64,), jnp.float32),
        "w_fc": s * jax.random.normal(ks[2], (c, c), jnp.float32),
        "w_mlp": s * jax.random.normal(ks[3], (d_out, c), jnp.float32),
        "b_mlp": s * jax.random.normal(ks[4], (d_out,), jnp.float32),
        "bn_gamma": jnp.ones((d_out,), jnp.float32),
        "bn_beta": jnp.zeros((d_out,), jnp.float32),
    }


def _reference(feature_set, xyz_set, params, eps=1e-5, slope=0.01):
    """Pure-JAX NCHW reference mirroring the PyTorch module (training-mode BN)."""
    fxyz = (jnp.einsum("oi,bink->bonk", params["w_xyz"], xyz_set)
            + params["b_xyz"][None, :, None, None])
    f = jnp.concatenate([fxyz, feature_set], axis=1)
    att = jnp.einsum("oi,bink->bonk", params["w_fc"], f)
    scores = jax.nn.softmax(att, axis=3)
    agg = jnp.sum(f * scores, axis=3, keepdims=True)
    out = (jnp.einsum("oi,bink->bonk", params["w_mlp"], agg)
           + params["b_mlp"][None, :, None, None])
    mean = jnp.mean(out, axis=(0, 2, 3), keepdims=True)
    var = jnp.mean((out - mean) ** 2, axis=(0, 2, 3), keepdims=True)
    y = ((out - mean) * jax.lax.rsqrt(var + eps)
         * params["bn_gamma"][None, :, None, None]
         + params["bn_beta"][None, :, None, None])
    return jnp.where(y >= 0.0, y, slope * y)


if __name__ == "__main__":
    B, d_in, d_out, N, K = 2, 8, 16, 16, 16

    key = jax.random.PRNGKey(0)
    k_feat, k_xyz, k_param = jax.random.split(key, 3)

    feature_set = jax.random.normal(k_feat, (B, d_in, N, K), jnp.float32)
    xyz_set = jax.random.normal(k_xyz, (B, 10, N, K), jnp.float32)
    params = init_params(k_param, d_in, d_out)

    out = att_pooling_forward(feature_set, xyz_set, params)
    out = jax.block_until_ready(out)
    assert out.shape == (B, d_out, N, 1), out.shape

    ref = _reference(feature_set, xyz_set, params)
    err = float(jnp.max(jnp.abs(out - ref)))
    assert err < 5e-2, f"max abs error vs reference: {err}"

    print("KERNEL_OK")
</pallas_src>

<mosaic_0001>
module attributes {stable_mosaic.version = 11 : i64} {
  func.func @_att_pool_kernel(%arg0: i32, %arg1: i32, %arg2: memref<1x10x256xf32, #tpu.memory_space<vmem>>, %arg3: memref<1x8x256xf32, #tpu.memory_space<vmem>>, %arg4: memref<64x10xf32, #tpu.memory_space<vmem>>, %arg5: memref<64x1xf32, #tpu.memory_space<vmem>>, %arg6: memref<64x64xf32, #tpu.memory_space<vmem>>, %arg7: memref<8x64xf32, #tpu.memory_space<vmem>>, %arg8: memref<64x8xf32, #tpu.memory_space<vmem>>, %arg9: memref<8x8xf32, #tpu.memory_space<vmem>>, %arg10: memref<16x64xf32, #tpu.memory_space<vmem>>, %arg11: memref<16x8xf32, #tpu.memory_space<vmem>>, %arg12: memref<16x1xf32, #tpu.memory_space<vmem>>, %arg13: memref<1x16x16xf32, #tpu.memory_space<vmem>>, %arg14: memref<1x1x16x1xf32, #tpu.memory_space<vmem>>, %arg15: memref<1x1x16x1xf32, #tpu.memory_space<vmem>>) attributes {dimension_semantics = [#tpu.dimension_semantics<parallel>, #tpu.dimension_semantics<parallel>], iteration_bounds = array<i64: 2, 1>, scalar_prefetch = 0 : i64, scratch_operands = 0 : i64, tpu.core_type = #tpu.core_type<tc>, window_params = [{transform_indices = @transform_0, window_bounds = array<i64: 1, 10, 256>}, {transform_indices = @transform_1, window_bounds = array<i64: 1, 8, 256>}, {pipeline_mode = #tpu.pipeline_mode<synchronous>, transform_indices = @transform_2, window_bounds = array<i64: 64, 10>}, {pipeline_mode = #tpu.pipeline_mode<synchronous>, transform_indices = @transform_3, window_bounds = array<i64: 64, 1>}, {pipeline_mode = #tpu.pipeline_mode<synchronous>, transform_indices = @transform_4, window_bounds = array<i64: 64, 64>}, {pipeline_mode = #tpu.pipeline_mode<synchronous>, transform_indices = @transform_5, window_bounds = array<i64: 8, 64>}, {pipeline_mode = #tpu.pipeline_mode<synchronous>, transform_indices = @transform_6, window_bounds = array<i64: 64, 8>}, {pipeline_mode = #tpu.pipeline_mode<synchronous>, transform_indices = @transform_7, window_bounds = array<i64: 8, 8>}, {pipeline_mode = #tpu.pipeline_mode<synchronous>, transform_indices = @transform_8, window_bounds = array<i64: 16, 64>}, {pipeline_mode = #tpu.pipeline_mode<synchronous>, transform_indices = @transform_9, window_bounds = array<i64: 16, 8>}, {pipeline_mode = #tpu.pipeline_mode<synchronous>, transform_indices = @transform_10, window_bounds = array<i64: 16, 1>}, {transform_indices = @transform_11, window_bounds = array<i64: 1, 16, 16>}, {transform_indices = @transform_12, window_bounds = array<i64: 1, 1, 16, 1>}, {transform_indices = @transform_13, window_bounds = array<i64: 1, 1, 16, 1>}]} {
    %c0 = arith.constant 0 : index
    %c0_0 = arith.constant 0 : index
    %c0_1 = arith.constant 0 : index
    %0 = vector.load %arg2[%c0, %c0_0, %c0_1] : memref<1x10x256xf32, #tpu.memory_space<vmem>>, vector<1x10x256xf32>
    %1 = vector.shape_cast %0 : vector<1x10x256xf32> to vector<10x256xf32>
    %c0_2 = arith.constant 0 : index
    %c0_3 = arith.constant 0 : index
    %c0_4 = arith.constant 0 : index
    %2 = vector.load %arg3[%c0_2, %c0_3, %c0_4] : memref<1x8x256xf32, #tpu.memory_space<vmem>>, vector<1x8x256xf32>
    %3 = vector.shape_cast %2 : vector<1x8x256xf32> to vector<8x256xf32>
    %c0_5 = arith.constant 0 : index
    %c0_6 = arith.constant 0 : index
    %4 = vector.load %arg4[%c0_5, %c0_6] : memref<64x10xf32, #tpu.memory_space<vmem>>, vector<64x10xf32>
    %cst = arith.constant dense<0.000000e+00> : vector<64x256xf32>
    %5 = tpu.matmul %4, %1, %cst {dimension_numbers = #tpu.dot_dimension_numbers<[1], [0], [0], [1], [0, 0, 1, 1], [], []>} : vector<64x10xf32>, vector<10x256xf32>, vector<64x256xf32> -> vector<64x256xf32>
    %c0_7 = arith.constant 0 : index
    %c0_8 = arith.constant 0 : index
    %6 = vector.load %arg5[%c0_7, %c0_8] : memref<64x1xf32, #tpu.memory_space<vmem>>, vector<64x1xf32>
    %7 = vector.broadcast %6 : vector<64x1xf32> to vector<64x256xf32>
    %8 = arith.addf %5, %7 : vector<64x256xf32>
    %9 = tpu.transpose %8, [1, 0] : vector<64x256xf32> -> vector<256x64xf32>
    %10 = tpu.transpose %3, [1, 0] : vector<8x256xf32> -> vector<256x8xf32>
    %c0_9 = arith.constant 0 : index
    %c0_10 = arith.constant 0 : index
    %11 = vector.load %arg6[%c0_9, %c0_10] : memref<64x64xf32, #tpu.memory_space<vmem>>, vector<64x64xf32>
    %cst_11 = arith.constant dense<0.000000e+00> : vector<256x64xf32>
    %12 = tpu.matmul %9, %11, %cst_11 {dimension_numbers = #tpu.dot_dimension_numbers<[1], [0], [0], [1], [0, 0, 1, 1], [], []>} : vector<256x64xf32>, vector<64x64xf32>, vector<256x64xf32> -> vector<256x64xf32>
    %c0_12 = arith.constant 0 : index
    %c0_13 = arith.constant 0 : index
    %13 = vector.load %arg7[%c0_12, %c0_13] : memref<8x64xf32, #tpu.memory_space<vmem>>, vector<8x64xf32>
    %cst_14 = arith.constant dense<0.000000e+00> : vector<256x64xf32>
    %14 = tpu.matmul %10, %13, %cst_14 {dimension_numbers = #tpu.dot_dimension_numbers<[1], [0], [0], [1], [0, 0, 1, 1], [], []>} : vector<256x8xf32>, vector<8x64xf32>, vector<256x64xf32> -> vector<256x64xf32>
    %15 = arith.addf %12, %14 : vector<256x64xf32>
    %c0_15 = arith.constant 0 : index
    %c0_16 = arith.constant 0 : index
    %16 = vector.load %arg8[%c0_15, %c0_16] : memref<64x8xf32, #tpu.memory_space<vmem>>, vector<64x8xf32>
    %cst_17 = arith.constant dense<0.000000e+00> : vector<256x8xf32>
    %17 = tpu.matmul %9, %16, %cst_17 {dimension_numbers = #tpu.dot_dimension_numbers<[1], [0], [0], [1], [0, 0, 1, 1], [], []>} : vector<256x64xf32>, vector<64x8xf32>, vector<256x8xf32> -> vector<256x8xf32>
    %c0_18 = arith.constant 0 : index
    %c0_19 = arith.constant 0 : index
    %18 = vector.load %arg9[%c0_18, %c0_19] : memref<8x8xf32, #tpu.memory_space<vmem>>, vector<8x8xf32>
    %cst_20 = arith.constant dense<0.000000e+00> : vector<256x8xf32>
    %19 = tpu.matmul %10, %18, %cst_20 {dimension_numbers = #tpu.dot_dimension_numbers<[1], [0], [0], [1], [0, 0, 1, 1], [], []>} : vector<256x8xf32>, vector<8x8xf32>, vector<256x8xf32> -> vector<256x8xf32>
    %20 = arith.addf %17, %19 : vector<256x8xf32>
    %21 = vector.shape_cast %15 : vector<256x64xf32> to vector<16x16x64xf32>
    %cst_21 = arith.constant dense<0xFF800000> : vector<16x64xf32>
    %22 = vector.multi_reduction <maximumf>, %21, %cst_21 [1] : vector<16x16x64xf32> to vector<16x64xf32>
    %23 = vector.shape_cast %22 : vector<16x64xf32> to vector<16x1x64xf32>
    %24 = vector.broadcast %23 : vector<16x1x64xf32> to vector<16x16x64xf32>
    %25 = arith.subf %21, %24 : vector<16x16x64xf32>
    %26 = math.exp %25 : vector<16x16x64xf32>
    %cst_22 = arith.constant dense<0.000000e+00> : vector<16x64xf32>
    %27 = vector.multi_reduction <add>, %26, %cst_22 [1] : vector<16x16x64xf32> to vector<16x64xf32>
    %28 = vector.shape_cast %27 : vector<16x64xf32> to vector<16x1x64xf32>
    %29 = tpu.reciprocal %28 {approx = true} : vector<16x1x64xf32> -> vector<16x1x64xf32>
    %30 = vector.broadcast %29 : vector<16x1x64xf32> to vector<16x16x64xf32>
    %31 = arith.mulf %26, %30 : vector<16x16x64xf32>
    %32 = vector.shape_cast %20 : vector<256x8xf32> to vector<16x16x8xf32>
    %cst_23 = arith.constant dense<0xFF800000> : vector<16x8xf32>
    %33 = vector.multi_reduction <maximumf>, %32, %cst_23 [1] : vector<16x16x8xf32> to vector<16x8xf32>
    %34 = vector.shape_cast %33 : vector<16x8xf32> to vector<16x1x8xf32>
    %35 = vector.broadcast %34 : vector<16x1x8xf32> to vector<16x16x8xf32>
    %36 = arith.subf %32, %35 : vector<16x16x8xf32>
    %37 = math.exp %36 : vector<16x16x8xf32>
    %cst_24 = arith.constant dense<0.000000e+00> : vector<16x8xf32>
    %38 = vector.multi_reduction <add>, %37, %cst_24 [1] : vector<16x16x8xf32> to vector<16x8xf32>
    %39 = vector.shape_cast %38 : vector<16x8xf32> to vector<16x1x8xf32>
    %40 = tpu.reciprocal %39 {approx = true} : vector<16x1x8xf32> -> vector<16x1x8xf32>
    %41 = vector.broadcast %40 : vector<16x1x8xf32> to vector<16x16x8xf32>
    %42 = arith.mulf %37, %41 : vector<16x16x8xf32>
    %43 = vector.shape_cast %9 : vector<256x64xf32> to vector<16x16x64xf32>
    %44 = arith.mulf %43, %31 : vector<16x16x64xf32>
    %cst_25 = arith.constant dense<0.000000e+00> : vector<16x64xf32>
    %45 = vector.multi_reduction <add>, %44, %cst_25 [1] : vector<16x16x64xf32> to vector<16x64xf32>
    %46 = vector.shape_cast %10 : vector<256x8xf32> to vector<16x16x8xf32>
    %47 = arith.mulf %46, %42 : vector<16x16x8xf32>
    %cst_26 = arith.constant dense<0.000000e+00> : vector<16x8xf32>
    %48 = vector.multi_reduction <add>, %47, %cst_26 [1] : vector<16x16x8xf32> to vector<16x8xf32>
    %c0_27 = arith.constant 0 : index
    %c0_28 = arith.constant 0 : index
    %49 = vector.load %arg10[%c0_27, %c0_28] : memref<16x64xf32, #tpu.memory_space<vmem>>, vector<16x64xf32>
    %cst_29 = arith.constant dense<0.000000e+00> : vector<16x16xf32>
    %50 = tpu.matmul %49, %45, %cst_29 {dimension_numbers = #tpu.dot_dimension_numbers<[1], [1], [0], [0], [0, 0, 1, 0], [], []>} : vector<16x64xf32>, vector<16x64xf32>, vector<16x16xf32> -> vector<16x16xf32>
    %c0_30 = arith.constant 0 : index
    %c0_31 = arith.constant 0 : index
    %51 = vector.load %arg11[%c0_30, %c0_31] : memref<16x8xf32, #tpu.memory_space<vmem>>, vector<16x8xf32>
    %cst_32 = arith.constant dense<0.000000e+00> : vector<16x16xf32>
    %52 = tpu.matmul %51, %48, %cst_32 {dimension_numbers = #tpu.dot_dimension_numbers<[1], [1], [0], [0], [0, 0, 1, 0], [], []>} : vector<16x8xf32>, vector<16x8xf32>, vector<16x16xf32> -> vector<16x16xf32>
    %53 = arith.addf %50, %52 : vector<16x16xf32>
    %c0_33 = arith.constant 0 : index
    %c0_34 = arith.constant 0 : index
    %54 = vector.load %arg12[%c0_33, %c0_34] : memref<16x1xf32, #tpu.memory_space<vmem>>, vector<16x1xf32>
    %55 = vector.broadcast %54 : vector<16x1xf32> to vector<16x16xf32>
    %56 = arith.addf %53, %55 : vector<16x16xf32>
    %c0_35 = arith.constant 0 : index
    %c0_36 = arith.constant 0 : index
    %c0_37 = arith.constant 0 : index
    %57 = vector.load %arg13[%c0_35, %c0_36, %c0_37] : memref<1x16x16xf32, #tpu.memory_space<vmem>>, vector<1x16x16xf32>
    %58 = vector.shape_cast %57 : vector<1x16x16xf32> to vector<16x16xf32>
    %59 = vector.shape_cast %56 : vector<16x16xf32> to vector<1x16x16xf32>
    tpu.vector_store %arg13[%c0_35, %c0_36, %c0_37], %59 {strides = array<i32>} : memref<1x16x16xf32, #tpu.memory_space<vmem>>, vector<1x16x16xf32>,
    %cst_38 = arith.constant dense<0.000000e+00> : vector<16xf32>
    %60 = vector.multi_reduction <add>, %56, %cst_38 [1] : vector<16x16xf32> to vector<16xf32>
    %61 = vector.shape_cast %60 : vector<16xf32> to vector<16x1xf32>
    %c0_39 = arith.constant 0 : index
    %c0_40 = arith.constant 0 : index
    %c0_41 = arith.constant 0 : index
    %c0_42 = arith.constant 0 : index
    %62 = vector.load %arg14[%c0_39, %c0_40, %c0_41, %c0_42] : memref<1x1x16x1xf32, #tpu.memory_space<vmem>>, vector<1x1x16x1xf32>
    %63 = vector.shape_cast %62 : vector<1x1x16x1xf32> to vector<16x1xf32>
    %64 = vector.shape_cast %61 : vector<16x1xf32> to vector<1x1x16x1xf32>
    tpu.vector_store %arg14[%c0_39, %c0_40, %c0_41, %c0_42], %64 {strides = array<i32>} : memref<1x1x16x1xf32, #tpu.memory_space<vmem>>, vector<1x1x16x1xf32>,
    %65 = arith.mulf %56, %56 : vector<16x16xf32>
    %cst_43 = arith.constant dense<0.000000e+00> : vector<16xf32>
    %66 = vector.multi_reduction <add>, %65, %cst_43 [1] : vector<16x16xf32> to vector<16xf32>
    %67 = vector.shape_cast %66 : vector<16xf32> to vector<16x1xf32>
    %c0_44 = arith.constant 0 : index
    %c0_45 = arith.constant 0 : index
    %c0_46 = arith.constant 0 : index
    %c0_47 = arith.constant 0 : index
    %68 = vector.load %arg15[%c0_44, %c0_45, %c0_46, %c0_47] : memref<1x1x16x1xf32, #tpu.memory_space<vmem>>, vector<1x1x16x1xf32>
    %69 = vector.shape_cast %68 : vector<1x1x16x1xf32> to vector<16x1xf32>
    %70 = vector.shape_cast %67 : vector<16x1xf32> to vector<1x1x16x1xf32>
    tpu.vector_store %arg15[%c0_44, %c0_45, %c0_46, %c0_47], %70 {strides = array<i32>} : memref<1x1x16x1xf32, #tpu.memory_space<vmem>>, vector<1x1x16x1xf32>,
    return
  }
  func.func @transform_0(%arg0: i32, %arg1: i32) -> (i32, i32, i32) {
    %c0_i32 = arith.constant 0 : i32
    %c0_i32_0 = arith.constant 0 : i32
    return %arg0, %c0_i32, %arg1 : i32, i32, i32
  }
  func.func @transform_1(%arg0: i32, %arg1: i32) -> (i32, i32, i32) {
    %c0_i32 = arith.constant 0 : i32
    %c0_i32_0 = arith.constant 0 : i32
    return %arg0, %c0_i32, %arg1 : i32, i32, i32
  }
  func.func @transform_2(%arg0: i32, %arg1: i32) -> (i32, i32) {
    %c0_i32 = arith.constant 0 : i32
    %c0_i32_0 = arith.constant 0 : i32
    %c0_i32_1 = arith.constant 0 : i32
    return %c0_i32, %c0_i32_0 : i32, i32
  }
  func.func @transform_3(%arg0: i32, %arg1: i32) -> (i32, i32) {
    %c0_i32 = arith.constant 0 : i32
    %c0_i32_0 = arith.constant 0 : i32
    %c0_i32_1 = arith.constant 0 : i32
    return %c0_i32, %c0_i32_0 : i32, i32
  }
  func.func @transform_4(%arg0: i32, %arg1: i32) -> (i32, i32) {
    %c0_i32 = arith.constant 0 : i32
    %c0_i32_0 = arith.constant 0 : i32
    %c0_i32_1 = arith.constant 0 : i32
    return %c0_i32, %c0_i32_0 : i32, i32
  }
  func.func @transform_5(%arg0: i32, %arg1: i32) -> (i32, i32) {
    %c0_i32 = arith.constant 0 : i32
    %c0_i32_0 = arith.constant 0 : i32
    %c0_i32_1 = arith.constant 0 : i32
    return %c0_i32, %c0_i32_0 : i32, i32
  }
  func.func @transform_6(%arg0: i32, %arg1: i32) -> (i32, i32) {
    %c0_i32 = arith.constant 0 : i32
    %c0_i32_0 = arith.constant 0 : i32
    %c0_i32_1 = arith.constant 0 : i32
    return %c0_i32, %c0_i32_0 : i32, i32
  }
  func.func @transform_7(%arg0: i32, %arg1: i32) -> (i32, i32) {
    %c0_i32 = arith.constant 0 : i32
    %c0_i32_0 = arith.constant 0 : i32
    %c0_i32_1 = arith.constant 0 : i32
    return %c0_i32, %c0_i32_0 : i32, i32
  }
  func.func @transform_8(%arg0: i32, %arg1: i32) -> (i32, i32) {
    %c0_i32 = arith.constant 0 : i32
    %c0_i32_0 = arith.constant 0 : i32
    %c0_i32_1 = arith.constant 0 : i32
    return %c0_i32, %c0_i32_0 : i32, i32
  }
  func.func @transform_9(%arg0: i32, %arg1: i32) -> (i32, i32) {
    %c0_i32 = arith.constant 0 : i32
    %c0_i32_0 = arith.constant 0 : i32
    %c0_i32_1 = arith.constant 0 : i32
    return %c0_i32, %c0_i32_0 : i32, i32
  }
  func.func @transform_10(%arg0: i32, %arg1: i32) -> (i32, i32) {
    %c0_i32 = arith.constant 0 : i32
    %c0_i32_0 = arith.constant 0 : i32
    %c0_i32_1 = arith.constant 0 : i32
    return %c0_i32, %c0_i32_0 : i32, i32
  }
  func.func @transform_11(%arg0: i32, %arg1: i32) -> (i32, i32, i32) {
    %c0_i32 = arith.constant 0 : i32
    %c0_i32_0 = arith.constant 0 : i32
    return %arg0, %c0_i32, %arg1 : i32, i32, i32
  }
  func.func @transform_12(%arg0: i32, %arg1: i32) -> (i32, i32, i32, i32) {
    %c0_i32 = arith.constant 0 : i32
    %c0_i32_0 = arith.constant 0 : i32
    %c0_i32_1 = arith.constant 0 : i32
    return %arg0, %arg1, %c0_i32, %c0_i32_0 : i32, i32, i32, i32
  }
  func.func @transform_13(%arg0: i32, %arg1: i32) -> (i32, i32, i32, i32) {
    %c0_i32 = arith.constant 0 : i32
    %c0_i32_0 = arith.constant 0 : i32
    %c0_i32_1 = arith.constant 0 : i32
    return %arg0, %arg1, %c0_i32, %c0_i32_0 : i32, i32, i32, i32
  }
}

</mosaic_0001>

<bundles_post_ra>
// kernel: tpu_custom_call.1
= control target key start
LH: loop header
LB: loop body
LE: loop exit
PB: predicated region body
PF: predicated region fallthrough
CT: control target
= control target key end

     0   :  { %s6475_s0 = inlined_call_operand.vmem [shape: f32[2,10,256], index: 0, kind: input, shape index: {}]   ;;  %s6476_s1 = inlined_call_operand.vmem [shape: f32[2,8,256], index: 1, kind: input, shape index: {}]   ;;  %s6477_s2 = inlined_call_operand.vmem [shape: f32[64,10], index: 2, kind: input, shape index: {}]   ;;  %s6478_s3 = inlined_call_operand.vmem [shape: f32[64,1], index: 3, kind: input, shape index: {}]   ;;  %s6479_s4 = inlined_call_operand.vmem [shape: f32[64,64], index: 4, kind: input, shape index: {}]   ;;  %s6480_s5 = inlined_call_operand.vmem [shape: f32[8,64], index: 5, kind: input, shape index: {}]   ;;  %s6481_s6 = inlined_call_operand.vmem [shape: f32[64,8], index: 6, kind: input, shape index: {}]   ;;  %s6482_s7 = inlined_call_operand.vmem [shape: f32[8,8], index: 7, kind: input, shape index: {}]   ;;  %s6483_s8 = inlined_call_operand.vmem [shape: f32[16,64], index: 8, kind: input, shape index: {}]   ;;  %s6484_s9 = inlined_call_operand.vmem [shape: f32[16,8], index: 9, kind: input, shape index: {}]   ;;  %s6485_s10 = inlined_call_operand.vmem [shape: f32[16,1], index: 10, kind: input, shape index: {}]   ;;  %s6486_s11 = inlined_call_operand.hbm [shape: f32[2,16,16], index: 11, kind: output, shape index: {0}]   ;;  %s6487_s12 = inlined_call_operand.vmem [shape: f32[2,1,16,1], index: 12, kind: output, shape index: {1}]   ;;  %s6488_s13 = inlined_call_operand.vmem [shape: f32[2,1,16,1], index: 13, kind: output, shape index: {2}]  }
   0x1   :  { %6566 = sst [smem:[#allocation77_spill]] %s6475_s0 }
   0x2   :  { %19 = vsyncpa [#allocation3], 0 }
   0x3   :  { %21 = vsyncpa [#allocation3 + $0x1], 0  ;;  %s4801_s25 = smov 0   ;;  %s4803_s26 = smov 0  }
   0x4   :  { %s4805_s27 = smov 0   ;;  %s4807_s28 = smov 0  }
   0x5   :  { %s4809_s29 = smov 0   ;;  %s4811_s30 = smov 0  }
   0x6 LB: > { %6567 = sst [smem:[#allocation5_spill]] %s4711_s27  ;;  %s3707_s14 = sadd.s32 4294967295, %s4723_s30   ;;  %s4723_s30 = sphi %s4811_s30, %s27_s30   ;;  %s4719_s29 = sphi %s4809_s29, %s6735_s29   ;;  %s4715_s28 = sphi %s4807_s28, %s6731_s28   ;;  %s4711_s27 = sphi %s4805_s27, %s6730_s27   ;;  %s4707_s26 = sphi %s4803_s26, %s6734_s26   ;;  %s4703_s25 = sphi %s4801_s25, %s6733_s25  }
   0x7   : > { %6568 = sst [smem:[#allocation6_spill]] %s4719_s29  ;;  %s3708_s15 = sadd.s32 4294967294, %s4723_s30  }
   0x8   : > { %s39_s16 = sadd.s32 1, %s4719_s29  ;;  %s293_s17 = sadd.s32 1, %s4711_s27 }
   0x9   : > { %p41_p0 = scmp.ge.s32.totalorder %s39_s16, 2  ;;  %p303_p1 = scmp.ne.s32.totalorder %s4711_s27, %s4707_s26 }
   0xa   : > { %p304_p2 = scmp.eq.s32.totalorder %s3707_s14, 1  ;;  %p309_p3 = scmp.ne.s32.totalorder %s4707_s26, %s4703_s25 }
   0xb   : > { %s6737_s16 = smov (%p41_p0, %s39_s16), 0  ;;  %p310_p5 = scmp.eq.s32.totalorder %s3708_s15, 1 }
   0xc   : > { %6569 = sst [smem:[#allocation7_spill]] %s6737_s16  ;;  %p4841_p4 = por %p304_p2, %p303_p1 }
   0xd   : > { %s288_s19 = ssub.s32 %s4719_s29, %s6737_s16  ;;  %p3711_p6 = scmp.ge.s32.totalorder %s4723_s30, 1 }
   0xe   : > { %p291_p7 = scmp.eq.s32.totalorder %s288_s19, 0  ;;  %p4848_p8 = por %p310_p5, %p309_p3 }
   0xf   : > { %p437_p9 = scmp.lt.s32.totalorder %s4723_s30, 3 }
  0x10   : > { %s4854_s21 = scalar_select %p291_p7, %s4711_s27, %s293_s17  }
  0x11   : > { %p438_p10 = pnand %p3711_p6, %p437_p9 }
  0x12   : > { %6572 = sst [smem:[#allocation8_spill]] %s4854_s21 }
  0x13   : > { %441 = sbr.rel (%p438_p10) target bundleno = 1321 (0x529), region = 64 }
  0x1a   : > { %p513_p11 = scmp.lt.s32.totalorder %s4715_s28, 1  ;;  %v4725_v0 = vmov 0.0   ;;  %vm637_vm0 = vcmask 1041408   ;;  %v4726_v1 = vmov 0   ;;  %v564_v2 = vld [vmem:[%s6478_s3] sm:$0xff]  ;;  %v566_v3 = vld [vmem:[%s6478_s3 + $0x10] sm:$0xff] }
  0x1b   : > { %708 = vmatprep.mubr.f32.mxu0 %v4725_v0  ;;  %744 = vmatprep.mubr.f32.mxu1 %v4725_v0  ;;  %s6573_s0 = sld [smem:[#allocation77_spill]]  ;;  %vm4727_vm1 = vmmov 1   ;;  %v565_v4 = vld [vmem:[%s6478_s3 + $0x8] sm:$0xff]  ;;  %v567_v11 = vld [vmem:[%s6478_s3 + $0x18] sm:$0xff]  ;;  %v568_v12 = vld [vmem:[%s6478_s3 + $0x20] sm:$0xff]  ;;  %vm612_vm3 = vcmask 80896  }
  0x1c   : > { %s4858_s22 = scalar_select %p513_p11, %s4715_s28, 1  ;;  %4451 = vset.pattern.permute.xlu0 %v4726_v1  ;;  %4452 = vset.pattern.permute.xlu1 %v4726_v1  ;;  %vm4274_vm2 = vmpackc.low %vm637_vm0, %vm4727_vm1  ;;  %v556_v13 = vld [vmem:[%s6477_s2] sm:$0xff]  ;;  %v562_v14 = vld [vmem:[%s6477_s2 + $0x30] sm:$0xff]  ;;  %vm894_vm4 = vcmask 64512   ;;  %vm1216_vm5 = vcmask 523264   ;;  %vm3233_vm6 = vcmask 1041409  }
  0x1d   : > { %574 = vperm.xlu0 %4451, %v564_v2   ;;  %584 = vperm.xlu1 %4452, %v566_v3   ;;  %v569_v15 = vld [vmem:[%s6478_s3 + $0x28] sm:$0xff]  ;;  %v570_v16 = vld [vmem:[%s6478_s3 + $0x30] sm:$0xff]  ;;  %v563_v18 = vld [vmem:[%s6477_s2 + $0x38] sm:$0xff]  ;;  %vm3235_vm7 = vcmask 1042434   ;;  %vm3237_vm8 = vcmask 1043459   ;;  %vm3239_vm9 = vcmask 1044484  }
  0x1e   : > { %s3872_s14 = sshll.u32 %s4858_s22, 5  ;;  %v557_v17 = vld [vmem:[%s6477_s2 + $0x8] sm:$0xff]  ;;  %v571_v19 = vld [vmem:[%s6478_s3 + $0x38] sm:$0xff]  ;;  %v558_v20 = vld [vmem:[%s6477_s2 + $0x10] sm:$0xff]  ;;  %vm3241_vm10 = vcmask 1045509   ;;  %vm3243_vm11 = vcmask 1046534  }
  0x1f   : > { %v559_v21 = vld [vmem:[%s6477_s2 + $0x18] sm:$0xff]  ;;  %v560_v22 = vld [vmem:[%s6477_s2 + $0x20] sm:$0xff]  ;;  %v561_v23 = vld [vmem:[%s6477_s2 + $0x28] sm:$0xff]  ;;  %vm3245_vm12 = vcmask 1047559   ;;  %vm3468_vm15 = vcmask 130048   ;;  %s3876_s17 = sshll.u32 %s4715_s28, 8 }
  0x20   : > { %v893_v26 = vld [vmem:[%s6480_s5] sm:$0xff]  ;;  %v886_v48 = vld [vmem:[%s6479_s4 + $0x8] sm:$0xff]  ;;  %v887_v52 = vld [vmem:[%s6479_s4 + $0x10] sm:$0xff] }
  0x21   : > { %s520_s29 = scalar_lea.vmem %s6573_s0, %s3872_s14  ;;  %579 = vperm.xlu0 %4451, %v565_v4   ;;  %589 = vperm.xlu1 %4452, %v567_v11   ;;  %v1546_v27 = vld [vmem:[%s6482_s7] sm:$0xff]  ;;  %v1539_v51 = vld [vmem:[%s6481_s6 + $0x8] sm:$0xff]  ;;  %v888_v53 = vld [vmem:[%s6479_s4 + $0x18] sm:$0xff]  ;;  %s6419_s0 = scalar_lea.hbm %s6486_s11, %s3876_s17 }
  0x22   : > { %v551_v5 = vld [vmem:[%s520_s29 + $0x8] sm:$0xff]  ;;  %v553_v6 = vld [vmem:[%s520_s29 + $0x18] sm:$0x3]  ;;  %v550_v7 = vld [vmem:[%s520_s29] sm:$0xff]  ;;  %v4283_v56 = vpack.c.bf16 %v888_v53, %v887_v52  ;;  %s4728_s14 = smov [#allocation2]  }
  0x23   : > { %v4273_v8 = vpack.c.bf16 %v553_v6, %v551_v5  ;;  %v552_v9 = vld [vmem:[%s520_s29 + $0x10] sm:$0x3]  ;;  %s4921_s29 = sshll.u32 %s4858_s22, 4  ;;  %v885_v47 = vld [vmem:[%s6479_s4] sm:$0xff]  ;;  %v1541_v58 = vld [vmem:[%s6481_s6 + $0x18] sm:$0xff]  ;;  %s487_s22 = sand.u32 1, %s4707_s26  }
  0x24   : > { %v4276_v10 = vpack.c.bf16 %v552_v9, %v550_v7  ;;  %s530_s19 = scalar_lea.vmem %s6476_s1, %s4921_s29  ;;  %v1538_v49 = vld [vmem:[%s6481_s6] sm:$0xff]  ;;  %v4279_v50 = vpack.c.bf16 %v886_v48, %v885_v47  ;;  %v1540_v57 = vld [vmem:[%s6481_s6 + $0x10] sm:$0xff]  ;;  %v890_v61 = vld [vmem:[%s6479_s4 + $0x28] sm:$0xff]  ;;  %s3712_s27 = sshll.u32 %s487_s22, 4 }
  0x25   : > { %4275 = vmatprep.subr.msk.bf16.mxu0 %vm4274_vm2, %v4273_v8  ;;  %4323 = vmatprep.subr.msk.bf16.mxu1 %vm4274_vm2, %v4273_v8  ;;  %v554_v24 = vld [vmem:[%s530_s19] sm:$0xff]  ;;  %v555_v25 = vld [vmem:[%s530_s19 + $0x8] sm:$0xff]  ;;  %v4295_v55 = vpack.c.bf16 %v1539_v51, %v1538_v49  ;;  %v4299_v60 = vpack.c.bf16 %v1541_v58, %v1540_v57  ;;  %vm4312_vm13 = vmpackc.low %vm894_vm4, %vm894_vm4  ;;  %s489_s21 = scalar_lea.vmem [#allocation2], %s3712_s27  ;;  %s6421_s24 = scalar_lea.sflag [#allocation3], %s487_s22 }
  0x26   : > { %4278 = vmatpush1.bf16.msk.msra.mxu0 %vm4274_vm2, %v4276_v10  ;;  %4324 = vmatpush1.bf16.msk.msra.mxu1 %vm4274_vm2, %v4276_v10  ;;  %v889_v59 = vld [vmem:[%s6479_s4 + $0x20] sm:$0xff]  ;;  %v1543_v63 = vld [vmem:[%s6481_s6 + $0x28] sm:$0xff]  ;;  %vm4318_vm14 = vmpackc.low %vm1216_vm5, %vm1216_vm5  ;;  %s3523_s15 = sshll.u32 %s489_s21, 4  ;;  %s4649_s27 = sshll.u32 %s4728_s14, 4  ;;  %s6413_s15 = int_to_ptr.vmem [resolvable:$true] %s3523_s15  ;;  %s4650_s27 = int_to_ptr.vmem [resolvable:$false] %s4649_s27 }
  0x27   : > { %594 = vperm.xlu0 %4451, %v568_v12   ;;  %599 = vperm.xlu1 %4452, %v569_v15   ;;  %v1542_v62 = vld [vmem:[%s6481_s6 + $0x20] sm:$0xff]  ;;  %v4287_v2 = vpack.c.bf16 %v890_v61, %v889_v59  ;;  %s4645_s16 = scalar_lea.vmem %s6413_s15, 256  ;;  %p4652_p1 = scmp.lt.s32.totalorder %s6413_s15, %s4650_s27 }
  0x28   : > { %4031 = vmatprep.subr.mxu1 %v893_v26  ;;  %4145 = vmatprep.subr.mxu0 %v1546_v27  ;;  %v4303_v3 = vpack.c.bf16 %v1543_v63, %v1542_v62  ;;  %p4646_p12 = scmp.ne.s32.totalorder %s6413_s15, %s4645_s16 }
  0x29   : > { %3723 = vmatmul.mubr.msk.f32.vlgmr.msra.gmra.mrb[0].mxu0 %vm612_vm3, %v556_v13  ;;  %3729 = vmatmul.mubr.msk.f32.vlgmr.msra.gmra.mrb[0].mxu1 %vm612_vm3, %v562_v14 }
  0x2a   : > { %714 = vmatprep.mubr.f32.mxu0 %v4725_v0  ;;  %750 = vmatprep.mubr.f32.mxu1 %v4725_v0  ;;  %p4647_p13 = pnand %p4646_p12, %p4841_p4 }
  0x2b   : > { %604 = vperm.xlu0 %4451, %v570_v16   ;;  %609 = vperm.xlu1 %4452, %v571_v19   ;;  %v892_v19 = vld [vmem:[%s6479_s4 + $0x38] sm:$0xff] }
  0x2c   : > { %4032 = vmatpush3.msra.mxu1 %v893_v26  ;;  %4146 = vmatpush3.msra.mxu0 %v1546_v27  ;;  %p4648_p0 = pneg %p4647_p13 }
  0x2d   : > { %3724 = vmatmul.mubr.msk.f32.gmra.mrb[2].mxu0 %vm612_vm3, %v557_v17  ;;  %3730 = vmatmul.mubr.msk.f32.gmra.mrb[2].mxu1 %vm612_vm3, %v563_v18  ;;  %v891_v18 = vld [vmem:[%s6479_s4 + $0x30] sm:$0xff] }
  0x2e   : > { %720 = vmatprep.mubr.f32.mxu0 %v4725_v0  ;;  %4280 = vmatprep.subr.bf16.mxu1 %v4279_v50 }
  0x2f   : > { %4296 = vmatprep.subr.bf16.mxu0 %v4295_v55 }
  0x31   : > { %3725 = vmatmul.mubr.msk.f32.gmra.mrb[4].mxu0 %vm612_vm3, %v558_v20  ;;  %v1544_v20 = vld [vmem:[%s6481_s6 + $0x30] sm:$0xff] }
  0x32   : > { %726 = vmatprep.mubr.f32.mxu0 %v4725_v0 }
  0x35   : > { %3726 = vmatmul.mubr.msk.f32.gmra.mrb[6].mxu0 %vm612_vm3, %v559_v21 }
  0x36   : > { %732 = vmatprep.mubr.f32.mxu0 %v4725_v0 }
  0x39   : > { %3727 = vmatmul.mubr.msk.f32.gmra.mrb[8].mxu0 %vm612_vm3, %v560_v22 }
  0x3a   : > { %738 = vmatprep.mubr.f32.mxu0 %v4725_v0 }
  0x3d   : > { %3728 = vmatmul.mubr.msk.f32.gmra.mrb[10].mxu0 %vm612_vm3, %v561_v23 }
  0x49   : > { %821 = vxpose.xlu0.b32.start.end [1/1] (short) %v554_v24, 128  ;;  %v4291_v24 = vpack.c.bf16 %v892_v19, %v891_v18  ;;  %v3455_v18 = vld [vmem:[%s6485_s10 + $0x8] sm:$0xff]  ;;  %v3454_v19 = vld [vmem:[%s6485_s10] sm:$0xff] }
  0x54   : > { %853 = vxpose.xlu1.b32.start.end [1/1] (short) %v555_v25, 128  ;;  %v1545_v25 = vld [vmem:[%s6481_s6 + $0x38] sm:$0xff] }
  0x55   : > { %v4307_v27 = vpack.c.bf16 %v1545_v25, %v1544_v20 }
  0x9c   : > { %v4933_v28 = vpop.permute.xlu0 %574  ;;  %v4939_v31 = vpop.permute.xlu1 %584 }
  0xa0   : > { %v4935_v29 = vpop.permute.xlu0 %579  ;;  %v4943_v33 = vpop.permute.xlu1 %589 }
  0xa6   : > { %v4937_v30 = vpop.permute.xlu0 %594  ;;  %v4951_v35 = vpop.permute.xlu1 %599 }
  0xaa   : > { %v4941_v32 = vpop.permute.xlu0 %604  ;;  %v4965_v38 = vpop.permute.xlu1 %609 }
  0xc9   : > { %v4945_v34 = vpop.trf.xlu0 }
  0xca   : > { %4033 = vmatprep.mubr.msk.f32.mxu1 %vm894_vm4, %v4945_v34  ;;  %4147 = vmatprep.mubr.msk.f32.mxu0 %vm894_vm4, %v4945_v34 }
  0xcd   : > { %v4953_v36 = vpop.trf.xlu0 }
  0xce   : > { %4034 = vmatmul.mubr.msk.f32.vlgmr.msra.gmra.mrb[4].mxu1 %vm894_vm4, %v4953_v36  ;;  %4148 = vmatmul.mubr.msk.f32.vlgmr.msra.gmra.mrb[12].mxu0 %vm894_vm4, %v4953_v36 }
  0xcf   : > { %4282 = vmatpush3.bf16.msra.mxu1 %v4279_v50  ;;  %4298 = vmatpush3.bf16.msra.mxu0 %v4295_v55 }
  0xd0   : > { %4284 = vmatprep.subr.bf16.mxu1 %v4283_v56  ;;  %4300 = vmatprep.subr.bf16.mxu0 %v4299_v60 }
  0xd1   : > { %v4959_v37 = vpop.trf.xlu0 }
  0xd2   : > { %4036 = vmatprep.mubr.msk.f32.mxu1 %vm894_vm4, %v4959_v37  ;;  %4150 = vmatprep.mubr.msk.f32.mxu0 %vm894_vm4, %v4959_v37 }
  0xd3   : > { %4286 = vmatpush3.bf16.msra.mxu1 %v4283_v56  ;;  %4302 = vmatpush3.bf16.msra.mxu0 %v4299_v60 }
  0xd4   : > { %v4973_v40 = vpop.trf.xlu1  ;;  %4288 = vmatprep.subr.bf16.mxu1 %v4287_v2  ;;  %4304 = vmatprep.subr.bf16.mxu0 %v4303_v3 }
  0xd5   : > { %v4967_v39 = vpop.trf.xlu0  ;;  %6574 = vst [vmem:[#allocation9_spill] sm:$0xff] %v4973_v40 }
  0xd6   : > { %4037 = vmatmul.mubr.msk.f32.gmra.mrb[6].mxu1 %vm894_vm4, %v4967_v39  ;;  %4151 = vmatmul.mubr.msk.f32.gmra.mrb[14].mxu0 %vm894_vm4, %v4967_v39 }
  0xd7   : > { %4290 = vmatpush3.bf16.msra.mxu1 %v4287_v2  ;;  %4306 = vmatpush3.bf16.msra.mxu0 %v4303_v3 }
  0xd8   : > { %v4981_v42 = vpop.trf.xlu1  ;;  %4292 = vmatprep.subr.bf16.mxu1 %v4291_v24  ;;  %4308 = vmatprep.subr.bf16.mxu0 %v4307_v27 }
  0xd9   : > { %v4975_v41 = vpop.trf.xlu0  ;;  %6575 = vst [vmem:[#allocation10_spill] sm:$0xff] %v4981_v42 }
  0xda   : > { %4039 = vmatprep.mubr.msk.f32.mxu1 %vm894_vm4, %v4975_v41  ;;  %4153 = vmatprep.mubr.msk.f32.mxu0 %vm894_vm4, %v4975_v41 }
  0xdb   : > { %4294 = vmatpush3.bf16.msra.mxu1 %v4291_v24  ;;  %4310 = vmatpush3.bf16.msra.mxu0 %v4307_v27 }
  0xdc   : > { %v4989_v44 = vpop.trf.xlu1 }
  0xdd   : > { %v4983_v43 = vpop.trf.xlu0  ;;  %6576 = vst [vmem:[#allocation11_spill] sm:$0xff] %v4989_v44 }
  0xde   : > { %4040 = vmatmul.mubr.msk.f32.gmra.mrb[8].mxu1 %vm894_vm4, %v4983_v43  ;;  %4154 = vmatmul.mubr.msk.f32.gmra.mrb[16].mxu0 %vm894_vm4, %v4983_v43 }
  0xe0   : > { %v4997_v46 = vpop.trf.xlu1 }
  0xe1   : > { %v4991_v45 = vpop.trf.xlu0  ;;  %6577 = vst [vmem:[#allocation12_spill] sm:$0xff] %v4997_v46 }
  0xe2   : > { %4042 = vmatprep.mubr.msk.f32.mxu1 %vm894_vm4, %v4991_v45  ;;  %4156 = vmatprep.mubr.msk.f32.mxu0 %vm894_vm4, %v4991_v45 }
  0xe4   : > { %v5041_v0 = vpop.trf.xlu1 }
  0xe5   : > { %v5017_v54 = vpop.trf.xlu0  ;;  %6578 = vst [vmem:[#allocation13_spill] sm:$0xff] %v5041_v0 }
  0xe6   : > { %4043 = vmatmul.mubr.msk.f32.gmra.mrb[10].mxu1 %vm894_vm4, %v5017_v54  ;;  %4157 = vmatmul.mubr.msk.f32.gmra.mrb[18].mxu0 %vm894_vm4, %v5017_v54 }
  0xe8   : > { %v5049_v4 = vpop.trf.xlu1 }
  0xe9   : > { %v5043_v1 = vpop.trf.xlu0  ;;  %6580 = vst [vmem:[#allocation15_spill] sm:$0xff] %v5049_v4 }
  0xea   : > { %6579 = vst [vmem:[#allocation14_spill] sm:$0xff] %v5043_v1  ;;  %4045 = vmatprep.mubr.msk.f32.mxu1 %vm894_vm4, %v5043_v1  ;;  %4159 = vmatprep.mubr.msk.f32.mxu0 %vm894_vm4, %v5043_v1 }
  0xec   : > { %v5057_v6 = vpop.trf.xlu1 }
  0xed   : > { %v5051_v5 = vpop.trf.xlu0  ;;  %6582 = vst [vmem:[#allocation17_spill] sm:$0xff] %v5057_v6 }
  0xee   : > { %6581 = vst [vmem:[#allocation16_spill] sm:$0xff] %v5051_v5  ;;  %4046 = vmatmul.mubr.msk.f32.gmra.mrb[12].mxu1 %vm894_vm4, %v5051_v5  ;;  %4160 = vmatmul.mubr.msk.f32.gmra.mrb[20].mxu0 %vm894_vm4, %v5051_v5 }
  0xf0   : > { %v5065_v8 = vpop.trf.xlu1 }
  0xf1   : > { %v5059_v7 = vpop.trf.xlu0  ;;  %6584 = vst [vmem:[#allocation19_spill] sm:$0xff] %v5065_v8 }
  0xf2   : > { %6583 = vst [vmem:[#allocation18_spill] sm:$0xff] %v5059_v7  ;;  %4048 = vmatprep.mubr.msk.f32.mxu1 %vm894_vm4, %v5059_v7  ;;  %4162 = vmatprep.mubr.msk.f32.mxu0 %vm894_vm4, %v5059_v7 }
  0xf4   : > { %v5073_v10 = vpop.trf.xlu1 }
  0xf5   : > { %v5067_v9 = vpop.trf.xlu0  ;;  %6586 = vst [vmem:[#allocation21_spill] sm:$0xff] %v5073_v10 }
  0xf6   : > { %6585 = vst [vmem:[#allocation20_spill] sm:$0xff] %v5067_v9  ;;  %4049 = vmatmul.mubr.msk.f32.gmra.mrb[14].mxu1 %vm894_vm4, %v5067_v9  ;;  %4163 = vmatmul.mubr.msk.f32.gmra.mrb[22].mxu0 %vm894_vm4, %v5067_v9 }
  0xf8   : > { %v5105_v26 = vpop.trf.xlu1 }
  0xf9   : > { %v5075_v11 = vpop.trf.xlu0  ;;  %6589 = vst [vmem:[#allocation24_spill] sm:$0xff] %v5105_v26 }
  0xfa   : > { %6587 = vst [vmem:[#allocation22_spill] sm:$0xff] %v5075_v11  ;;  %4051 = vmatprep.mubr.msk.f32.mxu1 %vm894_vm4, %v5075_v11  ;;  %4165 = vmatprep.mubr.msk.f32.mxu0 %vm894_vm4, %v5075_v11 }
  0xfc   : > { %v710_v12 = vpop.f32.mrb[0].mxu0  ;;  %v746_v13 = vpop.f32.mrb[0].mxu1 }
  0xfd   : > { %v711_v14 = vadd.f32 %v710_v12, %v4933_v28  ;;  %v5083_v15 = vadd.f32 %v746_v13, %v4941_v32  ;;  %v712_v16 = vpop.f32.mrb[1].mxu0  ;;  %v748_v17 = vpop.f32.mrb[1].mxu1 }
  0xfe   : > { %v713_v21 = vadd.f32 %v712_v16, %v4933_v28  ;;  %v5096_v22 = vadd.f32 %v748_v17, %v4941_v32  ;;  %v5098_v23 = vpop.trf.xlu0 }
  0xff   : > { %6588 = vst [vmem:[#allocation23_spill] sm:$0xff] %v5098_v23  ;;  %757 = vxpose.xlu0.b32.start [1/8] (short) %v711_v14, 128  ;;  %4052 = vmatmul.mubr.msk.f32.gmra.mrb[16].mxu1 %vm894_vm4, %v5098_v23 }
 0x100   : > { %v716_v47 = vpop.f32.mrb[2].mxu0  ;;  %789 = vxpose.xlu1.b32.start [1/8] (short) %v713_v21, 128  ;;  %v5107_v28 = vpop.f32.mrb[2].mxu1  ;;  %4166 = vmatmul.mubr.msk.f32.gmra.mrb[24].mxu0 %vm894_vm4, %v5098_v23 }
 0x101   : > { %v717_v32 = vadd.f32 %v716_v47, %v4935_v29  ;;  %v718_v48 = vpop.f32.mrb[3].mxu0  ;;  %v5112_v49 = vpop.f32.mrb[3].mxu1  ;;  %v753_v16 = vadd.f32 %v5107_v28, %v4965_v38 }
 0x102   : > { %v719_v50 = vadd.f32 %v718_v48, %v4935_v29  ;;  %v5115_v51 = vpop.trf.xlu0  ;;  %v5125_v29 = vpop.trf.xlu1 }
 0x103   : > { %6590 = vst [vmem:[#allocation25_spill] sm:$0xff] %v5115_v51  ;;  %758 = vxpose.xlu0.b32.cont [2/8] (short) %v717_v32, 128  ;;  %4054 = vmatprep.mubr.msk.f32.mxu1 %vm894_vm4, %v5115_v51  ;;  %6592 = vst [vmem:[#allocation27_spill] sm:$0xff] %v5125_v29 }
 0x104   : > { %v722_v52 = vpop.f32.mrb[4].mxu0  ;;  %790 = vxpose.xlu1.b32.cont [2/8] (short) %v719_v50, 128  ;;  %4168 = vmatprep.mubr.msk.f32.mxu0 %vm894_vm4, %v5115_v51 }
 0x105   : > { %v723_v53 = vadd.f32 %v722_v52, %v4939_v31  ;;  %v724_v55 = vpop.f32.mrb[5].mxu0 }
 0x106   : > { %v725_v56 = vadd.f32 %v724_v55, %v4939_v31  ;;  %v5123_v57 = vpop.trf.xlu0  ;;  %v5141_v62 = vpop.trf.xlu1 }
 0x107   : > { %6591 = vst [vmem:[#allocation26_spill] sm:$0xff] %v5123_v57  ;;  %759 = vxpose.xlu0.b32.cont [3/8] (short) %v723_v53, 128  ;;  %4055 = vmatmul.mubr.msk.f32.gmra.mrb[18].mxu1 %vm894_vm4, %v5123_v57  ;;  %6593 = vst [vmem:[#allocation28_spill] sm:$0xff] %v5141_v62 }
 0x108   : > { %v728_v58 = vpop.f32.mrb[6].mxu0  ;;  %791 = vxpose.xlu1.b32.cont [3/8] (short) %v725_v56, 128  ;;  %4169 = vmatmul.mubr.msk.f32.gmra.mrb[26].mxu0 %vm894_vm4, %v5123_v57 }
 0x109   : > { %v729_v59 = vadd.f32 %v728_v58, %v4943_v33  ;;  %v730_v60 = vpop.f32.mrb[7].mxu0  ;;  %4057 = vmatprep.mubr.msk.f32.mxu1 %vm894_vm4, %v4973_v40  ;;  %4171 = vmatprep.mubr.msk.f32.mxu0 %vm894_vm4, %v4973_v40 }
 0x10a   : > { %v731_v31 = vadd.f32 %v730_v60, %v4943_v33  ;;  %v5159_v14 = vpop.trf.xlu1 }
 0x10b   : > { %760 = vxpose.xlu0.b32.cont [4/8] (short) %v729_v59, 128  ;;  %4058 = vmatmul.mubr.msk.f32.gmra.mrb[20].mxu1 %vm894_vm4, %v4981_v42  ;;  %6594 = vst [vmem:[#allocation29_spill] sm:$0xff] %v5159_v14 }
 0x10c   : > { %v734_v61 = vpop.f32.mrb[8].mxu0  ;;  %792 = vxpose.xlu1.b32.cont [4/8] (short) %v731_v31, 128  ;;  %4172 = vmatmul.mubr.msk.f32.gmra.mrb[28].mxu0 %vm894_vm4, %v4981_v42 }
 0x10d   : > { %v735_v63 = vadd.f32 %v734_v61, %v4937_v30  ;;  %v736_v2 = vpop.f32.mrb[9].mxu0  ;;  %4060 = vmatprep.mubr.msk.f32.mxu1 %vm894_vm4, %v4989_v44  ;;  %4174 = vmatprep.mubr.msk.f32.mxu0 %vm894_vm4, %v4989_v44 }
 0x10e   : > { %v737_v33 = vadd.f32 %v736_v2, %v4937_v30 }
 0x10f   : > { %761 = vxpose.xlu0.b32.cont [5/8] (short) %v735_v63, 128  ;;  %4061 = vmatmul.mubr.msk.f32.gmra.mrb[22].mxu1 %vm894_vm4, %v4997_v46 }
 0x110   : > { %v740_v3 = vpop.f32.mrb[10].mxu0  ;;  %793 = vxpose.xlu1.b32.cont [5/8] (short) %v737_v33, 128  ;;  %4175 = vmatmul.mubr.msk.f32.gmra.mrb[30].mxu0 %vm894_vm4, %v4997_v46 }
 0x111   : > { %v741_v12 = vadd.f32 %v740_v3, %v4951_v35  ;;  %v742_v13 = vpop.f32.mrb[11].mxu0  ;;  %4063 = vmatprep.mubr.msk.f32.mxu1 %vm894_vm4, %v5041_v0  ;;  %4177 = vmatprep.mubr.msk.f32.mxu0 %vm894_vm4, %v5041_v0 }
 0x112   : > { %v743_v30 = vadd.f32 %v742_v13, %v4951_v35  ;;  %v5175_v35 = vpop.trf.xlu1 }
 0x113   : > { %762 = vxpose.xlu0.b32.cont [6/8] (short) %v741_v12, 128  ;;  %4064 = vmatmul.mubr.msk.f32.gmra.mrb[24].mxu1 %vm894_vm4, %v5049_v4  ;;  %6595 = vst [vmem:[#allocation30_spill] sm:$0xff] %v5175_v35 }
 0x114   : > { %794 = vxpose.xlu1.b32.cont [6/8] (short) %v743_v30, 128  ;;  %4178 = vmatmul.mubr.msk.f32.gmra.mrb[32].mxu0 %vm894_vm4, %v5049_v4 }
 0x115   : > { %4066 = vmatprep.mubr.msk.f32.mxu1 %vm894_vm4, %v5057_v6  ;;  %4180 = vmatprep.mubr.msk.f32.mxu0 %vm894_vm4, %v5057_v6 }
 0x116   : > { %v5193_v17 = vpop.trf.xlu1 }
 0x117   : > { %763 = vxpose.xlu0.b32.cont [7/8] (short) %v5083_v15, 128  ;;  %4067 = vmatmul.mubr.msk.f32.gmra.mrb[26].mxu1 %vm894_vm4, %v5065_v8  ;;  %v755_v15 = vadd.f32 %v5112_v49, %v4965_v38  ;;  %6596 = vst [vmem:[#allocation31_spill] sm:$0xff] %v5193_v17 }
 0x118   : > { %795 = vxpose.xlu1.b32.cont [7/8] (short) %v5096_v22, 128  ;;  %4181 = vmatmul.mubr.msk.f32.gmra.mrb[34].mxu0 %vm894_vm4, %v5065_v8 }
 0x119   : > { %4069 = vmatprep.mubr.msk.f32.mxu1 %vm894_vm4, %v5073_v10  ;;  %4183 = vmatprep.mubr.msk.f32.mxu0 %vm894_vm4, %v5073_v10 }
 0x11a   : > { %v5207_v38 = vpop.trf.xlu1 }
 0x11b   : > { %764 = vxpose.xlu0.b32.end [8/8] (short) %v753_v16, 128  ;;  %4070 = vmatmul.mubr.msk.f32.gmra.mrb[28].mxu1 %vm894_vm4, %v5105_v26  ;;  %6597 = vst [vmem:[#allocation32_spill] sm:$0xff] %v5207_v38 }
 0x11c   : > { %796 = vxpose.xlu1.b32.end [8/8] (short) %v755_v15, 128  ;;  %4184 = vmatmul.mubr.msk.f32.gmra.mrb[36].mxu0 %vm894_vm4, %v5105_v26 }
 0x11d   : > { %4072 = vmatprep.mubr.msk.f32.mxu1 %vm894_vm4, %v5125_v29  ;;  %4186 = vmatprep.mubr.msk.f32.mxu0 %vm894_vm4, %v5125_v29 }
 0x11f   : > { %4073 = vmatmul.mubr.msk.f32.gmra.mrb[30].mxu1 %vm894_vm4, %v5141_v62 }
 0x120   : > { %4187 = vmatmul.mubr.msk.f32.gmra.mrb[38].mxu0 %vm894_vm4, %v5141_v62  ;;  %4075 = vmatprep.mubr.msk.f32.mxu1 %vm894_vm4, %v5159_v14 }
 0x121   : > { %4189 = vmatprep.mubr.msk.f32.mxu0 %vm894_vm4, %v5159_v14 }
 0x123   : > { %4076 = vmatmul.mubr.msk.f32.gmra.mrb[32].mxu1 %vm894_vm4, %v5175_v35 }
 0x124   : > { %4190 = vmatmul.mubr.msk.f32.gmra.mrb[40].mxu0 %vm894_vm4, %v5175_v35  ;;  %4078 = vmatprep.mubr.msk.f32.mxu1 %vm894_vm4, %v5193_v17 }
 0x125   : > { %4192 = vmatprep.mubr.msk.f32.mxu0 %vm894_vm4, %v5193_v17 }
 0x127   : > { %4079 = vmatmul.mubr.msk.f32.gmra.mrb[34].mxu1 %vm894_vm4, %v5207_v38 }
 0x128   : > { %4193 = vmatmul.mubr.msk.f32.gmra.mrb[42].mxu0 %vm894_vm4, %v5207_v38 }
 0x15a   : > { %3463 = vperm.xlu1 %4452, %v3455_v18  }
 0x164   : > { %3458 = vperm.xlu0 %4451, %v3454_v19  }
 0x17f   : > { %v5223_v20 = vpop.trf.xlu0 }
 0x180   : > { %4097 = vmatprep.mubr.msk.f32.mxu1 %vm1216_vm5, %v5223_v20  ;;  %4211 = vmatprep.mubr.msk.f32.mxu0 %vm1216_vm5, %v5223_v20  ;;  %v5229_v21 = vpop.trf.xlu1 }
 0x181   : > { %6598 = vst [vmem:[#allocation33_spill] sm:$0xff] %v5229_v21 }
 0x183   : > { %v5231_v22 = vpop.trf.xlu0 }
 0x184   : > { %4098 = vmatmul.mubr.msk.f32.vlgmr.msra.gmra.mrb[4].mxu1 %vm1216_vm5, %v5231_v22  ;;  %4212 = vmatmul.mubr.msk.f32.vlgmr.msra.gmra.mrb[12].mxu0 %vm1216_vm5, %v5231_v22  ;;  %v5239_v25 = vpop.trf.xlu1 }
 0x185   : > { %6599 = vst [vmem:[#allocation34_spill] sm:$0xff] %v5239_v25 }
 0x187   : > { %v5237_v24 = vpop.trf.xlu0 }
 0x188   : > { %4100 = vmatprep.mubr.msk.f32.mxu1 %vm1216_vm5, %v5237_v24  ;;  %4214 = vmatprep.mubr.msk.f32.mxu0 %vm1216_vm5, %v5237_v24  ;;  %v5251_v47 = vpop.trf.xlu1 }
 0x189   : > { %6600 = vst [vmem:[#allocation35_spill] sm:$0xff] %v5251_v47 }
 0x18b   : > { %v5245_v27 = vpop.trf.xlu0 }
 0x18c   : > { %4101 = vmatmul.mubr.msk.f32.gmra.mrb[6].mxu1 %vm1216_vm5, %v5245_v27  ;;  %4215 = vmatmul.mubr.msk.f32.gmra.mrb[14].mxu0 %vm1216_vm5, %v5245_v27  ;;  %v5261_v48 = vpop.trf.xlu1 }
 0x18d   : > { %6601 = vst [vmem:[#allocation36_spill] sm:$0xff] %v5261_v48 }
 0x18f   : > { %v5253_v28 = vpop.trf.xlu0 }
 0x190   : > { %4103 = vmatprep.mubr.msk.f32.mxu1 %vm1216_vm5, %v5253_v28  ;;  %4217 = vmatprep.mubr.msk.f32.mxu0 %vm1216_vm5, %v5253_v28  ;;  %v5273_v50 = vpop.trf.xlu1 }
 0x191   : > { %6602 = vst [vmem:[#allocation37_spill] sm:$0xff] %v5273_v50 }
 0x193   : > { %v5259_v32 = vpop.trf.xlu0 }
 0x194   : > { %4104 = vmatmul.mubr.msk.f32.gmra.mrb[8].mxu1 %vm1216_vm5, %v5259_v32  ;;  %4218 = vmatmul.mubr.msk.f32.gmra.mrb[16].mxu0 %vm1216_vm5, %v5259_v32  ;;  %v5283_v55 = vpop.trf.xlu1 }
 0x195   : > { %6604 = vst [vmem:[#allocation39_spill] sm:$0xff] %v5283_v55 }
 0x197   : > { %v5267_v49 = vpop.trf.xlu0 }
 0x198   : > { %4106 = vmatprep.mubr.msk.f32.mxu1 %vm1216_vm5, %v5267_v49  ;;  %4220 = vmatprep.mubr.msk.f32.mxu0 %vm1216_vm5, %v5267_v49  ;;  %v5295_v58 = vpop.trf.xlu1 }
 0x199   : > { %6606 = vst [vmem:[#allocation41_spill] sm:$0xff] %v5295_v58 }
 0x19b   : > { %v5275_v52 = vpop.trf.xlu0 }
 0x19c   : > { %4107 = vmatmul.mubr.msk.f32.gmra.mrb[10].mxu1 %vm1216_vm5, %v5275_v52  ;;  %4221 = vmatmul.mubr.msk.f32.gmra.mrb[18].mxu0 %vm1216_vm5, %v5275_v52  ;;  %v5305_v31 = vpop.trf.xlu1 }
 0x19d   : > { %6609 = vst [vmem:[#allocation44_spill] sm:$0xff] %v5305_v31 }
 0x19f   : > { %v5281_v53 = vpop.trf.xlu0 }
 0x1a0   : > { %6603 = vst [vmem:[#allocation38_spill] sm:$0xff] %v5281_v53  ;;  %4109 = vmatprep.mubr.msk.f32.mxu1 %vm1216_vm5, %v5281_v53  ;;  %4223 = vmatprep.mubr.msk.f32.mxu0 %vm1216_vm5, %v5281_v53  ;;  %v5317_v63 = vpop.trf.xlu1 }
 0x1a1   : > { %6611 = vst [vmem:[#allocation46_spill] sm:$0xff] %v5317_v63 }
 0x1a3   : > { %v5289_v56 = vpop.trf.xlu0 }
 0x1a4   : > { %6605 = vst [vmem:[#allocation40_spill] sm:$0xff] %v5289_v56  ;;  %4110 = vmatmul.mubr.msk.f32.gmra.mrb[12].mxu1 %vm1216_vm5, %v5289_v56  ;;  %4224 = vmatmul.mubr.msk.f32.gmra.mrb[20].mxu0 %vm1216_vm5, %v5289_v56  ;;  %v5327_v3 = vpop.trf.xlu1 }
 0x1a5   : > { %6614 = vst [vmem:[#allocation49_spill] sm:$0xff] %v5327_v3 }
 0x1a7   : > { %v5297_v59 = vpop.trf.xlu0 }
 0x1a8   : > { %6607 = vst [vmem:[#allocation42_spill] sm:$0xff] %v5297_v59  ;;  %4112 = vmatprep.mubr.msk.f32.mxu1 %vm1216_vm5, %v5297_v59  ;;  %4226 = vmatprep.mubr.msk.f32.mxu0 %vm1216_vm5, %v5297_v59  ;;  %v5343_v13 = vpop.trf.xlu1 }
 0x1a9   : > { %6616 = vst [vmem:[#allocation51_spill] sm:$0xff] %v5343_v13 }
 0x1ab   : > { %v5303_v60 = vpop.trf.xlu0 }
 0x1ac   : > { %6608 = vst [vmem:[#allocation43_spill] sm:$0xff] %v5303_v60  ;;  %4113 = vmatmul.mubr.msk.f32.gmra.mrb[14].mxu1 %vm1216_vm5, %v5303_v60  ;;  %4227 = vmatmul.mubr.msk.f32.gmra.mrb[22].mxu0 %vm1216_vm5, %v5303_v60  ;;  %v5353_v30 = vpop.trf.xlu1 }
 0x1ad   : > { %6617 = vst [vmem:[#allocation52_spill] sm:$0xff] %v5353_v30 }
 0x1af   : > { %v5311_v61 = vpop.trf.xlu0 }
 0x1b0   : > { %6610 = vst [vmem:[#allocation45_spill] sm:$0xff] %v5311_v61  ;;  %4115 = vmatprep.mubr.msk.f32.mxu1 %vm1216_vm5, %v5311_v61  ;;  %4229 = vmatprep.mubr.msk.f32.mxu0 %vm1216_vm5, %v5311_v61  ;;  %v5367_v16 = vpop.trf.xlu1 }
 0x1b1   : > { %6618 = vst [vmem:[#allocation53_spill] sm:$0xff] %v5367_v16 }
 0x1b3   : > { %v5319_v2 = vpop.trf.xlu0 }
 0x1b4   : > { %6612 = vst [vmem:[#allocation47_spill] sm:$0xff] %v5319_v2  ;;  %4116 = vmatmul.mubr.msk.f32.gmra.mrb[16].mxu1 %vm1216_vm5, %v5319_v2  ;;  %4230 = vmatmul.mubr.msk.f32.gmra.mrb[24].mxu0 %vm1216_vm5, %v5319_v2  ;;  %v5381_v15 = vpop.trf.xlu1 }
 0x1b5   : > { %6619 = vst [vmem:[#allocation54_spill] sm:$0xff] %v5381_v15 }
 0x1b7   : > { %v5325_v33 = vpop.trf.xlu0 }
 0x1b8   : > { %6613 = vst [vmem:[#allocation48_spill] sm:$0xff] %v5325_v33  ;;  %4118 = vmatprep.mubr.msk.f32.mxu1 %vm1216_vm5, %v5325_v33  ;;  %4232 = vmatprep.mubr.msk.f32.mxu0 %vm1216_vm5, %v5325_v33  ;;  %v5395_v18 = vpop.trf.xlu1 }
 0x1b9   : > { %6620 = vst [vmem:[#allocation55_spill] sm:$0xff] %v5395_v18 }
 0x1bb   : > { %v5333_v12 = vpop.trf.xlu0 }
 0x1bc   : > { %6615 = vst [vmem:[#allocation50_spill] sm:$0xff] %v5333_v12  ;;  %4119 = vmatmul.mubr.msk.f32.gmra.mrb[18].mxu1 %vm1216_vm5, %v5333_v12  ;;  %4233 = vmatmul.mubr.msk.f32.gmra.mrb[26].mxu0 %vm1216_vm5, %v5333_v12  ;;  %v5409_v19 = vpop.trf.xlu1 }
 0x1bd   : > { %4121 = vmatprep.mubr.msk.f32.mxu1 %vm1216_vm5, %v5229_v21  ;;  %4235 = vmatprep.mubr.msk.f32.mxu0 %vm1216_vm5, %v5229_v21  ;;  %6621 = vst [vmem:[#allocation56_spill] sm:$0xff] %v5409_v19 }
 0x1c0   : > { %4122 = vmatmul.mubr.msk.f32.gmra.mrb[20].mxu1 %vm1216_vm5, %v5239_v25  ;;  %4236 = vmatmul.mubr.msk.f32.gmra.mrb[28].mxu0 %vm1216_vm5, %v5239_v25 }
 0x1c1   : > { %4124 = vmatprep.mubr.msk.f32.mxu1 %vm1216_vm5, %v5251_v47  ;;  %4238 = vmatprep.mubr.msk.f32.mxu0 %vm1216_vm5, %v5251_v47 }
 0x1c4   : > { %4125 = vmatmul.mubr.msk.f32.gmra.mrb[22].mxu1 %vm1216_vm5, %v5261_v48  ;;  %4239 = vmatmul.mubr.msk.f32.gmra.mrb[30].mxu0 %vm1216_vm5, %v5261_v48 }
 0x1c5   : > { %4127 = vmatprep.mubr.msk.f32.mxu1 %vm1216_vm5, %v5273_v50  ;;  %4241 = vmatprep.mubr.msk.f32.mxu0 %vm1216_vm5, %v5273_v50 }
 0x1c8   : > { %4128 = vmatmul.mubr.msk.f32.gmra.mrb[24].mxu1 %vm1216_vm5, %v5283_v55  ;;  %4242 = vmatmul.mubr.msk.f32.gmra.mrb[32].mxu0 %vm1216_vm5, %v5283_v55 }
 0x1c9   : > { %4130 = vmatprep.mubr.msk.f32.mxu1 %vm1216_vm5, %v5295_v58  ;;  %4244 = vmatprep.mubr.msk.f32.mxu0 %vm1216_vm5, %v5295_v58 }
 0x1cc   : > { %4131 = vmatmul.mubr.msk.f32.gmra.mrb[26].mxu1 %vm1216_vm5, %v5305_v31  ;;  %4245 = vmatmul.mubr.msk.f32.gmra.mrb[34].mxu0 %vm1216_vm5, %v5305_v31 }
 0x1cd   : > { %4133 = vmatprep.mubr.msk.f32.mxu1 %vm1216_vm5, %v5317_v63  ;;  %4247 = vmatprep.mubr.msk.f32.mxu0 %vm1216_vm5, %v5317_v63 }
 0x1d0   : > { %4134 = vmatmul.mubr.msk.f32.gmra.mrb[28].mxu1 %vm1216_vm5, %v5327_v3  ;;  %4248 = vmatmul.mubr.msk.f32.gmra.mrb[36].mxu0 %vm1216_vm5, %v5327_v3 }
 0x1d1   : > { %4136 = vmatprep.mubr.msk.f32.mxu1 %vm1216_vm5, %v5343_v13  ;;  %4250 = vmatprep.mubr.msk.f32.mxu0 %vm1216_vm5, %v5343_v13 }
 0x1d4   : > { %4137 = vmatmul.mubr.msk.f32.gmra.mrb[30].mxu1 %vm1216_vm5, %v5353_v30  ;;  %4251 = vmatmul.mubr.msk.f32.gmra.mrb[38].mxu0 %vm1216_vm5, %v5353_v30 }
 0x1d5   : > { %4139 = vmatprep.mubr.msk.f32.mxu1 %vm1216_vm5, %v5367_v16  ;;  %4253 = vmatprep.mubr.msk.f32.mxu0 %vm1216_vm5, %v5367_v16 }
 0x1d8   : > { %4140 = vmatmul.mubr.msk.f32.gmra.mrb[32].mxu1 %vm1216_vm5, %v5381_v15  ;;  %4254 = vmatmul.mubr.msk.f32.gmra.mrb[40].mxu0 %vm1216_vm5, %v5381_v15 }
 0x1d9   : > { %4142 = vmatprep.mubr.msk.f32.mxu1 %vm1216_vm5, %v5395_v18  ;;  %4256 = vmatprep.mubr.msk.f32.mxu0 %vm1216_vm5, %v5395_v18 }
 0x1dc   : > { %4143 = vmatmul.mubr.msk.f32.gmra.mrb[34].mxu1 %vm1216_vm5, %v5409_v19  ;;  %4257 = vmatmul.mubr.msk.f32.gmra.mrb[42].mxu0 %vm1216_vm5, %v5409_v19 }
 0x257   : > { %v4099_v38 = vpop.f32.mrb[4].mxu1  ;;  %v4213_v17 = vpop.f32.mrb[12].mxu0 }
 0x258   : > { %v1998_v35 = vsel %vm1216_vm5, %v4099_v38, -inf  ;;  %v2430_v14 = vsel %vm894_vm4, %v4213_v17, -inf  ;;  %v1379_v15 = vpop.f32.mrb[5].mxu1  ;;  %v1838_v16 = vpop.f32.mrb[13].mxu0 }
 0x259   : > { %v1997_v62 = vsel %vm1216_vm5, %v1379_v15, -inf  ;;  %v2429_v18 = vsel %vm894_vm4, %v1838_v16, -inf }
 0x25a   : > { %v1999_v29 = vmax.f32 %v1997_v62, %v1998_v35  ;;  %v2431_v30 = vmax.f32 %v2429_v18, %v2430_v14 }
 0x25c   : > { %v2000_v13 = vrot.slane %v1999_v29, 4  ;;  %v2432_v26 = vrot.slane %v2431_v30, 4 }
 0x25e   : > { %v2001_v10 = vmax.f32 %v1999_v29, %v2000_v13  ;;  %v2433_v3 = vmax.f32 %v2431_v30, %v2432_v26 }
 0x25f   : > { %v5419_v63 = vpop.f32.mrb[6].mxu1  ;;  %v5421_v19 = vpop.f32.mrb[14].mxu0 }
 0x260   : > { %v2002_v8 = vrot.slane %v2001_v10, 2  ;;  %v2434_v6 = vrot.slane %v2433_v3, 2  ;;  %v2007_v31 = vsel %vm1216_vm5, %v5419_v63, -inf  ;;  %v2439_v58 = vsel %vm894_vm4, %v5421_v19, -inf  ;;  %v5427_v4 = vpop.f32.mrb[7].mxu1  ;;  %v5429_v62 = vpop.f32.mrb[15].mxu0 }
 0x261   : > { %v2006_v29 = vsel %vm1216_vm5, %v5427_v4, -inf  ;;  %v2438_v26 = vsel %vm894_vm4, %v5429_v62, -inf }
 0x262   : > { %v2003_v14 = vmax.f32 %v2001_v10, %v2002_v8  ;;  %v2435_v35 = vmax.f32 %v2433_v3, %v2434_v6  ;;  %v2008_v13 = vmax.f32 %v2006_v29, %v2007_v31  ;;  %v2440_v30 = vmax.f32 %v2438_v26, %v2439_v58 }
 0x264   : > { %v2004_v18 = vrot.slane %v2003_v14, 1  ;;  %v2436_v0 = vrot.slane %v2435_v35, 1  ;;  %v2009_v55 = vrot.slane %v2008_v13, 4  ;;  %v2441_v50 = vrot.slane %v2440_v30, 4 }
 0x266   : > { %v2005_v46 = vmax.f32 %v2003_v14, %v2004_v18  ;;  %v2437_v44 = vmax.f32 %v2435_v35, %v2436_v0  ;;  %v2010_v48 = vmax.f32 %v2008_v13, %v2009_v55  ;;  %v2442_v47 = vmax.f32 %v2440_v30, %v2441_v50 }
 0x267   : > { %v5435_v42 = vpop.f32.mrb[8].mxu1  ;;  %v5437_v40 = vpop.f32.mrb[16].mxu0 }
 0x268   : > { %v2141_v25 = vsub.f32 %v1379_v15, %v2005_v46  ;;  %v2142_v21 = vsub.f32 %v4099_v38, %v2005_v46  ;;  %v2573_v57 = vsub.f32 %v1838_v16, %v2437_v44  ;;  %v2574_v51 = vsub.f32 %v4213_v17, %v2437_v44  ;;  %v5439_v8 = vpop.f32.mrb[9].mxu1  ;;  %v5441_v6 = vpop.f32.mrb[17].mxu0 }
 0x269   : > { %v2011_v10 = vrot.slane %v2010_v48, 2  ;;  %v2443_v58 = vrot.slane %v2442_v47, 2  ;;  %v2016_v31 = vsel %vm1216_vm5, %v5435_v42, -inf  ;;  %v2448_v0 = vsel %vm894_vm4, %v5437_v40, -inf }
 0x26a   : > { %v2173_v50 = vmul.f32 1.442695, %v2141_v25  ;;  %v2175_v55 = vmul.f32 1.442695, %v2142_v21  ;;  %v2605_v3 = vmul.f32 1.442695, %v2573_v57 }
 0x26b   : > { %v2607_v29 = vmul.f32 1.442695, %v2574_v51  ;;  %v2012_v15 = vmax.f32 %v2010_v48, %v2011_v10  ;;  %v2444_v46 = vmax.f32 %v2442_v47, %v2443_v58  ;;  %v2015_v44 = vsel %vm1216_vm5, %v5439_v8, -inf }
 0x26c   : > { %4453 = vpow2.f32 %v2173_v50  ;;  %v2017_v17 = vmax.f32 %v2015_v44, %v2016_v31  ;;  %v2447_v38 = vsel %vm894_vm4, %v5441_v6, -inf }
 0x26d   : > { %4455 = vpow2.f32 %v2175_v55  ;;  %v2013_v16 = vrot.slane %v2012_v15, 1  ;;  %v2445_v26 = vrot.slane %v2444_v46, 1  ;;  %v2449_v14 = vmax.f32 %v2447_v38, %v2448_v0 }
 0x26e   : > { %4457 = vpow2.f32 %v2605_v3  ;;  %v2018_v35 = vrot.slane %v2017_v17, 4 }
 0x26f   : > { %4459 = vpow2.f32 %v2607_v29  ;;  %v2014_v21 = vmax.f32 %v2012_v15, %v2013_v16  ;;  %v2446_v57 = vmax.f32 %v2444_v46, %v2445_v26  ;;  %v2450_v51 = vrot.slane %v2449_v14, 4  ;;  %v5451_v25 = vpop.f32.mrb[10].mxu1  ;;  %v5453_v47 = vpop.f32.mrb[18].mxu0 }
 0x270   : > { %v2019_v48 = vmax.f32 %v2017_v17, %v2018_v35  ;;  %v2025_v13 = vsel %vm1216_vm5, %v5451_v25, -inf  ;;  %v2457_v30 = vsel %vm894_vm4, %v5453_v47, -inf  ;;  %v5459_v18 = vpop.f32.mrb[11].mxu1  ;;  %v5461_v10 = vpop.f32.mrb[19].mxu0 }
 0x271   : > { %v2143_v58 = vsub.f32 %v5427_v4, %v2014_v21  ;;  %v2144_v31 = vsub.f32 %v5419_v63, %v2014_v21  ;;  %v2575_v0 = vsub.f32 %v5429_v62, %v2446_v57  ;;  %v2576_v50 = vsub.f32 %v5421_v19, %v2446_v57 }
 0x272   : > { %v2020_v55 = vrot.slane %v2019_v48, 2  ;;  %v2451_v3 = vmax.f32 %v2449_v14, %v2450_v51  ;;  %v2024_v29 = vsel %vm1216_vm5, %v5459_v18, -inf  ;;  %v2456_v15 = vsel %vm894_vm4, %v5461_v10, -inf }
 0x273   : > { %v2177_v46 = vmul.f32 1.442695, %v2143_v58  ;;  %v2179_v44 = vmul.f32 1.442695, %v2144_v31  ;;  %v2609_v17 = vmul.f32 1.442695, %v2575_v0  ;;  %v2026_v38 = vmax.f32 %v2024_v29, %v2025_v13 }
 0x274   : > { %v2611_v16 = vmul.f32 1.442695, %v2576_v50  ;;  %v2021_v4 = vmax.f32 %v2019_v48, %v2020_v55  ;;  %v2452_v26 = vrot.slane %v2451_v3, 2  ;;  %v2458_v63 = vmax.f32 %v2456_v15, %v2457_v30 }
 0x275   : > { %4461 = vpow2.f32 %v2177_v46  ;;  %v2027_v62 = vrot.slane %v2026_v38, 4 }
 0x276   : > { %v5471_v35 = vpop.eup %4453  ;;  %4463 = vpow2.f32 %v2179_v44  ;;  %v2022_v19 = vrot.slane %v2021_v4, 1  ;;  %v2453_v14 = vmax.f32 %v2451_v3, %v2452_v26  ;;  %v2459_v21 = vrot.slane %v2458_v63, 4 }
 0x277   : > { %v5473_v57 = vpop.eup %4455  ;;  %v2237_v51 = vsel %vm1216_vm5, %v5471_v35, 0.0  ;;  %4465 = vpow2.f32 %v2609_v17  ;;  %v2028_v58 = vmax.f32 %v2026_v38, %v2027_v62  ;;  %v5477_v13 = vpop.f32.mrb[12].mxu1 }
 0x278   : > { %v5479_v48 = vpop.f32.mrb[20].mxu0  ;;  %v5481_v30 = vpop.eup %4457  ;;  %v2238_v31 = vsel %vm1216_vm5, %v5473_v57, 0.0  ;;  %4467 = vpow2.f32 %v2611_v16  ;;  %v2023_v0 = vmax.f32 %v2021_v4, %v2022_v19  ;;  %v2454_v50 = vrot.slane %v2453_v14, 1 }
 0x279   : > { %v5485_v55 = vpop.f32.mrb[13].mxu1  ;;  %v5487_v3 = vpop.f32.mrb[21].mxu0  ;;  %v2239_v15 = vadd.f32 %v2238_v31, %v2237_v51  ;;  %v2669_v46 = vsel %vm894_vm4, %v5481_v30, 0.0  ;;  %v2029_v44 = vrot.slane %v2028_v58, 2  ;;  %v2460_v17 = vmax.f32 %v2458_v63, %v2459_v21 }
 0x27a   : > { %v5489_v29 = vpop.eup %4459  ;;  %v2145_v26 = vsub.f32 %v5439_v8, %v2023_v0  ;;  %v2146_v16 = vsub.f32 %v5435_v42, %v2023_v0  ;;  %v2455_v4 = vmax.f32 %v2453_v14, %v2454_v50  ;;  %v2034_v42 = vsel %vm1216_vm5, %v5477_v13, -inf }
 0x27b   : > { %v2670_v38 = vsel %vm894_vm4, %v5489_v29, 0.0  ;;  %v2240_v62 = vrot.slane %v2239_v15, 4  ;;  %v2030_v12 = vmax.f32 %v2028_v58, %v2029_v44  ;;  %v2461_v33 = vrot.slane %v2460_v17, 2 }
 0x27c   : > { %v2671_v19 = vadd.f32 %v2670_v38, %v2669_v46  ;;  %v2181_v23 = vmul.f32 1.442695, %v2145_v26  ;;  %v2183_v11 = vmul.f32 1.442695, %v2146_v16  ;;  %v2577_v51 = vsub.f32 %v5441_v6, %v2455_v4 }
 0x27d   : > { %v2578_v31 = vsub.f32 %v5437_v40, %v2455_v4  ;;  %v2241_v2 = vadd.f32 %v2240_v62, %v2239_v15  ;;  %v2031_v21 = vrot.slane %v2030_v12, 1  ;;  %v2462_v61 = vmax.f32 %v2460_v17, %v2461_v33 }
 0x27e   : > { %v2672_v63 = vrot.slane %v2671_v19, 4  ;;  %4469 = vpow2.f32 %v2181_v23  ;;  %v2613_v9 = vmul.f32 1.442695, %v2577_v51  ;;  %v2466_v15 = vsel %vm894_vm4, %v5479_v48, -inf }
 0x27f   : > { %v2615_v8 = vmul.f32 1.442695, %v2578_v31  ;;  %v5501_v14 = vpop.eup %4461  ;;  %v2242_v58 = vrot.slane %v2241_v2, 2  ;;  %4471 = vpow2.f32 %v2183_v11  ;;  %v2032_v50 = vmax.f32 %v2030_v12, %v2031_v21  ;;  %v5503_v46 = vpop.f32.mrb[14].mxu1 }
 0x280   : > { %v2673_v0 = vadd.f32 %v2672_v63, %v2671_v19  ;;  %6622 = vst [vmem:[#allocation57_spill] sm:$0xff] %v5503_v46  ;;  %v5505_v6 = vpop.f32.mrb[22].mxu0  ;;  %v5507_v40 = vpop.eup %4463  ;;  %v2246_v23 = vsel %vm1216_vm5, %v5501_v14, 0.0  ;;  %4473 = vpow2.f32 %v2613_v9  ;;  %v2463_v33 = vrot.slane %v2462_v61, 1 }
 0x281   : > { %6623 = vst [vmem:[#allocation58_spill] sm:$0xff] %v5505_v6  ;;  %v5513_v44 = vpop.f32.mrb[15].mxu1  ;;  %v5515_v17 = vpop.f32.mrb[23].mxu0  ;;  %v2243_v12 = vadd.f32 %v2242_v58, %v2241_v2  ;;  %v2247_v26 = vsel %vm1216_vm5, %v5507_v40, 0.0  ;;  %4475 = vpow2.f32 %v2615_v8  ;;  %v2147_v62 = vsub.f32 %v5459_v18, %v2032_v50 }
 0x282   : > { %6624 = vst [vmem:[#allocation59_spill] sm:$0xff] %v5515_v17  ;;  %v5517_v11 = vpop.eup %4465  ;;  %v2674_v38 = vrot.slane %v2673_v0, 2  ;;  %v2248_v4 = vadd.f32 %v2247_v26, %v2246_v23  ;;  %v2148_v19 = vsub.f32 %v5451_v25, %v2032_v50  ;;  %v2464_v63 = vmax.f32 %v2462_v61, %v2463_v33 }
 0x283   : > { %v5521_v16 = vpop.eup %4467  ;;  %v2678_v9 = vsel %vm894_vm4, %v5517_v11, 0.0  ;;  %v2244_v51 = vrot.slane %v2243_v12, 1  ;;  %v2185_v7 = vmul.f32 1.442695, %v2147_v62  ;;  %v2033_v25 = vsel %vm1216_vm5, %v5485_v55, -inf }
 0x284   : > { %v2675_v31 = vadd.f32 %v2674_v38, %v2673_v0  ;;  %v2679_v2 = vsel %vm894_vm4, %v5521_v16, 0.0  ;;  %v2249_v21 = vrot.slane %v2248_v4, 4  ;;  %v2187_v8 = vmul.f32 1.442695, %v2148_v19 }
 0x285   : > { %v2680_v58 = vadd.f32 %v2679_v2, %v2678_v9  ;;  %v2245_v60 = vadd.f32 %v2244_v51, %v2243_v12  ;;  %v2579_v23 = vsub.f32 %v5461_v10, %v2464_v63  ;;  %v2580_v26 = vsub.f32 %v5453_v47, %v2464_v63 }
 0x286   : > { %v2676_v59 = vrot.slane %v2675_v31, 1  ;;  %v2250_v5 = vadd.f32 %v2249_v21, %v2248_v4  ;;  %4477 = vpow2.f32 %v2185_v7  ;;  %v2035_v47 = vmax.f32 %v2033_v25, %v2034_v42 }
 0x287   : > { %v2681_v18 = vrot.slane %v2680_v58, 4  ;;  %4479 = vrcp.f32 %v2245_v60  ;;  %v2617_v50 = vmul.f32 1.442695, %v2579_v23  ;;  %v2619_v61 = vmul.f32 1.442695, %v2580_v26  ;;  %v5533_v33 = vpop.f32.mrb[16].mxu1 }
 0x288   : > { %v2677_v0 = vadd.f32 %v2676_v59, %v2675_v31  ;;  %v5535_v38 = vpop.f32.mrb[24].mxu0  ;;  %v5537_v12 = vpop.eup %4469  ;;  %v2251_v9 = vrot.slane %v2250_v5, 2  ;;  %4481 = vpow2.f32 %v2187_v8  ;;  %v2465_v60 = vsel %vm894_vm4, %v5487_v3, -inf }
 0x289   : > { %v2682_v10 = vadd.f32 %v2681_v18, %v2680_v58  ;;  %v5539_v4 = vpop.f32.mrb[17].mxu1  ;;  %v5541_v7 = vpop.f32.mrb[25].mxu0  ;;  %v2255_v59 = vsel %vm1216_vm5, %v5537_v12, 0.0  ;;  %v2043_v19 = vsel %vm1216_vm5, %v5503_v46, -inf  ;;  %v2036_v8 = vrot.slane %v2035_v47, 4 }
 0x28a   : > { %v5543_v62 = vpop.eup %4471  ;;  %4483 = vrcp.f32 %v2677_v0  ;;  %v2252_v31 = vadd.f32 %v2251_v9, %v2250_v5  ;;  %v2467_v25 = vmax.f32 %v2465_v60, %v2466_v15 }
 0x28b   : > { %v5551_v51 = vpop.eup %4473  ;;  %v2683_v42 = vrot.slane %v2682_v10, 2  ;;  %v2256_v2 = vsel %vm1216_vm5, %v5543_v62, 0.0  ;;  %4485 = vpow2.f32 %v2617_v50  ;;  %v2037_v9 = vmax.f32 %v2035_v47, %v2036_v8 }
 0x28c   : > { %v5555_v63 = vpop.eup %4475  ;;  %v2257_v21 = vadd.f32 %v2256_v2, %v2255_v59  ;;  %v2687_v58 = vsel %vm894_vm4, %v5551_v51, 0.0  ;;  %4487 = vpow2.f32 %v2619_v61  ;;  %v2253_v23 = vrot.slane %v2252_v31, 1 }
 0x28d   : > { %v2684_v26 = vadd.f32 %v2683_v42, %v2682_v10  ;;  %v2688_v18 = vsel %vm894_vm4, %v5555_v63, 0.0  ;;  %v5563_v50 = vsel %vm894_vm4, %v5505_v6, -inf  ;;  %v2468_v2 = vrot.slane %v2467_v25, 4 }
 0x28e   : > { %v2258_v5 = vrot.slane %v2257_v21, 4  ;;  %v2689_v0 = vadd.f32 %v2688_v18, %v2687_v58  ;;  %v2254_v1 = vadd.f32 %v2253_v23, %v2252_v31  ;;  %v2042_v61 = vsel %vm1216_vm5, %v5513_v44, -inf }
 0x28f   : > { %v2685_v59 = vrot.slane %v2684_v26, 1  ;;  %v2038_v10 = vrot.slane %v2037_v9, 2  ;;  %v5567_v42 = vmax.f32 %v2042_v61, %v2043_v19  ;;  %v5569_v46 = vpop.f32.mrb[18].mxu1  ;;  %v5571_v15 = vpop.f32.mrb[26].mxu0  ;;  %v5575_v58 = vmax.f32 %v2467_v25, %v2468_v2 }
 0x290   : > { %v2259_v56 = vadd.f32 %v2258_v5, %v2257_v21  ;;  %v2690_v53 = vrot.slane %v2689_v0, 4  ;;  %6625 = vst [vmem:[#allocation60_spill] sm:$0xff] %v5569_v46  ;;  %6626 = vst [vmem:[#allocation61_spill] sm:$0xff] %v5571_v15  ;;  %v5573_v47 = vpop.eup %4477  ;;  %4489 = vrcp.f32 %v2254_v1  ;;  %v5579_v31 = vsel %vm894_vm4, %v5515_v17, -inf  ;;  %v5581_v8 = vpop.f32.mrb[19].mxu1 }
 0x291   : > { %v2686_v60 = vadd.f32 %v2685_v59, %v2684_v26  ;;  %6627 = vst [vmem:[#allocation62_spill] sm:$0xff] %v5581_v8  ;;  %v5583_v21 = vpop.f32.mrb[27].mxu0  ;;  %v4480_v19 = vpop.eup %4479  ;;  %v2264_v5 = vsel %vm1216_vm5, %v5573_v47, 0.0  ;;  %v2039_v61 = vmax.f32 %v2037_v9, %v2038_v10 }
 0x292   : > { %6628 = vst [vmem:[#allocation63_spill] sm:$0xff] %v5583_v21  ;;  %v2260_v23 = vrot.slane %v2259_v56, 2  ;;  %v2691_v18 = vadd.f32 %v2690_v53, %v2689_v0  ;;  %v5587_v15 = vpop.eup %4481  ;;  %v2397_v1 = vmul.f32 %v4480_v19, %v5471_v35  ;;  %v2398_v26 = vmul.f32 %v4480_v19, %v5473_v57 }
 0x293   : > { %4491 = vrcp.f32 %v2686_v60  ;;  %v2265_v21 = vsel %vm1216_vm5, %v5587_v15, 0.0  ;;  %v2040_v53 = vrot.slane %v2039_v61, 1  ;;  %v5594_v0 = vpop.f32.mrb[20].mxu1  ;;  %v5596_v6 = vpop.f32.mrb[28].mxu0 }
 0x294   : > { %v4484_v59 = vpop.eup %4483  ;;  %v2261_v2 = vadd.f32 %v2260_v23, %v2259_v56  ;;  %v2692_v8 = vrot.slane %v2691_v18, 2  ;;  %6629 = vst [vmem:[#allocation64_spill] sm:$0xff] %v5594_v0  ;;  %6630 = vst [vmem:[#allocation65_spill] sm:$0xff] %v5596_v6  ;;  %v2861_v35 = vmul.f32 %v2397_v1, %v5223_v20  ;;  %v2862_v57 = vmul.f32 %v2398_v26, %v5231_v22  ;;  %v5604_v56 = vpop.f32.mrb[21].mxu1 }
 0x295   : > { %v5598_v9 = vpop.eup %4485  ;;  %v2829_v10 = vmul.f32 %v4484_v59, %v5481_v30  ;;  %v2830_v60 = vmul.f32 %v4484_v59, %v5489_v29  ;;  %6631 = vst [vmem:[#allocation66_spill] sm:$0xff] %v5604_v56  ;;  %v5606_v19 = vpop.f32.mrb[29].mxu0  ;;  %v2266_v17 = vadd.f32 %v2265_v21, %v2264_v5  ;;  %v5624_v5 = vmax.f32 %v2039_v61, %v2040_v53 }
 0x296   : > { %6632 = vst [vmem:[#allocation67_spill] sm:$0xff] %v5606_v19  ;;  %v5608_v23 = vpop.eup %4487  ;;  %v2262_v25 = vrot.slane %v2261_v2, 1  ;;  %v2693_v0 = vadd.f32 %v2692_v8, %v2691_v18  ;;  %v2696_v6 = vsel %vm894_vm4, %v5598_v9, 0.0  ;;  %v2893_v20 = vsel %vm1216_vm5, %v2861_v35, 0.0 }
 0x297   : > { %v2894_v22 = vsel %vm1216_vm5, %v2862_v57, 0.0  ;;  %v3037_v30 = vmul.f32 %v2829_v10, %v4945_v34  ;;  %v3038_v29 = vmul.f32 %v2830_v60, %v4953_v36  ;;  %v2267_v19 = vrot.slane %v2266_v17, 4  ;;  %v5616_v56 = vpop.f32.mrb[22].mxu1  ;;  %v5618_v46 = vpop.f32.mrb[30].mxu0 }
 0x298   : > { %v2895_v1 = vadd.f32 %v2894_v22, %v2893_v20  ;;  %v2263_v26 = vadd.f32 %v2262_v25, %v2261_v2  ;;  %v2694_v59 = vrot.slane %v2693_v0, 1  ;;  %v2697_v18 = vsel %vm894_vm4, %v5608_v23, 0.0  ;;  %v5626_v34 = vpop.f32.mrb[23].mxu1  ;;  %v5628_v36 = vpop.f32.mrb[31].mxu0 }
 0x299   : > { %v3069_v8 = vsel %vm894_vm4, %v3037_v30, 0.0  ;;  %v3070_v21 = vsel %vm894_vm4, %v3038_v29, 0.0  ;;  %6633 = vst [vmem:[#allocation68_spill] sm:$0xff] %v5628_v36  ;;  %v2268_v10 = vadd.f32 %v2267_v19, %v2266_v17  ;;  %v2698_v60 = vadd.f32 %v2697_v18, %v2696_v6 }
 0x29a   : > { %v2896_v25 = vrot.slane %v2895_v1, 4  ;;  %v3071_v2 = vadd.f32 %v3070_v21, %v3069_v8  ;;  %4493 = vrcp.f32 %v2263_v26  ;;  %v2695_v35 = vadd.f32 %v2694_v59, %v2693_v0  ;;  %v4490_v57 = vpop.eup %4489 }
 0x29b   : > { %v2149_v20 = vsub.f32 %v5485_v55, %v5624_v5  ;;  %v2150_v22 = vsub.f32 %v5477_v13, %v5624_v5  ;;  %v2399_v53 = vmul.f32 %v4490_v57, %v5501_v14  ;;  %v2400_v29 = vmul.f32 %v4490_v57, %v5507_v40  ;;  %v5636_v36 = vpop.f32.mrb[24].mxu1  ;;  %v5638_v8 = vpop.f32.mrb[32].mxu0 }
 0x29c   : > { %v2897_v30 = vadd.f32 %v2896_v25, %v2895_v1  ;;  %v3072_v61 = vrot.slane %v3071_v2, 4  ;;  %4495 = vrcp.f32 %v2695_v35  ;;  %v2269_v17 = vrot.slane %v2268_v10, 2  ;;  %v5640_v26 = vpop.f32.mrb[25].mxu1  ;;  %v5642_v55 = vpop.f32.mrb[33].mxu0 }
 0x29d   : > { %v4492_v0 = vpop.eup %4491  ;;  %v2699_v6 = vrot.slane %v2698_v60, 4  ;;  %v2189_v19 = vmul.f32 1.442695, %v2149_v20  ;;  %6634 = vst [vmem:[#allocation69_spill] sm:$0xff] %v5640_v26  ;;  %6635 = vst [vmem:[#allocation70_spill] sm:$0xff] %v5642_v55  ;;  %v2863_v59 = vmul.f32 %v2399_v53, %v5237_v24  ;;  %v2864_v14 = vmul.f32 %v2400_v29, %v5245_v27 }
 0x29e   : > { %v2898_v13 = vrot.slane %v2897_v30, 2  ;;  %v3073_v1 = vadd.f32 %v3072_v61, %v3071_v2  ;;  %v2831_v40 = vmul.f32 %v4492_v0, %v5517_v11  ;;  %v2832_v21 = vmul.f32 %v4492_v0, %v5521_v16 }
 0x29f   : > { %v2270_v18 = vadd.f32 %v2269_v17, %v2268_v10  ;;  %v2700_v5 = vadd.f32 %v2699_v6, %v2698_v60  ;;  %v2902_v57 = vsel %vm1216_vm5, %v2863_v59, 0.0  ;;  %v2903_v20 = vsel %vm1216_vm5, %v2864_v14, 0.0  ;;  %v5650_v26 = vpop.f32.mrb[26].mxu1  ;;  %v5652_v55 = vpop.f32.mrb[34].mxu0 }
 0x2a0   : > { %v2899_v25 = vadd.f32 %v2898_v13, %v2897_v30  ;;  %v3074_v35 = vrot.slane %v3073_v1, 2  ;;  %v2904_v2 = vadd.f32 %v2903_v20, %v2902_v57  ;;  %v3039_v24 = vmul.f32 %v2831_v40, %v4959_v37  ;;  %v5656_v61 = vpop.f32.mrb[27].mxu1  ;;  %v5658_v16 = vpop.f32.mrb[35].mxu0 }
 0x2a1   : > { %v3040_v27 = vmul.f32 %v2832_v21, %v4967_v39  ;;  %v2271_v11 = vrot.slane %v2270_v18, 1  ;;  %v2701_v30 = vrot.slane %v2700_v5, 2  ;;  %4497 = vpow2.f32 %v2189_v19 }
 0x2a2   : > { %v2900_v10 = vrot.slane %v2899_v25, 1  ;;  %v3075_v60 = vadd.f32 %v3074_v35, %v3073_v1  ;;  %v2905_v53 = vrot.slane %v2904_v2, 4  ;;  %v3078_v29 = vsel %vm894_vm4, %v3039_v24, 0.0 }
 0x2a3   : > { %v3079_v0 = vsel %vm894_vm4, %v3040_v27, 0.0  ;;  %v2272_v17 = vadd.f32 %v2271_v11, %v2270_v18  ;;  %v2702_v59 = vadd.f32 %v2701_v30, %v2700_v5  ;;  %v5664_v14 = vpop.f32.mrb[28].mxu1  ;;  %v5666_v40 = vpop.f32.mrb[36].mxu0  ;;  %v2191_v24 = vmul.f32 1.442695, %v2150_v22 }
 0x2a4   : > { %v4494_v6 = vpop.eup %4493  ;;  %v5662_v13 = vadd.f32 %v2900_v10, %v2899_v25  ;;  %v3076_v37 = vrot.slane %v3075_v60, 1  ;;  %v3080_v39 = vadd.f32 %v3079_v0, %v3078_v29  ;;  %v2906_v21 = vadd.f32 %v2905_v53, %v2904_v2  ;;  %v5670_v35 = vpop.f32.mrb[29].mxu1 }
 0x2a5   : > { %v2401_v1 = vmul.f32 %v4494_v6, %v5537_v12  ;;  %v2402_v19 = vmul.f32 %v4494_v6, %v5543_v62  ;;  %4499 = vrcp.f32 %v2272_v17  ;;  %v5672_v57 = vpop.f32.mrb[37].mxu0  ;;  %v2703_v20 = vrot.slane %v2702_v59, 1 }
 0x2a6   : > { %6636 = vst [vmem:[#allocation71_spill] sm:$0xff] %v5662_v13  ;;  %v5674_v18 = vadd.f32 %v3076_v37, %v3075_v60  ;;  %v3081_v25 = vrot.slane %v3080_v39, 4  ;;  %v4496_v5 = vpop.eup %4495  ;;  %v2907_v27 = vrot.slane %v2906_v21, 2  ;;  %v6638_v12 = vrot.slane %v5575_v58, 2 }
 0x2a7   : > { %v2865_v11 = vmul.f32 %v2401_v1, %v5253_v28  ;;  %v2866_v2 = vmul.f32 %v2402_v19, %v5259_v32  ;;  %v2833_v30 = vmul.f32 %v4496_v5, %v5551_v51  ;;  %v2834_v53 = vmul.f32 %v4496_v5, %v5555_v63  ;;  %v5687_v37 = vpop.f32.mrb[30].mxu1 }
 0x2a8   : > { %6637 = vst [vmem:[#allocation72_spill] sm:$0xff] %v5674_v18  ;;  %v2471_v62 = vmax.f32 %v5575_v58, %v6638_v12  ;;  %v3082_v10 = vadd.f32 %v3081_v25, %v3080_v39  ;;  %v2704_v60 = vadd.f32 %v2703_v20, %v2702_v59  ;;  %v2908_v29 = vadd.f32 %v2907_v27, %v2906_v21  ;;  %v5689_v58 = vpop.f32.mrb[38].mxu0  ;;  %v5692_v59 = vpop.f32.mrb[31].mxu1 }
 0x2a9   : > { %v2911_v0 = vsel %vm1216_vm5, %v2865_v11, 0.0  ;;  %v2912_v22 = vsel %vm1216_vm5, %v2866_v2, 0.0  ;;  %4501 = vpow2.f32 %v2191_v24  ;;  %v3041_v32 = vmul.f32 %v2833_v30, %v4975_v41 }
 0x2aa   : > { %v3083_v17 = vrot.slane %v3082_v10, 2  ;;  %v2913_v28 = vadd.f32 %v2912_v22, %v2911_v0  ;;  %v3042_v6 = vmul.f32 %v2834_v53, %v4983_v43  ;;  %v2909_v51 = vrot.slane %v2908_v29, 1 }
 0x2ab   : > { %4503 = vrcp.f32 %v2704_v60  ;;  %v2472_v63 = vrot.slane %v2471_v62, 1  ;;  %v2045_v39 = vrot.slane %v5567_v42, 4  ;;  %v5694_v21 = vpop.eup %4497  ;;  %v3087_v25 = vsel %vm894_vm4, %v3041_v32, 0.0 }
 0x2ac   : > { %v3084_v1 = vadd.f32 %v3083_v17, %v3082_v10  ;;  %v2914_v19 = vrot.slane %v2913_v28, 4  ;;  %v3088_v41 = vsel %vm894_vm4, %v3042_v6, 0.0  ;;  %v5698_v43 = vadd.f32 %v2909_v51, %v2908_v29 }
 0x2ad   : > { %v3089_v20 = vadd.f32 %v3088_v41, %v3087_v25  ;;  %v2273_v24 = vsel %vm1216_vm5, %v5694_v21, 0.0  ;;  %v2473_v5 = vmax.f32 %v2471_v62, %v2472_v63  ;;  %v2046_v2 = vmax.f32 %v5567_v42, %v2045_v39 }
 0x2ae   : > { %6639 = vst [vmem:[#allocation73_spill] sm:$0xff] %v5698_v43  ;;  %v3085_v27 = vrot.slane %v3084_v1, 1  ;;  %v2915_v11 = vadd.f32 %v2914_v19, %v2913_v28  ;;  %v2476_v12 = vmax.f32 %v5579_v31, %v5563_v50  ;;  %v2052_v29 = vsel %vm1216_vm5, %v5533_v33, -inf }
 0x2af   : > { %v4500_v10 = vpop.eup %4499  ;;  %v3090_v30 = vrot.slane %v3089_v20, 4  ;;  %v2581_v53 = vsub.f32 %v5487_v3, %v2473_v5  ;;  %v2582_v60 = vsub.f32 %v5479_v48, %v2473_v5  ;;  %v2047_v50 = vrot.slane %v2046_v2, 2 }
 0x2b0   : > { %v5709_v0 = vadd.f32 %v3085_v27, %v3084_v1  ;;  %v2916_v22 = vrot.slane %v2915_v11, 2  ;;  %v2403_v62 = vmul.f32 %v4500_v10, %v5573_v47  ;;  %v2404_v17 = vmul.f32 %v4500_v10, %v5587_v15  ;;  %v5721_v15 = vpop.f32.mrb[39].mxu0 }
 0x2b1   : > { %v3091_v42 = vadd.f32 %v3090_v30, %v3089_v20  ;;  %v2621_v28 = vmul.f32 1.442695, %v2581_v53  ;;  %v2623_v32 = vmul.f32 1.442695, %v2582_v60  ;;  %v2477_v6 = vrot.slane %v2476_v12, 4  ;;  %v6650_v30 = vld [vmem:[#allocation62_spill] sm:$0xff] }
 0x2b2   : > { %6640 = vst [vmem:[#allocation74_spill] sm:$0xff] %v5709_v0  ;;  %v5713_v31 = vadd.f32 %v2916_v22, %v2915_v11  ;;  %v2867_v3 = vmul.f32 %v2403_v62, %v5267_v49  ;;  %v2868_v48 = vmul.f32 %v2404_v17, %v5275_v52  ;;  %v2048_v39 = vmax.f32 %v2046_v2, %v2047_v50 }
 0x2b3   : > { %v5717_v51 = vpop.eup %4501  ;;  %v3092_v63 = vrot.slane %v3091_v42, 2  ;;  %4505 = vpow2.f32 %v2621_v28  ;;  %v2484_v47 = vsel %vm894_vm4, %v5535_v38, -inf  ;;  %v2478_v10 = vmax.f32 %v2476_v12, %v2477_v6 }
 0x2b4   : > { %6641 = vst [vmem:[#allocation75_spill] sm:$0xff] %v5713_v31  ;;  %v2920_v19 = vsel %vm1216_vm5, %v2867_v3, 0.0  ;;  %v2921_v25 = vsel %vm1216_vm5, %v2868_v48, 0.0  ;;  %v2274_v49 = vsel %vm1216_vm5, %v5717_v51, 0.0  ;;  %4507 = vpow2.f32 %v2623_v32  ;;  %v6643_v48 = vld [vmem:[#allocation57_spill] sm:$0xff] }
 0x2b5   : > { %v4504_v52 = vpop.eup %4503  ;;  %v5728_v41 = vadd.f32 %v3092_v63, %v3091_v42  ;;  %v2922_v20 = vadd.f32 %v2921_v25, %v2920_v19  ;;  %v2275_v5 = vadd.f32 %v2274_v49, %v2273_v24  ;;  %v2049_v2 = vrot.slane %v2048_v39, 1 }
 0x2b6   : > { %v2835_v27 = vmul.f32 %v4504_v52, %v5598_v9  ;;  %v2836_v11 = vmul.f32 %v4504_v52, %v5608_v23  ;;  %v2051_v22 = vsel %vm1216_vm5, %v5539_v4, -inf  ;;  %v2479_v24 = vrot.slane %v2478_v10, 2 }
 0x2b7   : > { %6642 = vst [vmem:[#allocation76_spill] sm:$0xff] %v5728_v41  ;;  %v2923_v53 = vrot.slane %v2922_v20, 4  ;;  %v2276_v60 = vrot.slane %v2275_v5, 4  ;;  %v2050_v42 = vmax.f32 %v2048_v39, %v2049_v2  ;;  %v2053_v9 = vmax.f32 %v2051_v22, %v2052_v29 }
 0x2b8   : > { %v3043_v62 = vmul.f32 %v2835_v27, %v4991_v45  ;;  %v3044_v17 = vmul.f32 %v2836_v11, %v5017_v54  ;;  %v2483_v23 = vsel %vm894_vm4, %v5541_v7, -inf  ;;  %v2480_v54 = vmax.f32 %v2478_v10, %v2479_v24 }
 0x2b9   : > { %v2924_v28 = vadd.f32 %v2923_v53, %v2922_v20  ;;  %v2277_v32 = vadd.f32 %v2276_v60, %v2275_v5  ;;  %v2151_v3 = vsub.f32 %v5513_v44, %v2050_v42  ;;  %v2152_v6 = vsub.f32 %v6643_v48, %v2050_v42  ;;  %v6646_v48 = vld [vmem:[#allocation59_spill] sm:$0xff] }
 0x2ba   : > { %v3096_v12 = vsel %vm894_vm4, %v3043_v62, 0.0  ;;  %v3097_v50 = vsel %vm894_vm4, %v3044_v17, 0.0  ;;  %v2054_v49 = vrot.slane %v2053_v9, 4  ;;  %v2485_v52 = vmax.f32 %v2483_v23, %v2484_v47  ;;  %v5751_v47 = vpop.f32.mrb[32].mxu1  ;;  %v5753_v17 = vpop.f32.mrb[40].mxu0 }
 0x2bb   : > { %v2925_v63 = vrot.slane %v2924_v28, 2  ;;  %v3098_v45 = vadd.f32 %v3097_v50, %v3096_v12  ;;  %v2278_v19 = vrot.slane %v2277_v32, 2  ;;  %v2193_v39 = vmul.f32 1.442695, %v2151_v3 }
 0x2bc   : > { %v2195_v25 = vmul.f32 1.442695, %v2152_v6  ;;  %v2481_v11 = vrot.slane %v2480_v54, 1  ;;  %v2055_v2 = vmax.f32 %v2053_v9, %v2054_v49  ;;  %v2486_v53 = vrot.slane %v2485_v52, 4  ;;  %v5759_v9 = vpop.f32.mrb[33].mxu1 }
 0x2bd   : > { %v5743_v29 = vpop.eup %4505  ;;  %v5745_v20 = vadd.f32 %v2925_v63, %v2924_v28  ;;  %v3099_v5 = vrot.slane %v3098_v45, 4  ;;  %v2279_v27 = vadd.f32 %v2278_v19, %v2277_v32  ;;  %4509 = vpow2.f32 %v2193_v39  ;;  %v6645_v32 = vld [vmem:[#allocation60_spill] sm:$0xff]  ;;  %v6647_v63 = vld [vmem:[#allocation58_spill] sm:$0xff]  ;;  %v6648_v39 = vld [vmem:[#allocation61_spill] sm:$0xff] }
 0x2be   : > { %v2705_v44 = vsel %vm894_vm4, %v5743_v29, 0.0  ;;  %v5749_v60 = vpop.eup %4507  ;;  %4511 = vpow2.f32 %v2195_v25  ;;  %v2482_v62 = vmax.f32 %v2480_v54, %v2481_v11  ;;  %v2056_v24 = vrot.slane %v2055_v2, 2 }
 0x2bf   : > { %6644 = vst [vmem:[#allocation57_spill] sm:$0xff] %v5745_v20  ;;  %v3100_v10 = vadd.f32 %v3099_v5, %v3098_v45  ;;  %v2280_v22 = vrot.slane %v2279_v27, 1  ;;  %v2706_v42 = vsel %vm894_vm4, %v5749_v60, 0.0  ;;  %v2487_v28 = vmax.f32 %v2485_v52, %v2486_v53 }
 0x2c0   : > { %v2061_v23 = vsel %vm1216_vm5, %v6645_v32, -inf  ;;  %v2707_v3 = vadd.f32 %v2706_v42, %v2705_v44  ;;  %v2583_v6 = vsub.f32 %v6646_v48, %v2482_v62  ;;  %v2584_v45 = vsub.f32 %v6647_v63, %v2482_v62  ;;  %v6651_v62 = vld [vmem:[#allocation63_spill] sm:$0xff]  ;;  %v6652_v48 = vld [vmem:[#allocation64_spill] sm:$0xff]  ;;  %v6653_v63 = vld [vmem:[#allocation65_spill] sm:$0xff] }
 0x2c1   : > { %v3101_v12 = vrot.slane %v3100_v10, 2  ;;  %v2281_v50 = vadd.f32 %v2280_v22, %v2279_v27  ;;  %v2057_v19 = vmax.f32 %v2055_v2, %v2056_v24  ;;  %v2488_v54 = vrot.slane %v2487_v28, 2 }
 0x2c2   : > { %v2493_v25 = vsel %vm894_vm4, %v6648_v39, -inf  ;;  %v2708_v52 = vrot.slane %v2707_v3, 4  ;;  %v2625_v5 = vmul.f32 1.442695, %v2583_v6  ;;  %v2627_v11 = vmul.f32 1.442695, %v2584_v45 }
 0x2c3   : > { %v5765_v49 = vadd.f32 %v3101_v12, %v3100_v10  ;;  %4513 = vrcp.f32 %v2281_v50  ;;  %v2058_v53 = vrot.slane %v2057_v19, 1  ;;  %v2489_v1 = vmax.f32 %v2487_v28, %v2488_v54 }
 0x2c4   : > { %v2060_v27 = vsel %vm1216_vm5, %v6650_v30, -inf  ;;  %v2709_v44 = vadd.f32 %v2708_v52, %v2707_v3  ;;  %4515 = vpow2.f32 %v2625_v5  ;;  %v2492_v2 = vsel %vm894_vm4, %v6651_v62, -inf }
 0x2c5   : > { %6649 = vst [vmem:[#allocation60_spill] sm:$0xff] %v5765_v49  ;;  %v2062_v22 = vmax.f32 %v2060_v27, %v2061_v23  ;;  %4517 = vpow2.f32 %v2627_v11  ;;  %v2059_v42 = vmax.f32 %v2057_v19, %v2058_v53  ;;  %v2490_v24 = vrot.slane %v2489_v1, 1  ;;  %v6654_v53 = vld [vmem:[#allocation66_spill] sm:$0xff] }
 0x2c6   : > { %v2494_v10 = vmax.f32 %v2492_v2, %v2493_v25  ;;  %v2710_v12 = vrot.slane %v2709_v44, 2  ;;  %v2070_v6 = vsel %vm1216_vm5, %v6652_v48, -inf  ;;  %v5775_v28 = vsel %vm894_vm4, %v6653_v63, -inf  ;;  %v5787_v2 = vpop.f32.mrb[41].mxu0 }
 0x2c7   : > { %v2063_v50 = vrot.slane %v2062_v22, 4  ;;  %v5777_v45 = vpop.eup %4509  ;;  %v2153_v23 = vsub.f32 %v5539_v4, %v2059_v42  ;;  %v2154_v3 = vsub.f32 %v5533_v33, %v2059_v42  ;;  %v2491_v54 = vmax.f32 %v2489_v1, %v2490_v24 }
 0x2c8   : > { %v2495_v52 = vrot.slane %v2494_v10, 4  ;;  %v5781_v19 = vpop.eup %4511  ;;  %v2711_v25 = vadd.f32 %v2710_v12, %v2709_v44  ;;  %v2282_v5 = vsel %vm1216_vm5, %v5777_v45, 0.0  ;;  %v2069_v27 = vsel %vm1216_vm5, %v6654_v53, -inf }
 0x2c9   : > { %v2064_v11 = vmax.f32 %v2062_v22, %v2063_v50  ;;  %v2283_v43 = vsel %vm1216_vm5, %v5781_v19, 0.0  ;;  %v2197_v4 = vmul.f32 1.442695, %v2153_v23  ;;  %v2199_v13 = vmul.f32 1.442695, %v2154_v3 }
 0x2ca   : > { %v2585_v33 = vsub.f32 %v5541_v7, %v2491_v54  ;;  %v2712_v1 = vrot.slane %v2711_v25, 1  ;;  %v2284_v42 = vadd.f32 %v2283_v43, %v2282_v5  ;;  %v2586_v44 = vsub.f32 %v5535_v38, %v2491_v54 }
 0x2cb   : > { %v2065_v24 = vrot.slane %v2064_v11, 2  ;;  %4519 = vpow2.f32 %v2197_v4  ;;  %v2496_v22 = vmax.f32 %v2494_v10, %v2495_v52  ;;  %v2071_v50 = vmax.f32 %v2069_v27, %v2070_v6  ;;  %v6655_v10 = vld [vmem:[#allocation38_spill] sm:$0xff]  ;;  %v6656_v52 = vld [vmem:[#allocation40_spill] sm:$0xff] }
 0x2cc   : > { %v2629_v12 = vmul.f32 1.442695, %v2585_v33  ;;  %v2713_v31 = vadd.f32 %v2712_v1, %v2711_v25  ;;  %v2285_v0 = vrot.slane %v2284_v42, 4  ;;  %4521 = vpow2.f32 %v2199_v13 }
 0x2cd   : > { %v4514_v20 = vpop.eup %4513  ;;  %v2631_v18 = vmul.f32 1.442695, %v2586_v44  ;;  %v2066_v7 = vmax.f32 %v2064_v11, %v2065_v24  ;;  %v2497_v43 = vrot.slane %v2496_v22, 2  ;;  %v2072_v54 = vrot.slane %v2071_v50, 4 }
 0x2ce   : > { %v2405_v49 = vmul.f32 %v4514_v20, %v5694_v21  ;;  %v2406_v23 = vmul.f32 %v4514_v20, %v5717_v51  ;;  %4523 = vpow2.f32 %v2629_v12  ;;  %v5795_v3 = vpop.eup %4515  ;;  %v2286_v38 = vadd.f32 %v2285_v0, %v2284_v42  ;;  %v6657_v12 = vld [vmem:[#allocation67_spill] sm:$0xff] }
 0x2cf   : > { %4525 = vrcp.f32 %v2713_v31  ;;  %v5797_v5 = vpop.eup %4517  ;;  %v2714_v13 = vsel %vm894_vm4, %v5795_v3, 0.0  ;;  %v2067_v20 = vrot.slane %v2066_v7, 1  ;;  %v2498_v11 = vmax.f32 %v2496_v22, %v2497_v43 }
 0x2d0   : > { %v2869_v6 = vmul.f32 %v2405_v49, %v6655_v10  ;;  %v2870_v25 = vmul.f32 %v2406_v23, %v6656_v52  ;;  %4527 = vpow2.f32 %v2631_v18  ;;  %v2287_v21 = vrot.slane %v2286_v38, 2 }
 0x2d1   : > { %v2715_v51 = vsel %vm894_vm4, %v5797_v5, 0.0  ;;  %v2073_v4 = vmax.f32 %v2071_v50, %v2072_v54  ;;  %v2068_v1 = vmax.f32 %v2066_v7, %v2067_v20  ;;  %v2499_v42 = vrot.slane %v2498_v11, 1  ;;  %v5815_v50 = vpop.f32.mrb[34].mxu1 }
 0x2d2   : > { %v2929_v0 = vsel %vm1216_vm5, %v2869_v6, 0.0  ;;  %v2930_v31 = vsel %vm1216_vm5, %v2870_v25, 0.0  ;;  %v2716_v27 = vadd.f32 %v2715_v51, %v2714_v13  ;;  %v2288_v49 = vadd.f32 %v2287_v21, %v2286_v38  ;;  %v5817_v38 = vpop.f32.mrb[42].mxu0  ;;  %v5822_v21 = vpop.f32.mrb[35].mxu1 }
 0x2d3   : > { %v2931_v33 = vadd.f32 %v2930_v31, %v2929_v0  ;;  %v2074_v24 = vrot.slane %v2073_v4, 2  ;;  %v2501_v18 = vsel %vm894_vm4, %v6657_v12, -inf  ;;  %v5811_v23 = vsel %vm1216_vm5, %v5616_v56, -inf  ;;  %6658 = vst [vmem:[#allocation59_spill] sm:$0xff] %v5817_v38  ;;  %6659 = vst [vmem:[#allocation58_spill] sm:$0xff] %v5822_v21 }
 0x2d4   : > { %v2717_v44 = vrot.slane %v2716_v27, 4  ;;  %v2289_v43 = vrot.slane %v2288_v49, 1  ;;  %v2155_v10 = vsub.f32 %v6650_v30, %v2068_v1  ;;  %v2156_v6 = vsub.f32 %v6645_v32, %v2068_v1 }
 0x2d5   : > { %v2932_v22 = vrot.slane %v2931_v33, 4  ;;  %v5819_v7 = vpop.eup %4519  ;;  %v2500_v52 = vmax.f32 %v2498_v11, %v2499_v42  ;;  %v2075_v25 = vmax.f32 %v2073_v4, %v2074_v24  ;;  %v2503_v13 = vmax.f32 %v2501_v18, %v5775_v28  ;;  %v5835_v4 = vpop.f32.mrb[43].mxu0 }
 0x2d6   : > { %v2718_v54 = vadd.f32 %v2717_v44, %v2716_v27  ;;  %v5824_v51 = vpop.eup %4521  ;;  %v2290_v30 = vadd.f32 %v2289_v43, %v2288_v49  ;;  %v2291_v32 = vsel %vm1216_vm5, %v5819_v7, 0.0  ;;  %v2201_v0 = vmul.f32 1.442695, %v2155_v10  ;;  %6661 = vst [vmem:[#allocation62_spill] sm:$0xff] %v5835_v4 }
 0x2d7   : > { %v5826_v20 = vadd.f32 %v2932_v22, %v2931_v33  ;;  %v2292_v11 = vsel %vm1216_vm5, %v5824_v51, 0.0  ;;  %v2203_v27 = vmul.f32 1.442695, %v2156_v6  ;;  %v2587_v28 = vsub.f32 %v6651_v62, %v2500_v52 }
 0x2d8   : > { %v5830_v31 = vpop.eup %4523  ;;  %v2719_v1 = vrot.slane %v2718_v54, 2  ;;  %4529 = vrcp.f32 %v2290_v30  ;;  %v2293_v49 = vadd.f32 %v2292_v11, %v2291_v32  ;;  %v2588_v6 = vsub.f32 %v6648_v39, %v2500_v52  ;;  %v6662_v30 = vld [vmem:[#allocation14_spill] sm:$0xff]  ;;  %v6663_v11 = vld [vmem:[#allocation16_spill] sm:$0xff] }
 0x2d9   : > { %6660 = vst [vmem:[#allocation61_spill] sm:$0xff] %v5826_v20  ;;  %v4526_v42 = vpop.eup %4525  ;;  %v2723_v44 = vsel %vm894_vm4, %v5830_v31, 0.0  ;;  %4531 = vpow2.f32 %v2201_v0  ;;  %v2633_v21 = vmul.f32 1.442695, %v2587_v28  ;;  %v2076_v38 = vrot.slane %v2075_v25, 1 }
 0x2da   : > { %v5840_v24 = vpop.eup %4527  ;;  %v2837_v18 = vmul.f32 %v4526_v42, %v5743_v29  ;;  %v2838_v22 = vmul.f32 %v4526_v42, %v5749_v60  ;;  %v2720_v43 = vadd.f32 %v2719_v1, %v2718_v54  ;;  %v2294_v10 = vrot.slane %v2293_v49, 4 }
 0x2db   : > { %v2724_v62 = vsel %vm894_vm4, %v5840_v24, 0.0  ;;  %4533 = vpow2.f32 %v2203_v27  ;;  %v2635_v29 = vmul.f32 1.442695, %v2588_v6  ;;  %v2077_v39 = vmax.f32 %v2075_v25, %v2076_v38 }
 0x2dc   : > { %v3045_v32 = vmul.f32 %v2837_v18, %v6662_v30  ;;  %v3046_v33 = vmul.f32 %v2838_v22, %v6663_v11  ;;  %v2721_v20 = vrot.slane %v2720_v43, 1  ;;  %v2725_v41 = vadd.f32 %v2724_v62, %v2723_v44 }
 0x2dd   : > { %v2295_v4 = vadd.f32 %v2294_v10, %v2293_v49  ;;  %4535 = vpow2.f32 %v2633_v21  ;;  %v2504_v18 = vrot.slane %v2503_v13, 4  ;;  %v2511_v44 = vsel %vm894_vm4, %v5618_v46, -inf }
 0x2de   : > { %v3105_v60 = vsel %vm894_vm4, %v3045_v32, 0.0  ;;  %v3106_v54 = vsel %vm894_vm4, %v3046_v33, 0.0  ;;  %v2722_v0 = vadd.f32 %v2721_v20, %v2720_v43  ;;  %v2726_v1 = vrot.slane %v2725_v41, 4 }
 0x2df   : > { %v3107_v42 = vadd.f32 %v3106_v54, %v3105_v60  ;;  %v2296_v27 = vrot.slane %v2295_v4, 2  ;;  %v2157_v22 = vsub.f32 %v6654_v53, %v2077_v39  ;;  %v2158_v33 = vsub.f32 %v6652_v48, %v2077_v39  ;;  %v6664_v60 = vld [vmem:[#allocation42_spill] sm:$0xff] }
 0x2e0   : > { %4537 = vrcp.f32 %v2722_v0  ;;  %v2727_v52 = vadd.f32 %v2726_v1, %v2725_v41  ;;  %v2505_v20 = vmax.f32 %v2503_v13, %v2504_v18  ;;  %v2078_v43 = vsel %vm1216_vm5, %v5626_v34, -inf }
 0x2e1   : > { %v3108_v49 = vrot.slane %v3107_v42, 4  ;;  %v2297_v28 = vadd.f32 %v2296_v27, %v2295_v4  ;;  %4539 = vpow2.f32 %v2635_v29  ;;  %v2205_v25 = vmul.f32 1.442695, %v2157_v22 }
 0x2e2   : > { %v2728_v10 = vrot.slane %v2727_v52, 2  ;;  %v4530_v21 = vpop.eup %4529  ;;  %v2080_v62 = vmax.f32 %v2078_v43, %v5811_v23  ;;  %v2207_v32 = vmul.f32 1.442695, %v2158_v33  ;;  %v6665_v23 = vld [vmem:[#allocation43_spill] sm:$0xff] }
 0x2e3   : > { %v5857_v38 = vadd.f32 %v3108_v49, %v3107_v42  ;;  %v2298_v41 = vrot.slane %v2297_v28, 1  ;;  %v5860_v6 = vpop.eup %4531  ;;  %v2407_v4 = vmul.f32 %v4530_v21, %v5777_v45  ;;  %v2408_v53 = vmul.f32 %v4530_v21, %v5781_v19 }
 0x2e4   : > { %v2729_v30 = vadd.f32 %v2728_v10, %v2727_v52  ;;  %v2300_v29 = vsel %vm1216_vm5, %v5860_v6, 0.0  ;;  %4541 = vpow2.f32 %v2205_v25  ;;  %v2506_v42 = vrot.slane %v2505_v20, 2 }
 0x2e5   : > { %v5864_v48 = vpop.eup %4533  ;;  %v2299_v11 = vadd.f32 %v2298_v41, %v2297_v28  ;;  %v2871_v54 = vmul.f32 %v2407_v4, %v6664_v60  ;;  %v2872_v0 = vmul.f32 %v2408_v53, %v6665_v23  ;;  %v2081_v27 = vrot.slane %v2080_v62, 4  ;;  %v6666_v41 = vld [vmem:[#allocation68_spill] sm:$0xff] }
 0x2e6   : > { %v2730_v1 = vrot.slane %v2729_v30, 1  ;;  %v2301_v45 = vsel %vm1216_vm5, %v5864_v48, 0.0  ;;  %v2507_v10 = vmax.f32 %v2505_v20, %v2506_v42  ;;  %v2510_v25 = vsel %vm894_vm4, %v6666_v41, -inf }
 0x2e7   : > { %4543 = vrcp.f32 %v2299_v11  ;;  %v2302_v19 = vadd.f32 %v2301_v45, %v2300_v29  ;;  %v2938_v39 = vsel %vm1216_vm5, %v2871_v54, 0.0  ;;  %v2939_v52 = vsel %vm1216_vm5, %v2872_v0, 0.0  ;;  %v5875_v49 = vpop.eup %4535  ;;  %v6668_v0 = vld [vmem:[#allocation18_spill] sm:$0xff]  ;;  %v6669_v45 = vld [vmem:[#allocation20_spill] sm:$0xff] }
 0x2e8   : > { %v2731_v18 = vadd.f32 %v2730_v1, %v2729_v30  ;;  %4545 = vpow2.f32 %v2207_v32  ;;  %v2940_v28 = vadd.f32 %v2939_v52, %v2938_v39  ;;  %v2082_v33 = vmax.f32 %v2080_v62, %v2081_v27 }
 0x2e9   : > { %v2303_v22 = vrot.slane %v2302_v19, 4  ;;  %v2732_v21 = vsel %vm894_vm4, %v5875_v49, 0.0  ;;  %v5883_v4 = vsel %vm1216_vm5, %v5636_v36, -inf  ;;  %v2508_v29 = vrot.slane %v2507_v10, 1 }
 0x2ea   : > { %v4538_v43 = vpop.eup %4537  ;;  %4547 = vrcp.f32 %v2731_v18  ;;  %v2941_v30 = vrot.slane %v2940_v28, 4  ;;  %v2083_v60 = vrot.slane %v2082_v33, 2  ;;  %v2512_v54 = vmax.f32 %v2510_v25, %v2511_v44 }
 0x2eb   : > { %v5885_v53 = vpop.eup %4539  ;;  %v2839_v32 = vmul.f32 %v4538_v43, %v5795_v3  ;;  %v2840_v20 = vmul.f32 %v4538_v43, %v5797_v5  ;;  %v2304_v62 = vadd.f32 %v2303_v22, %v2302_v19  ;;  %v2509_v52 = vmax.f32 %v2507_v10, %v2508_v29 }
 0x2ec   : > { %v2733_v11 = vsel %vm894_vm4, %v5885_v53, 0.0  ;;  %v5891_v23 = vadd.f32 %v2941_v30, %v2940_v28  ;;  %v2084_v18 = vmax.f32 %v2082_v33, %v2083_v60  ;;  %v2513_v3 = vrot.slane %v2512_v54, 4 }
 0x2ed   : > { %v3047_v1 = vmul.f32 %v2839_v32, %v6668_v0  ;;  %v3048_v42 = vmul.f32 %v2840_v20, %v6669_v45  ;;  %v2305_v27 = vrot.slane %v2304_v62, 2  ;;  %v2734_v39 = vadd.f32 %v2733_v11, %v2732_v21 }
 0x2ee   : > { %6667 = vst [vmem:[#allocation63_spill] sm:$0xff] %v5891_v23  ;;  %v5895_v13 = vpop.eup %4541  ;;  %v2520_v44 = vsel %vm894_vm4, %v5638_v8, -inf  ;;  %v2589_v21 = vsub.f32 %v6657_v12, %v2509_v52  ;;  %v2590_v30 = vsub.f32 %v6653_v63, %v2509_v52  ;;  %v2085_v32 = vrot.slane %v2084_v18, 1  ;;  %v6670_v63 = vld [vmem:[#allocation45_spill] sm:$0xff] }
 0x2ef   : > { %v3114_v5 = vsel %vm894_vm4, %v3047_v1, 0.0  ;;  %v3115_v19 = vsel %vm894_vm4, %v3048_v42, 0.0  ;;  %v2306_v22 = vadd.f32 %v2305_v27, %v2304_v62  ;;  %v2735_v43 = vrot.slane %v2734_v39, 4 }
 0x2f0   : > { %v3116_v28 = vadd.f32 %v3115_v19, %v3114_v5  ;;  %v2309_v25 = vsel %vm1216_vm5, %v5895_v13, 0.0  ;;  %v2514_v20 = vmax.f32 %v2512_v54, %v2513_v3  ;;  %v2637_v42 = vmul.f32 1.442695, %v2589_v21  ;;  %v6671_v54 = vld [vmem:[#allocation47_spill] sm:$0xff] }
 0x2f1   : > { %v4544_v10 = vpop.eup %4543  ;;  %v2307_v33 = vrot.slane %v2306_v22, 1  ;;  %v2736_v0 = vadd.f32 %v2735_v43, %v2734_v39  ;;  %v2639_v12 = vmul.f32 1.442695, %v2590_v30 }
 0x2f2   : > { %v5905_v11 = vpop.eup %4545  ;;  %v3117_v29 = vrot.slane %v3116_v28, 4  ;;  %v2409_v62 = vmul.f32 %v4544_v10, %v5819_v7  ;;  %v2410_v60 = vmul.f32 %v4544_v10, %v5824_v51 }
 0x2f3   : > { %v2308_v1 = vadd.f32 %v2307_v33, %v2306_v22  ;;  %v2310_v45 = vsel %vm1216_vm5, %v5905_v11, 0.0  ;;  %v2737_v19 = vrot.slane %v2736_v0, 2  ;;  %v6673_v33 = vld [vmem:[#allocation23_spill] sm:$0xff] }
 0x2f4   : > { %v4548_v27 = vpop.eup %4547  ;;  %v5911_v5 = vadd.f32 %v3117_v29, %v3116_v28  ;;  %v2873_v52 = vmul.f32 %v2409_v62, %v6670_v63  ;;  %v2874_v3 = vmul.f32 %v2410_v60, %v6671_v54  ;;  %v2311_v51 = vadd.f32 %v2310_v45, %v2309_v25  ;;  %v6672_v28 = vld [vmem:[#allocation22_spill] sm:$0xff]  ;;  %v6674_v54 = vld [vmem:[#allocation69_spill] sm:$0xff] }
 0x2f5   : > { %v2841_v23 = vmul.f32 %v4548_v27, %v5830_v31  ;;  %v2842_v7 = vmul.f32 %v4548_v27, %v5840_v24  ;;  %4549 = vrcp.f32 %v2308_v1  ;;  %v2738_v43 = vadd.f32 %v2737_v19, %v2736_v0 }
 0x2f6   : > { %v2947_v39 = vsel %vm1216_vm5, %v2873_v52, 0.0  ;;  %v2948_v22 = vsel %vm1216_vm5, %v2874_v3, 0.0  ;;  %4551 = vpow2.f32 %v2637_v42  ;;  %v2312_v29 = vrot.slane %v2311_v51, 4 }
 0x2f7   : > { %v5919_v21 = vadd.f32 %v2948_v22, %v2947_v39  ;;  %v3049_v10 = vmul.f32 %v2841_v23, %v6672_v28  ;;  %v3050_v30 = vmul.f32 %v2842_v7, %v6673_v33  ;;  %v2739_v62 = vrot.slane %v2738_v43, 1 }
 0x2f8   : > { %4553 = vpow2.f32 %v2639_v12  ;;  %v2086_v31 = vmax.f32 %v2084_v18, %v2085_v32  ;;  %v2515_v60 = vrot.slane %v2514_v20, 2  ;;  %v2313_v45 = vadd.f32 %v2312_v29, %v2311_v51  ;;  %v6675_v32 = vld [vmem:[#allocation70_spill] sm:$0xff] }
 0x2f9   : > { %v2950_v24 = vrot.slane %v5919_v21, 4  ;;  %v3123_v25 = vsel %vm894_vm4, %v3049_v10, 0.0  ;;  %v3124_v1 = vsel %vm894_vm4, %v3050_v30, 0.0  ;;  %v2740_v42 = vadd.f32 %v2739_v62, %v2738_v43 }
 0x2fa   : > { %v5926_v0 = vadd.f32 %v3124_v1, %v3123_v25  ;;  %v2159_v27 = vsub.f32 %v5626_v34, %v2086_v31  ;;  %v2160_v23 = vsub.f32 %v5616_v56, %v2086_v31  ;;  %v2314_v63 = vrot.slane %v2313_v45, 2 }
 0x2fb   : > { %v2516_v52 = vmax.f32 %v2514_v20, %v2515_v60  ;;  %v2087_v18 = vsel %vm1216_vm5, %v6674_v54, -inf  ;;  %v2519_v12 = vsel %vm894_vm4, %v6675_v32, -inf  ;;  %4555 = vrcp.f32 %v2740_v42 }
 0x2fc   : > { %v3126_v3 = vrot.slane %v5926_v0, 4  ;;  %v2209_v19 = vmul.f32 1.442695, %v2159_v27  ;;  %v2211_v7 = vmul.f32 1.442695, %v2160_v23  ;;  %v2315_v51 = vadd.f32 %v2314_v63, %v2313_v45  ;;  %v6676_v27 = vld [vmem:[#allocation48_spill] sm:$0xff] }
 0x2fd   : > { %v2517_v39 = vrot.slane %v2516_v52, 1  ;;  %v2089_v22 = vmax.f32 %v2087_v18, %v5883_v4  ;;  %v2521_v34 = vmax.f32 %v2519_v12, %v2520_v44  ;;  %v2097_v56 = vsel %vm1216_vm5, %v5650_v26, -inf  ;;  %v6677_v63 = vld [vmem:[#allocation50_spill] sm:$0xff] }
 0x2fe   : > { %4557 = vpow2.f32 %v2209_v19  ;;  %v2529_v20 = vsel %vm894_vm4, %v5652_v55, -inf  ;;  %v2096_v43 = vsel %vm1216_vm5, %v5656_v61, -inf  ;;  %v2316_v10 = vrot.slane %v2315_v51, 1 }
 0x2ff   : > { %v4550_v28 = vpop.eup %4549  ;;  %4559 = vpow2.f32 %v2211_v7  ;;  %v2518_v33 = vmax.f32 %v2516_v52, %v2517_v39  ;;  %v2090_v30 = vrot.slane %v2089_v22, 4  ;;  %v2522_v62 = vrot.slane %v2521_v34, 4 }
 0x300   : > { %v5942_v29 = vpop.eup %4551  ;;  %v2411_v4 = vmul.f32 %v4550_v28, %v5860_v6  ;;  %v2412_v44 = vmul.f32 %v4550_v28, %v5864_v48  ;;  %v2098_v31 = vmax.f32 %v2096_v43, %v2097_v56  ;;  %v2317_v60 = vadd.f32 %v2316_v10, %v2315_v51 }
 0x301   : > { %v2741_v25 = vsel %vm894_vm4, %v5942_v29, 0.0  ;;  %v2591_v1 = vsub.f32 %v6666_v41, %v2518_v33  ;;  %v2592_v45 = vsub.f32 %v5618_v46, %v2518_v33  ;;  %v2091_v18 = vmax.f32 %v2089_v22, %v2090_v30 }
 0x302   : > { %v5950_v42 = vpop.eup %4553  ;;  %v2875_v23 = vmul.f32 %v2411_v4, %v6676_v27  ;;  %v2876_v52 = vmul.f32 %v2412_v44, %v6677_v63  ;;  %v2523_v6 = vmax.f32 %v2521_v34, %v2522_v62  ;;  %4561 = vrcp.f32 %v2317_v60 }
 0x303   : > { %v2742_v48 = vsel %vm894_vm4, %v5950_v42, 0.0  ;;  %v2641_v12 = vmul.f32 1.442695, %v2591_v1  ;;  %v2643_v19 = vmul.f32 1.442695, %v2592_v45  ;;  %v2092_v46 = vrot.slane %v2091_v18, 2 }
 0x304   : > { %v2956_v7 = vsel %vm1216_vm5, %v2875_v23, 0.0  ;;  %v2957_v41 = vsel %vm1216_vm5, %v2876_v52, 0.0  ;;  %v2743_v51 = vadd.f32 %v2742_v48, %v2741_v25  ;;  %v2524_v56 = vrot.slane %v2523_v6, 2  ;;  %v6678_v23 = vld [vmem:[#allocation25_spill] sm:$0xff]  ;;  %v6679_v52 = vld [vmem:[#allocation26_spill] sm:$0xff] }
 0x305   : > { %v5958_v39 = vadd.f32 %v2957_v41, %v2956_v7  ;;  %4563 = vpow2.f32 %v2641_v12  ;;  %v2099_v43 = vrot.slane %v2098_v31, 4  ;;  %v4556_v28 = vpop.eup %4555  ;;  %v2093_v34 = vmax.f32 %v2091_v18, %v2092_v46 }
 0x306   : > { %v2744_v22 = vrot.slane %v2743_v51, 4  ;;  %4565 = vpow2.f32 %v2643_v19  ;;  %v2528_v10 = vsel %vm894_vm4, %v5658_v16, -inf  ;;  %v2843_v33 = vmul.f32 %v4556_v28, %v5875_v49 }
 0x307   : > { %v2844_v30 = vmul.f32 %v4556_v28, %v5885_v53  ;;  %v2525_v4 = vmax.f32 %v2523_v6, %v2524_v56  ;;  %v2100_v44 = vmax.f32 %v2098_v31, %v2099_v43  ;;  %v2094_v25 = vrot.slane %v2093_v34, 1 }
 0x308   : > { %v5964_v62 = vpop.eup %4557  ;;  %v2745_v60 = vadd.f32 %v2744_v22, %v2743_v51  ;;  %v2530_v1 = vmax.f32 %v2528_v10, %v2529_v20  ;;  %v5968_v45 = vsel %vm1216_vm5, %v5664_v14, -inf  ;;  %v3051_v63 = vmul.f32 %v2843_v33, %v6678_v23 }
 0x309   : > { %v5970_v27 = vpop.eup %4559  ;;  %v3052_v18 = vmul.f32 %v2844_v30, %v6679_v52  ;;  %v2318_v49 = vsel %vm1216_vm5, %v5964_v62, 0.0  ;;  %v2526_v53 = vrot.slane %v2525_v4, 1  ;;  %v2095_v48 = vmax.f32 %v2093_v34, %v2094_v25 }
 0x30a   : > { %v2746_v31 = vrot.slane %v2745_v60, 2  ;;  %v2319_v6 = vsel %vm1216_vm5, %v5970_v27, 0.0  ;;  %v2101_v20 = vrot.slane %v2100_v44, 2  ;;  %v3132_v12 = vsel %vm894_vm4, %v3051_v63, 0.0 }
 0x30b   : > { %v3133_v19 = vsel %vm894_vm4, %v3052_v18, 0.0  ;;  %v2320_v7 = vadd.f32 %v2319_v6, %v2318_v49  ;;  %v2527_v41 = vmax.f32 %v2525_v4, %v2526_v53  ;;  %v2161_v56 = vsub.f32 %v6674_v54, %v2095_v48  ;;  %v6680_v49 = vld [vmem:[#allocation33_spill] sm:$0xff] }
 0x30c   : > { %v5980_v51 = vadd.f32 %v3133_v19, %v3132_v12  ;;  %v2747_v46 = vadd.f32 %v2746_v31, %v2745_v60  ;;  %v2162_v43 = vsub.f32 %v5636_v36, %v2095_v48  ;;  %v4562_v28 = vpop.eup %4561  ;;  %v2102_v33 = vmax.f32 %v2100_v44, %v2101_v20 }
 0x30d   : > { %v2321_v22 = vrot.slane %v2320_v7, 4  ;;  %v2593_v10 = vsub.f32 %v6675_v32, %v2527_v41  ;;  %v2594_v34 = vsub.f32 %v5638_v8, %v2527_v41  ;;  %v2413_v30 = vmul.f32 %v4562_v28, %v5895_v13  ;;  %v6681_v32 = vld [vmem:[#allocation34_spill] sm:$0xff] }
 0x30e   : > { %v2414_v25 = vmul.f32 %v4562_v28, %v5905_v11  ;;  %v2748_v23 = vrot.slane %v2747_v46, 1  ;;  %v2213_v4 = vmul.f32 1.442695, %v2161_v56  ;;  %v2215_v52 = vmul.f32 1.442695, %v2162_v43 }
 0x30f   : > { %v5988_v63 = vpop.eup %4563  ;;  %v2322_v60 = vadd.f32 %v2321_v22, %v2320_v7  ;;  %v2645_v54 = vmul.f32 1.442695, %v2593_v10  ;;  %v2647_v18 = vmul.f32 1.442695, %v2594_v34  ;;  %v2877_v53 = vmul.f32 %v2413_v30, %v6680_v49 }
 0x310   : > { %v5990_v36 = vpop.eup %4565  ;;  %v2878_v31 = vmul.f32 %v2414_v25, %v6681_v32  ;;  %v2749_v8 = vadd.f32 %v2748_v23, %v2747_v46  ;;  %v2750_v13 = vsel %vm894_vm4, %v5988_v63, 0.0  ;;  %4567 = vpow2.f32 %v2213_v4 }
 0x311   : > { %v2323_v44 = vrot.slane %v2322_v60, 2  ;;  %v2751_v11 = vsel %vm894_vm4, %v5990_v36, 0.0  ;;  %v2103_v6 = vrot.slane %v2102_v33, 1  ;;  %v2965_v48 = vsel %vm1216_vm5, %v2877_v53, 0.0 }
 0x312   : > { %v2966_v20 = vsel %vm1216_vm5, %v2878_v31, 0.0  ;;  %4569 = vrcp.f32 %v2749_v8  ;;  %v2752_v12 = vadd.f32 %v2751_v11, %v2750_v13  ;;  %v2531_v56 = vrot.slane %v2530_v1, 4 }
 0x313   : > { %v2967_v19 = vadd.f32 %v2966_v20, %v2965_v48  ;;  %v2324_v7 = vadd.f32 %v2323_v44, %v2322_v60  ;;  %4571 = vpow2.f32 %v2215_v52  ;;  %v2104_v41 = vmax.f32 %v2102_v33, %v2103_v6 }
 0x314   : > { %v2753_v46 = vrot.slane %v2752_v12, 4  ;;  %4573 = vpow2.f32 %v2645_v54  ;;  %v2538_v43 = vsel %vm894_vm4, %v5666_v40, -inf  ;;  %v2532_v25 = vmax.f32 %v2530_v1, %v2531_v56 }
 0x315   : > { %v2968_v28 = vrot.slane %v2967_v19, 4  ;;  %v2325_v22 = vrot.slane %v2324_v7, 1  ;;  %4575 = vpow2.f32 %v2647_v18  ;;  %v2163_v10 = vsub.f32 %v5656_v61, %v2104_v41 }
 0x316   : > { %v2754_v34 = vadd.f32 %v2753_v46, %v2752_v12  ;;  %v2164_v30 = vsub.f32 %v5650_v26, %v2104_v41  ;;  %v2105_v23 = vsel %vm1216_vm5, %v5670_v35, -inf  ;;  %v2533_v53 = vrot.slane %v2532_v25, 2 }
 0x317   : > { %v2969_v4 = vadd.f32 %v2968_v28, %v2967_v19  ;;  %v2326_v33 = vadd.f32 %v2325_v22, %v2324_v7  ;;  %v2217_v60 = vmul.f32 1.442695, %v2163_v10  ;;  %v2107_v52 = vmax.f32 %v2105_v23, %v5968_v45 }
 0x318   : > { %v2755_v54 = vrot.slane %v2754_v34, 2  ;;  %v2219_v49 = vmul.f32 1.442695, %v2164_v30  ;;  %v2537_v18 = vsel %vm894_vm4, %v5672_v57, -inf  ;;  %v2534_v1 = vmax.f32 %v2532_v25, %v2533_v53 }
 0x319   : > { %v2970_v32 = vrot.slane %v2969_v4, 2  ;;  %4577 = vrcp.f32 %v2326_v33  ;;  %v2108_v61 = vrot.slane %v2107_v52, 4  ;;  %v2539_v31 = vmax.f32 %v2537_v18, %v2538_v43 }
 0x31a   : > { %v2756_v26 = vadd.f32 %v2755_v54, %v2754_v34  ;;  %4579 = vpow2.f32 %v2217_v60  ;;  %v6011_v8 = vsel %vm1216_vm5, %v5687_v37, -inf  ;;  %v6013_v13 = vpop.eup %4567  ;;  %v2535_v12 = vrot.slane %v2534_v1, 1  ;;  %v6683_v60 = vld [vmem:[#allocation10_spill] sm:$0xff] }
 0x31b   : > { %v2971_v45 = vadd.f32 %v2970_v32, %v2969_v4  ;;  %4581 = vpow2.f32 %v2219_v49  ;;  %v2109_v44 = vmax.f32 %v2107_v52, %v2108_v61  ;;  %v2540_v11 = vrot.slane %v2539_v31, 4  ;;  %v6682_v4 = vld [vmem:[#allocation9_spill] sm:$0xff] }
 0x31c   : > { %v4570_v6 = vpop.eup %4569  ;;  %v2757_v48 = vrot.slane %v2756_v26, 1  ;;  %v2327_v20 = vsel %vm1216_vm5, %v6013_v13, 0.0  ;;  %v6019_v19 = vsel %vm894_vm4, %v5689_v58, -inf  ;;  %v2536_v34 = vmax.f32 %v2534_v1, %v2535_v12 }
 0x31d   : > { %v6021_v7 = vpop.eup %4571  ;;  %v2972_v41 = vrot.slane %v2971_v45, 1  ;;  %v2845_v46 = vmul.f32 %v4570_v6, %v5942_v29  ;;  %v2846_v56 = vmul.f32 %v4570_v6, %v5950_v42  ;;  %v2110_v43 = vrot.slane %v2109_v44, 2 }
 0x31e   : > { %v6025_v28 = vpop.eup %4573  ;;  %v2758_v22 = vadd.f32 %v2757_v48, %v2756_v26  ;;  %v2328_v10 = vsel %vm1216_vm5, %v6021_v7, 0.0  ;;  %v2541_v30 = vmax.f32 %v2539_v31, %v2540_v11  ;;  %v2595_v49 = vsub.f32 %v5658_v16, %v2536_v34 }
 0x31f   : > { %v6029_v25 = vpop.eup %4575  ;;  %v6031_v23 = vadd.f32 %v2972_v41, %v2971_v45  ;;  %v3053_v33 = vmul.f32 %v2845_v46, %v6682_v4  ;;  %v3054_v52 = vmul.f32 %v2846_v56, %v6683_v60  ;;  %v2329_v29 = vadd.f32 %v2328_v10, %v2327_v20  ;;  %v6684_v4 = vld [vmem:[#allocation35_spill] sm:$0xff]  ;;  %v6685_v60 = vld [vmem:[#allocation36_spill] sm:$0xff] }
 0x320   : > { %4583 = vrcp.f32 %v2758_v22  ;;  %v2759_v42 = vsel %vm894_vm4, %v6025_v28, 0.0  ;;  %v2760_v54 = vsel %vm894_vm4, %v6029_v25, 0.0  ;;  %v2596_v26 = vsub.f32 %v5652_v55, %v2536_v34 }
 0x321   : > { %v3141_v53 = vsel %vm894_vm4, %v3053_v33, 0.0  ;;  %v3142_v18 = vsel %vm894_vm4, %v3054_v52, 0.0  ;;  %v2330_v32 = vrot.slane %v2329_v29, 4  ;;  %v2761_v61 = vadd.f32 %v2760_v54, %v2759_v42 }
 0x322   : > { %v3143_v31 = vadd.f32 %v3142_v18, %v3141_v53  ;;  %v2649_v1 = vmul.f32 1.442695, %v2595_v49  ;;  %v2111_v45 = vmax.f32 %v2109_v44, %v2110_v43  ;;  %v2542_v20 = vrot.slane %v2541_v30, 2 }
 0x323   : > { %v4578_v11 = vpop.eup %4577  ;;  %v2331_v6 = vadd.f32 %v2330_v32, %v2329_v29  ;;  %v2762_v48 = vrot.slane %v2761_v61, 4  ;;  %v2114_v12 = vsel %vm1216_vm5, %v5692_v59, -inf  ;;  %v2651_v43 = vmul.f32 1.442695, %v2596_v26 }
 0x324   : > { %v6045_v41 = vpop.eup %4579  ;;  %v3144_v16 = vrot.slane %v3143_v31, 4  ;;  %v2415_v46 = vmul.f32 %v4578_v11, %v5964_v62  ;;  %v2416_v56 = vmul.f32 %v4578_v11, %v5970_v27  ;;  %4585 = vpow2.f32 %v2649_v1 }
 0x325   : > { %v6049_v22 = vpop.eup %4581  ;;  %v2332_v55 = vrot.slane %v2331_v6, 2  ;;  %v2763_v10 = vadd.f32 %v2762_v48, %v2761_v61  ;;  %v2336_v44 = vsel %vm1216_vm5, %v6045_v41, 0.0  ;;  %4587 = vpow2.f32 %v2651_v43  ;;  %v3215_v43 = vld [vmem:[%s6484_s9] sm:$0xff] }
 0x326   : > { %v3145_v34 = vadd.f32 %v3144_v16, %v3143_v31  ;;  %v2879_v33 = vmul.f32 %v2415_v46, %v6684_v4  ;;  %v2880_v52 = vmul.f32 %v2416_v56, %v6685_v60  ;;  %v2337_v29 = vsel %vm1216_vm5, %v6049_v22, 0.0  ;;  %4263 = vmatprep.mubr.msk.f32.mxu1 %vm894_vm4, %v3215_v43 }
 0x327   : > { %v2333_v62 = vadd.f32 %v2332_v55, %v2331_v6  ;;  %v2764_v42 = vrot.slane %v2763_v10, 2  ;;  %v2338_v27 = vadd.f32 %v2337_v29, %v2336_v44  ;;  %v2112_v18 = vrot.slane %v2111_v45, 1 }
 0x328   : > { %v3146_v54 = vrot.slane %v3145_v34, 2  ;;  %v2974_v49 = vsel %vm1216_vm5, %v2879_v33, 0.0  ;;  %v2975_v53 = vsel %vm1216_vm5, %v2880_v52, 0.0  ;;  %v2543_v16 = vmax.f32 %v2541_v30, %v2542_v20  ;;  %v6687_v20 = vld [vmem:[#allocation12_spill] sm:$0xff] }
 0x329   : > { %v2976_v32 = vadd.f32 %v2975_v53, %v2974_v49  ;;  %v2334_v61 = vrot.slane %v2333_v62, 1  ;;  %v2765_v31 = vadd.f32 %v2764_v42, %v2763_v10  ;;  %v2339_v26 = vrot.slane %v2338_v27, 4 }
 0x32a   : > { %v4584_v1 = vpop.eup %4583  ;;  %v3147_v11 = vadd.f32 %v3146_v54, %v3145_v34  ;;  %v2113_v48 = vmax.f32 %v2111_v45, %v2112_v18  ;;  %v2116_v46 = vmax.f32 %v2114_v12, %v6011_v8  ;;  %v6686_v45 = vld [vmem:[#allocation11_spill] sm:$0xff] }
 0x32b   : > { %v2977_v6 = vrot.slane %v2976_v32, 4  ;;  %v2847_v56 = vmul.f32 %v4584_v1, %v5988_v63  ;;  %v2848_v55 = vmul.f32 %v4584_v1, %v5990_v36  ;;  %v2335_v44 = vadd.f32 %v2334_v61, %v2333_v62 }
 0x32c   : > { %v3148_v4 = vrot.slane %v3147_v11, 1  ;;  %v2766_v33 = vrot.slane %v2765_v31, 1  ;;  %v2340_v10 = vadd.f32 %v2339_v26, %v2338_v27  ;;  %v2165_v60 = vsub.f32 %v5670_v35, %v2113_v48 }
 0x32d   : > { %v2978_v30 = vadd.f32 %v2977_v6, %v2976_v32  ;;  %v3055_v8 = vmul.f32 %v2847_v56, %v6686_v45  ;;  %v3056_v12 = vmul.f32 %v2848_v55, %v6687_v20  ;;  %4589 = vrcp.f32 %v2335_v44 }
 0x32e   : > { %v6069_v63 = vpop.eup %4585  ;;  %v6071_v36 = vadd.f32 %v3148_v4, %v3147_v11  ;;  %v2767_v34 = vadd.f32 %v2766_v33, %v2765_v31  ;;  %v2341_v52 = vrot.slane %v2340_v10, 2  ;;  %v2166_v29 = vsub.f32 %v5664_v14, %v2113_v48 }
 0x32f   : > { %v2979_v62 = vrot.slane %v2978_v30, 2  ;;  %v3150_v42 = vsel %vm894_vm4, %v3055_v8, 0.0  ;;  %v3151_v35 = vsel %vm894_vm4, %v3056_v12, 0.0  ;;  %v2768_v27 = vsel %vm894_vm4, %v6069_v63, 0.0  ;;  %v6078_v18 = vpop.eup %4587 }
 0x330   : > { %v3152_v54 = vadd.f32 %v3151_v35, %v3150_v42  ;;  %4591 = vrcp.f32 %v2767_v34  ;;  %v2342_v49 = vadd.f32 %v2341_v52, %v2340_v10  ;;  %v2221_v53 = vmul.f32 1.442695, %v2165_v60 }
 0x331   : > { %v2980_v32 = vadd.f32 %v2979_v62, %v2978_v30  ;;  %v2223_v61 = vmul.f32 1.442695, %v2166_v29  ;;  %v2544_v31 = vrot.slane %v2543_v16, 1  ;;  %v2117_v26 = vrot.slane %v2116_v46, 4 }
 0x332   : > { %v3153_v1 = vrot.slane %v3152_v54, 4  ;;  %v2343_v14 = vrot.slane %v2342_v49, 1  ;;  %v2769_v11 = vsel %vm894_vm4, %v6078_v18, 0.0  ;;  %4593 = vpow2.f32 %v2221_v53 }
 0x333   : > { %v2981_v48 = vrot.slane %v2980_v32, 1  ;;  %v2770_v6 = vadd.f32 %v2769_v11, %v2768_v27  ;;  %4595 = vpow2.f32 %v2223_v61  ;;  %v2545_v56 = vmax.f32 %v2543_v16, %v2544_v31 }
 0x334   : > { %v3154_v55 = vadd.f32 %v3153_v1, %v3152_v54  ;;  %v2344_v44 = vadd.f32 %v2343_v14, %v2342_v49  ;;  %v2118_v43 = vmax.f32 %v2116_v46, %v2117_v26  ;;  %v2546_v4 = vsel %vm894_vm4, %v5721_v15, -inf  ;;  %v6688_v49 = vld [vmem:[#allocation37_spill] sm:$0xff] }
 0x335   : > { %v6084_v33 = vadd.f32 %v2981_v48, %v2980_v32  ;;  %v2771_v10 = vrot.slane %v2770_v6, 4  ;;  %v2597_v60 = vsub.f32 %v5672_v57, %v2545_v56  ;;  %v2598_v30 = vsub.f32 %v5666_v40, %v2545_v56  ;;  %v6689_v32 = vld [vmem:[#allocation39_spill] sm:$0xff] }
 0x336   : > { %v3155_v45 = vrot.slane %v3154_v55, 2  ;;  %4597 = vrcp.f32 %v2344_v44  ;;  %v2119_v8 = vrot.slane %v2118_v43, 2  ;;  %v2548_v20 = vmax.f32 %v2546_v4, %v6019_v19  ;;  %v6690_v44 = vld [vmem:[#allocation13_spill] sm:$0xff]  ;;  %v6691_v4 = vld [vmem:[#allocation15_spill] sm:$0xff] }
 0x337   : > { %v4590_v12 = vpop.eup %4589  ;;  %v2772_v16 = vadd.f32 %v2771_v10, %v2770_v6  ;;  %v2653_v34 = vmul.f32 1.442695, %v2597_v60  ;;  %v2655_v52 = vmul.f32 1.442695, %v2598_v30  ;;  %v6091_v46 = vsel %vm1216_vm5, %v5751_v47, -inf }
 0x338   : > { %v3156_v29 = vadd.f32 %v3155_v45, %v3154_v55  ;;  %v2417_v62 = vmul.f32 %v4590_v12, %v6013_v13  ;;  %v2418_v57 = vmul.f32 %v4590_v12, %v6021_v7  ;;  %v2120_v42 = vmax.f32 %v2118_v43, %v2119_v8 }
 0x339   : > { %v2773_v40 = vrot.slane %v2772_v16, 2  ;;  %4599 = vpow2.f32 %v2653_v34  ;;  %v2549_v35 = vrot.slane %v2548_v20, 4  ;;  %v6097_v19 = vsel %vm894_vm4, %v5753_v17, -inf }
 0x33a   : > { %v4592_v27 = vpop.eup %4591  ;;  %v3157_v54 = vrot.slane %v3156_v29, 1  ;;  %v2881_v53 = vmul.f32 %v2417_v62, %v6688_v49  ;;  %v2882_v61 = vmul.f32 %v2418_v57, %v6689_v32  ;;  %4601 = vpow2.f32 %v2655_v52 }
 0x33b   : > { %v2849_v31 = vmul.f32 %v4592_v27, %v6025_v28  ;;  %v2850_v13 = vmul.f32 %v4592_v27, %v6029_v25  ;;  %v2774_v7 = vadd.f32 %v2773_v40, %v2772_v16  ;;  %v2121_v26 = vrot.slane %v2120_v42, 1 }
 0x33c   : > { %v6103_v1 = vpop.eup %4593  ;;  %v6105_v14 = vadd.f32 %v3157_v54, %v3156_v29  ;;  %v2983_v11 = vsel %vm1216_vm5, %v2881_v53, 0.0  ;;  %v2984_v48 = vsel %vm1216_vm5, %v2882_v61, 0.0  ;;  %v2550_v6 = vmax.f32 %v2548_v20, %v2549_v35 }
 0x33d   : > { %v6109_v56 = vpop.eup %4595  ;;  %v2985_v55 = vadd.f32 %v2984_v48, %v2983_v11  ;;  %v3057_v43 = vmul.f32 %v2849_v31, %v6690_v44  ;;  %v3058_v28 = vmul.f32 %v2850_v13, %v6691_v4  ;;  %v2775_v10 = vrot.slane %v2774_v7, 1  ;;  %v6692_v31 = vld [vmem:[#allocation41_spill] sm:$0xff] }
 0x33e   : > { %v2345_v25 = vsel %vm1216_vm5, %v6103_v1, 0.0  ;;  %v2346_v60 = vsel %vm1216_vm5, %v6109_v56, 0.0  ;;  %v2122_v30 = vmax.f32 %v2120_v42, %v2121_v26  ;;  %v2551_v45 = vrot.slane %v2550_v6, 2 }
 0x33f   : > { %v2986_v8 = vrot.slane %v2985_v55, 4  ;;  %v3159_v12 = vsel %vm894_vm4, %v3057_v43, 0.0  ;;  %v3160_v20 = vsel %vm894_vm4, %v3058_v28, 0.0  ;;  %v2776_v16 = vadd.f32 %v2775_v10, %v2774_v7  ;;  %v6693_v7 = vld [vmem:[#allocation44_spill] sm:$0xff] }
 0x340   : > { %v4598_v34 = vpop.eup %4597  ;;  %v3161_v52 = vadd.f32 %v3160_v20, %v3159_v12  ;;  %v2347_v29 = vadd.f32 %v2346_v60, %v2345_v25  ;;  %v2167_v62 = vsub.f32 %v5692_v59, %v2122_v30  ;;  %v2168_v57 = vsub.f32 %v5687_v37, %v2122_v30 }
 0x341   : > { %v2987_v40 = vadd.f32 %v2986_v8, %v2985_v55  ;;  %v2419_v35 = vmul.f32 %v4598_v34, %v6045_v41  ;;  %v2420_v27 = vmul.f32 %v4598_v34, %v6049_v22  ;;  %4603 = vrcp.f32 %v2776_v16 }
 0x342   : > { %v3162_v42 = vrot.slane %v3161_v52, 4  ;;  %v2348_v54 = vrot.slane %v2347_v29, 4  ;;  %v2225_v49 = vmul.f32 1.442695, %v2167_v62  ;;  %v2227_v53 = vmul.f32 1.442695, %v2168_v57 }
 0x343   : > { %v6123_v32 = vpop.eup %4599  ;;  %v2988_v61 = vrot.slane %v2987_v40, 2  ;;  %v2883_v13 = vmul.f32 %v2419_v35, %v6692_v31  ;;  %v2884_v26 = vmul.f32 %v2420_v27, %v6693_v7  ;;  %v2552_v59 = vmax.f32 %v2550_v6, %v2551_v45 }
 0x344   : > { %v6127_v11 = vpop.eup %4601  ;;  %v3163_v37 = vadd.f32 %v3162_v42, %v3161_v52  ;;  %v2349_v48 = vadd.f32 %v2348_v54, %v2347_v29  ;;  %v2777_v41 = vsel %vm894_vm4, %v6123_v32, 0.0  ;;  %4605 = vpow2.f32 %v2225_v49 }
 0x345   : > { %v6131_v22 = vadd.f32 %v2988_v61, %v2987_v40  ;;  %v2992_v55 = vsel %vm1216_vm5, %v2883_v13, 0.0  ;;  %v2993_v44 = vsel %vm1216_vm5, %v2884_v26, 0.0  ;;  %v2778_v43 = vsel %vm894_vm4, %v6127_v11, 0.0 }
 0x346   : > { %v3164_v4 = vrot.slane %v3163_v37, 2  ;;  %v2994_v28 = vadd.f32 %v2993_v44, %v2992_v55  ;;  %v2350_v6 = vrot.slane %v2349_v48, 2  ;;  %v2779_v10 = vadd.f32 %v2778_v43, %v2777_v41 }
 0x347   : > { %v2990_v25 = vrot.slane %v6131_v22, 1  ;;  %4607 = vpow2.f32 %v2227_v53  ;;  %v2553_v60 = vrot.slane %v2552_v59, 1  ;;  %v2123_v30 = vsel %vm1216_vm5, %v5759_v9, -inf }
 0x348   : > { %v6140_v45 = vadd.f32 %v3164_v4, %v3163_v37  ;;  %v2995_v8 = vrot.slane %v2994_v28, 4  ;;  %v2351_v12 = vadd.f32 %v2350_v6, %v2349_v48  ;;  %v2780_v20 = vrot.slane %v2779_v10, 4 }
 0x349   : > { %v2554_v16 = vmax.f32 %v2552_v59, %v2553_v60  ;;  %v2125_v34 = vmax.f32 %v2123_v30, %v6091_v46  ;;  %v2555_v52 = vsel %vm894_vm4, %v5787_v2, -inf  ;;  %v2133_v29 = vsel %vm1216_vm5, %v5815_v50, -inf }
 0x34a   : > { %v3166_v62 = vrot.slane %v6140_v45, 1  ;;  %v2996_v57 = vadd.f32 %v2995_v8, %v2994_v28  ;;  %v2352_v40 = vrot.slane %v2351_v12, 1  ;;  %v2781_v35 = vadd.f32 %v2780_v20, %v2779_v10  ;;  %v6696_v8 = vld [vmem:[#allocation59_spill] sm:$0xff] }
 0x34b   : > { %v4604_v27 = vpop.eup %4603  ;;  %v2599_v42 = vsub.f32 %v5721_v15, %v2554_v16  ;;  %v2600_v54 = vsub.f32 %v5689_v58, %v2554_v16  ;;  %v2126_v49 = vrot.slane %v2125_v34, 4  ;;  %v2557_v53 = vmax.f32 %v2555_v52, %v6097_v19  ;;  %v6694_v15 = vld [vmem:[#allocation17_spill] sm:$0xff]  ;;  %v6695_v58 = vld [vmem:[#allocation19_spill] sm:$0xff] }
 0x34c   : > { %v2997_v46 = vrot.slane %v2996_v57, 2  ;;  %v2851_v61 = vmul.f32 %v4604_v27, %v6069_v63  ;;  %v2852_v31 = vmul.f32 %v4604_v27, %v6078_v18  ;;  %v2353_v13 = vadd.f32 %v2352_v40, %v2351_v12 }
 0x34d   : > { %v2782_v7 = vrot.slane %v2781_v35, 2  ;;  %v2657_v26 = vmul.f32 1.442695, %v2599_v42  ;;  %v2659_v59 = vmul.f32 1.442695, %v2600_v54  ;;  %v2127_v37 = vmax.f32 %v2125_v34, %v2126_v49  ;;  %v6697_v34 = vld [vmem:[#allocation58_spill] sm:$0xff] }
 0x34e   : > { %v6153_v48 = vpop.eup %4605  ;;  %v6155_v41 = vadd.f32 %v2997_v46, %v2996_v57  ;;  %v3059_v55 = vmul.f32 %v2851_v61, %v6694_v15  ;;  %v3060_v44 = vmul.f32 %v2852_v31, %v6695_v58  ;;  %4609 = vrcp.f32 %v2353_v13  ;;  %v6698_v57 = vld [vmem:[#allocation62_spill] sm:$0xff]  ;;  %v6699_v31 = vld [vmem:[#allocation76_spill] sm:$0xff] }
 0x34f   : > { %v2783_v19 = vadd.f32 %v2782_v7, %v2781_v35  ;;  %v2354_v63 = vsel %vm1216_vm5, %v6153_v48, 0.0  ;;  %4611 = vpow2.f32 %v2657_v26  ;;  %v2128_v18 = vrot.slane %v2127_v37, 2  ;;  %v6701_v58 = vld [vmem:[#allocation60_spill] sm:$0xff] }
 0x350   : > { %v3168_v43 = vsel %vm894_vm4, %v3059_v55, 0.0  ;;  %v3169_v4 = vsel %vm894_vm4, %v3060_v44, 0.0  ;;  %4613 = vpow2.f32 %v2659_v59  ;;  %v2558_v28 = vrot.slane %v2557_v53, 4 }
 0x351   : > { %v6163_v6 = vpop.eup %4607  ;;  %v3170_v10 = vadd.f32 %v3169_v4, %v3168_v43  ;;  %v2784_v60 = vrot.slane %v2783_v19, 1  ;;  %v2129_v30 = vmax.f32 %v2127_v37, %v2128_v18  ;;  %v2565_v12 = vsel %vm894_vm4, %v6696_v8, -inf }
 0x352   : > { %v2355_v20 = vsel %vm1216_vm5, %v6163_v6, 0.0  ;;  %v2559_v16 = vmax.f32 %v2557_v53, %v2558_v28  ;;  %v2132_v52 = vsel %vm1216_vm5, %v6697_v34, -inf  ;;  %v2564_v40 = vsel %vm894_vm4, %v6698_v57, -inf }
 0x353   : > { %v3171_v35 = vrot.slane %v3170_v10, 4  ;;  %v2785_v27 = vadd.f32 %v2784_v60, %v2783_v19  ;;  %v2356_v42 = vadd.f32 %v2355_v20, %v2354_v63  ;;  %v2130_v54 = vrot.slane %v2129_v30, 1 }
 0x354   : > { %v2560_v49 = vrot.slane %v2559_v16, 2  ;;  %v2134_v46 = vmax.f32 %v2132_v52, %v2133_v29  ;;  %v2566_v61 = vmax.f32 %v2564_v40, %v2565_v12  ;;  %v6700_v13 = vrot.slane %v6699_v31, 1 }
 0x355   : > { %v3172_v26 = vadd.f32 %v3171_v35, %v3170_v10  ;;  %4615 = vrcp.f32 %v2785_v27  ;;  %v2357_v53 = vrot.slane %v2356_v42, 4  ;;  %v2131_v59 = vmax.f32 %v2129_v30, %v2130_v54 }
 0x356   : > { %v6176_v7 = vadd.f32 %v6700_v13, %v6699_v31  ;;  %v2561_v37 = vmax.f32 %v2559_v16, %v2560_v49  ;;  %v2135_v15 = vrot.slane %v2134_v46, 4  ;;  %v2567_v55 = vrot.slane %v2566_v61, 4  ;;  %v6703_v49 = vld [vmem:[#allocation49_spill] sm:$0xff] }
 0x357   : > { %v3103_v44 = vrot.slane %v6701_v58, 1  ;;  %v3173_v19 = vrot.slane %v3172_v26, 2  ;;  %v2358_v63 = vadd.f32 %v2357_v53, %v2356_v42  ;;  %v2169_v18 = vsub.f32 %v5759_v9, %v2131_v59  ;;  %v6702_v42 = vld [vmem:[#allocation46_spill] sm:$0xff] }
 0x358   : > { %v2170_v29 = vsub.f32 %v5751_v47, %v2131_v59  ;;  %v4610_v43 = vpop.eup %4609  ;;  %v2562_v4 = vrot.slane %v2561_v37, 1  ;;  %v2136_v28 = vmax.f32 %v2134_v46, %v2135_v15  ;;  %v2568_v60 = vmax.f32 %v2566_v61, %v2567_v55 }
 0x359   : > { %v6182_v10 = vadd.f32 %v3103_v44, %v6701_v58  ;;  %v6184_v12 = vpop.eup %4611  ;;  %v6186_v30 = vadd.f32 %v3173_v19, %v3172_v26  ;;  %v2421_v20 = vmul.f32 %v4610_v43, %v6103_v1  ;;  %v2422_v16 = vmul.f32 %v4610_v43, %v6109_v56 }
 0x35a   : > { %v2359_v52 = vrot.slane %v2358_v63, 2  ;;  %v6190_v40 = vpop.eup %4613  ;;  %v2786_v47 = vsel %vm894_vm4, %v6184_v12, 0.0  ;;  %v2229_v9 = vmul.f32 1.442695, %v2169_v18  ;;  %v2231_v35 = vmul.f32 1.442695, %v2170_v29 }
 0x35b   : > { %v2563_v27 = vmax.f32 %v2561_v37, %v2562_v4  ;;  %v2885_v54 = vmul.f32 %v2421_v20, %v6702_v42  ;;  %v2886_v46 = vmul.f32 %v2422_v16, %v6703_v49  ;;  %v2787_v31 = vsel %vm894_vm4, %v6190_v40, 0.0  ;;  %v6706_v42 = vld [vmem:[#allocation24_spill] sm:$0xff] }
 0x35c   : > { %v2360_v61 = vadd.f32 %v2359_v52, %v2358_v63  ;;  %v2788_v1 = vadd.f32 %v2787_v31, %v2786_v47  ;;  %4617 = vpow2.f32 %v2229_v9  ;;  %v2137_v63 = vrot.slane %v2136_v28, 2 }
 0x35d   : > { %v2601_v56 = vsub.f32 %v5787_v2, %v2563_v27  ;;  %v2602_v13 = vsub.f32 %v5753_v17, %v2563_v27  ;;  %v3001_v26 = vsel %vm1216_vm5, %v2885_v54, 0.0  ;;  %v3002_v53 = vsel %vm1216_vm5, %v2886_v46, 0.0 }
 0x35e   : > { %v2361_v59 = vrot.slane %v2360_v61, 1  ;;  %4619 = vpow2.f32 %v2231_v35  ;;  %v3003_v37 = vadd.f32 %v3002_v53, %v3001_v26  ;;  %v2789_v15 = vrot.slane %v2788_v1, 4  ;;  %v6705_v35 = vld [vmem:[#allocation21_spill] sm:$0xff] }
 0x35f   : > { %v2661_v55 = vmul.f32 1.442695, %v2601_v56  ;;  %v2663_v58 = vmul.f32 1.442695, %v2602_v13  ;;  %v4616_v44 = vpop.eup %4615  ;;  %v2569_v18 = vrot.slane %v2568_v60, 2  ;;  %v6704_v29 = vrot.slane %v5857_v38, 2 }
 0x360   : > { %v2362_v19 = vadd.f32 %v2361_v59, %v2360_v61  ;;  %v3004_v43 = vrot.slane %v3003_v37, 4  ;;  %v2853_v17 = vmul.f32 %v4616_v44, %v6123_v32  ;;  %v2854_v4 = vmul.f32 %v4616_v44, %v6127_v11 }
 0x361   : > { %v3111_v2 = vadd.f32 %v6704_v29, %v5857_v38  ;;  %v2790_v20 = vadd.f32 %v2789_v15, %v2788_v1  ;;  %v2138_v16 = vmax.f32 %v2136_v28, %v2137_v63  ;;  %v2570_v52 = vmax.f32 %v2568_v60, %v2569_v18 }
 0x362   : > { %4621 = vrcp.f32 %v2362_v19  ;;  %v6207_v9 = vadd.f32 %v3004_v43, %v3003_v37  ;;  %v3061_v27 = vmul.f32 %v2853_v17, %v6705_v35  ;;  %v3062_v54 = vmul.f32 %v2854_v4, %v6706_v42 }
 0x363   : > { %v3112_v47 = vrot.slane %v3111_v2, 1  ;;  %v2791_v49 = vrot.slane %v2790_v20, 2  ;;  %4623 = vpow2.f32 %v2661_v55  ;;  %v2139_v46 = vrot.slane %v2138_v16, 1 }
 0x364   : > { %v2571_v38 = vrot.slane %v2570_v52, 1  ;;  %v3006_v32 = vrot.slane %v6207_v9, 2  ;;  %v3177_v11 = vsel %vm894_vm4, %v3061_v27, 0.0  ;;  %v3178_v28 = vsel %vm894_vm4, %v3062_v54, 0.0 }
 0x365   : > { %v6211_v61 = vadd.f32 %v3112_v47, %v3111_v2  ;;  %v2792_v60 = vadd.f32 %v2791_v49, %v2790_v20  ;;  %v3179_v31 = vadd.f32 %v3178_v28, %v3177_v11  ;;  %4625 = vpow2.f32 %v2663_v58 }
 0x366   : > { %v2140_v1 = vmax.f32 %v2138_v16, %v2139_v46  ;;  %v2572_v56 = vmax.f32 %v2570_v52, %v2571_v38  ;;  %v6216_v13 = vpop.eup %4617  ;;  %v3119_v53 = vrot.slane %v5911_v5, 2  ;;  %v3127_v59 = vadd.f32 %v3126_v3, %v5926_v0  ;;  %v6707_v46 = vld [vmem:[#allocation51_spill] sm:$0xff]  ;;  %v6708_v38 = vld [vmem:[#allocation52_spill] sm:$0xff] }
 0x367   : > { %v2793_v26 = vrot.slane %v2792_v60, 1  ;;  %v3135_v37 = vrot.slane %v5980_v51, 4  ;;  %v3180_v55 = vrot.slane %v3179_v31, 4  ;;  %v2363_v44 = vsel %vm1216_vm5, %v6216_v13, 0.0 }
 0x368   : > { %v6223_v15 = vpop.eup %4619  ;;  %v2171_v58 = vsub.f32 %v6697_v34, %v2140_v1  ;;  %v2172_v19 = vsub.f32 %v5815_v50, %v2140_v1  ;;  %v2603_v29 = vsub.f32 %v6698_v57, %v2572_v56  ;;  %v2604_v0 = vsub.f32 %v6696_v8, %v2572_v56 }
 0x369   : > { %v2794_v63 = vadd.f32 %v2793_v26, %v2792_v60  ;;  %v2364_v18 = vsel %vm1216_vm5, %v6223_v15, 0.0  ;;  %v3181_v3 = vadd.f32 %v3180_v55, %v3179_v31  ;;  %v3120_v16 = vadd.f32 %v3119_v53, %v5911_v5 }
 0x36a   : > { %v2365_v2 = vadd.f32 %v2364_v18, %v2363_v44  ;;  %v2233_v43 = vmul.f32 1.442695, %v2171_v58  ;;  %v2235_v17 = vmul.f32 1.442695, %v2172_v19  ;;  %v2665_v4 = vmul.f32 1.442695, %v2603_v29 }
 0x36b   : > { %4627 = vrcp.f32 %v2794_v63  ;;  %v2667_v20 = vmul.f32 1.442695, %v2604_v0  ;;  %v3182_v52 = vrot.slane %v3181_v3, 2  ;;  %v3128_v47 = vrot.slane %v3127_v59, 2 }
 0x36c   : > { %v4622_v34 = vpop.eup %4621  ;;  %v2366_v50 = vrot.slane %v2365_v2, 4  ;;  %4629 = vpow2.f32 %v2233_v43  ;;  %v3121_v8 = vrot.slane %v3120_v16, 1  ;;  %v3136_v49 = vadd.f32 %v3135_v37, %v5980_v51  ;;  %v6710_v43 = vld [vmem:[#allocation74_spill] sm:$0xff] }
 0x36d   : > { %v2423_v35 = vmul.f32 %v4622_v34, %v6153_v48  ;;  %v2424_v57 = vmul.f32 %v4622_v34, %v6163_v6  ;;  %4631 = vpow2.f32 %v2235_v17  ;;  %v6236_v27 = vpop.eup %4623  ;;  %v3129_v54 = vadd.f32 %v3128_v47, %v3127_v59 }
 0x36e   : > { %v2367_v42 = vadd.f32 %v2366_v50, %v2365_v2  ;;  %4633 = vpow2.f32 %v2665_v4  ;;  %v2795_v28 = vsel %vm894_vm4, %v6236_v27, 0.0  ;;  %v6245_v60 = vadd.f32 %v3121_v8, %v3120_v16  ;;  %v6709_v2 = vld [vmem:[#allocation72_spill] sm:$0xff] }
 0x36f   : > { %v2887_v5 = vmul.f32 %v2423_v35, %v6707_v46  ;;  %v2888_v11 = vmul.f32 %v2424_v57, %v6708_v38  ;;  %4635 = vpow2.f32 %v2667_v20  ;;  %v6243_v48 = vpop.eup %4625  ;;  %v3130_v31 = vrot.slane %v3129_v54, 1  ;;  %v6712_v46 = vld [vmem:[#allocation28_spill] sm:$0xff] }
 0x370   : > { %v2368_v6 = vrot.slane %v2367_v42, 2  ;;  %v3137_v1 = vrot.slane %v3136_v49, 2  ;;  %v2796_v51 = vsel %vm894_vm4, %v6243_v48, 0.0  ;;  %v6254_v53 = vadd.f32 %v3166_v62, %v6140_v45 }
 0x371   : > { %v3010_v56 = vsel %vm1216_vm5, %v2887_v5, 0.0  ;;  %v3011_v26 = vsel %vm1216_vm5, %v2888_v11, 0.0  ;;  %v2797_v55 = vadd.f32 %v2796_v51, %v2795_v28  ;;  %v6256_v44 = vadd.f32 %v3130_v31, %v3129_v54  ;;  %v6711_v54 = vld [vmem:[#allocation27_spill] sm:$0xff] }
 0x372   : > { %v3012_v59 = vadd.f32 %v3011_v26, %v3010_v56  ;;  %v2369_v37 = vadd.f32 %v2368_v6, %v2367_v42  ;;  %v3138_v58 = vadd.f32 %v3137_v1, %v3136_v49  ;;  %v3175_v19 = vrot.slane %v6186_v30, 1 }
 0x373   : > { %v3183_v63 = vadd.f32 %v3182_v52, %v3181_v3  ;;  %v2798_v0 = vrot.slane %v2797_v55, 4  ;;  %v3234_v17 = vsel %vm3233_vm6, %v6710_v43, %v6709_v2 }
 0x374   : > { %v3013_v18 = vrot.slane %v3012_v59, 4  ;;  %v2370_v29 = vrot.slane %v2369_v37, 1  ;;  %v3139_v45 = vrot.slane %v3138_v58, 1  ;;  %v3176_v62 = vadd.f32 %v3175_v19, %v6186_v30 }
 0x375   : > { %v4628_v4 = vpop.eup %4627  ;;  %v3184_v20 = vrot.slane %v3183_v63, 1  ;;  %v2799_v35 = vadd.f32 %v2798_v0, %v2797_v55  ;;  %v3236_v6 = vsel %vm3235_vm7, %v6176_v7, %v3234_v17  ;;  %v6713_v0 = vld [vmem:[#allocation75_spill] sm:$0xff] }
 0x376   : > { %v6263_v16 = vpop.eup %4629  ;;  %v6265_v34 = vadd.f32 %v3013_v18, %v3012_v59  ;;  %v2855_v3 = vmul.f32 %v4628_v4, %v6184_v12  ;;  %v2856_v52 = vmul.f32 %v4628_v4, %v6190_v40  ;;  %v2371_v50 = vadd.f32 %v2370_v29, %v2369_v37 }
 0x377   : > { %v6269_v47 = vpop.eup %4631  ;;  %v2372_v57 = vsel %vm1216_vm5, %v6263_v16, 0.0  ;;  %v3140_v8 = vadd.f32 %v3139_v45, %v3138_v58  ;;  %v3185_v42 = vadd.f32 %v3184_v20, %v3183_v63  ;;  %v2800_v38 = vrot.slane %v2799_v35, 2 }
 0x378   : > { %v6273_v30 = vpop.eup %4633  ;;  %v3063_v49 = vmul.f32 %v2855_v3, %v6711_v54  ;;  %v3064_v5 = vmul.f32 %v2856_v52, %v6712_v46  ;;  %4637 = vrcp.f32 %v2371_v50  ;;  %v2373_v12 = vsel %vm1216_vm5, %v6269_v47, 0.0  ;;  %v6715_v3 = vld [vmem:[#allocation57_spill] sm:$0xff] }
 0x379   : > { %v6279_v40 = vpop.eup %4635  ;;  %v2374_v11 = vadd.f32 %v2373_v12, %v2372_v57  ;;  %v2804_v28 = vsel %vm894_vm4, %v6273_v30, 0.0  ;;  %v2801_v51 = vadd.f32 %v2800_v38, %v2799_v35  ;;  %v3238_v55 = vsel %vm3237_vm8, %v6182_v10, %v3236_v6  ;;  %v6716_v50 = vld [vmem:[#allocation61_spill] sm:$0xff] }
 0x37a   : > { %v3186_v31 = vsel %vm894_vm4, %v3063_v49, 0.0  ;;  %v3187_v1 = vsel %vm894_vm4, %v3064_v5, 0.0  ;;  %v2805_v56 = vsel %vm894_vm4, %v6279_v40, 0.0  ;;  %v3240_v18 = vsel %vm3239_vm9, %v6211_v61, %v3238_v55 }
 0x37b   : > { %v3188_v26 = vadd.f32 %v3187_v1, %v3186_v31  ;;  %v2375_v59 = vrot.slane %v2374_v11, 4  ;;  %v2806_v37 = vadd.f32 %v2805_v56, %v2804_v28  ;;  %v2802_v7 = vrot.slane %v2801_v51, 1 }
 0x37c   : > { %v3247_v29 = vsel %vm3233_vm6, %v6105_v14, %v6071_v36  ;;  %v6714_v2 = vrot.slane %v6713_v0, 1  ;;  %v3242_v20 = vsel %vm3241_vm10, %v6245_v60, %v3240_v18  ;;  %v2927_v52 = vrot.slane %v6715_v3, 1 }
 0x37d   : > { %v3189_v58 = vrot.slane %v3188_v26, 4  ;;  %v2376_v19 = vadd.f32 %v2375_v59, %v2374_v11  ;;  %v2807_v63 = vrot.slane %v2806_v37, 4  ;;  %v2803_v17 = vadd.f32 %v2802_v7, %v2801_v51 }
 0x37e   : > { %v6299_v43 = vadd.f32 %v6714_v2, %v6713_v0  ;;  %v3248_v61 = vsel %vm3235_vm7, %v6254_v53, %v3247_v29  ;;  %v6717_v36 = vrot.slane %v6716_v50, 2  ;;  %v3244_v46 = vsel %vm3243_vm11, %v6256_v44, %v3242_v20  ;;  %v6718_v44 = vld [vmem:[#allocation53_spill] sm:$0xff] }
 0x37f   : > { %v3190_v10 = vadd.f32 %v3189_v58, %v3188_v26  ;;  %v2377_v4 = vrot.slane %v2376_v19, 2  ;;  %v2808_v45 = vadd.f32 %v2807_v63, %v2806_v37  ;;  %4639 = vrcp.f32 %v2803_v17  ;;  %v6719_v26 = vld [vmem:[#allocation54_spill] sm:$0xff] }
 0x380   : > { %v2935_v14 = vadd.f32 %v6717_v36, %v6716_v50  ;;  %v3249_v5 = vsel %vm3237_vm8, %v3176_v62, %v3248_v61  ;;  %v6313_v60 = vadd.f32 %v2927_v52, %v6715_v3  ;;  %v6318_v31 = vsel %vm3245_vm12, %v3140_v8, %v3244_v46 }
 0x381   : > { %v2378_v35 = vadd.f32 %v2377_v4, %v2376_v19  ;;  %v2809_v57 = vrot.slane %v2808_v45, 2  ;;  %v3191_v54 = vrot.slane %v3190_v10, 2  ;;  %v3250_v1 = vsel %vm3239_vm9, %v3185_v42, %v3249_v5 }
 0x382   : > { %v4638_v49 = vpop.eup %4637  ;;  %v2936_v53 = vrot.slane %v2935_v14, 1  ;;  %v2959_v8 = vrot.slane %v5958_v39, 4  ;;  %v3015_v52 = vrot.slane %v6265_v34, 2 }
 0x383   : > { %v2425_v12 = vmul.f32 %v4638_v49, %v6216_v13  ;;  %v2426_v38 = vmul.f32 %v4638_v49, %v6223_v15  ;;  %v2379_v11 = vrot.slane %v2378_v35, 1  ;;  %v2810_v28 = vadd.f32 %v2809_v57, %v2808_v45  ;;  %v6720_v13 = vld [vmem:[#allocation63_spill] sm:$0xff]  ;;  %v6721_v49 = vld [vmem:[#allocation29_spill] sm:$0xff] }
 0x384   : > { %v3192_v6 = vadd.f32 %v3191_v54, %v3190_v10  ;;  %v6321_v56 = vadd.f32 %v2936_v53, %v2935_v14  ;;  %v2943_v58 = vrot.slane %v6720_v13, 2  ;;  %v2951_v15 = vadd.f32 %v2950_v24, %v5919_v21 }
 0x385   : > { %v2889_v62 = vmul.f32 %v2425_v12, %v6718_v44  ;;  %v2890_v51 = vmul.f32 %v2426_v38, %v6719_v26  ;;  %v2380_v59 = vadd.f32 %v2379_v11, %v2378_v35  ;;  %v2811_v37 = vrot.slane %v2810_v28, 1  ;;  %v6723_v12 = vld [vmem:[#allocation71_spill] sm:$0xff] }
 0x386   : > { %v3193_v55 = vrot.slane %v3192_v6, 1  ;;  %v2944_v29 = vadd.f32 %v2943_v58, %v6720_v13  ;;  %v2952_v0 = vrot.slane %v2951_v15, 2  ;;  %v2960_v2 = vadd.f32 %v2959_v8, %v5958_v39 }
 0x387   : > { %v3019_v7 = vsel %vm1216_vm5, %v2889_v62, 0.0  ;;  %v3020_v42 = vsel %vm1216_vm5, %v2890_v51, 0.0  ;;  %4641 = vrcp.f32 %v2380_v59  ;;  %v2812_v19 = vadd.f32 %v2811_v37, %v2810_v28 }
 0x388   : > { %v3021_v63 = vadd.f32 %v3020_v42, %v3019_v7  ;;  %v3194_v18 = vadd.f32 %v3193_v55, %v3192_v6  ;;  %v2991_v21 = vadd.f32 %v2990_v25, %v6131_v22  ;;  %v2999_v24 = vrot.slane %v6155_v41, 1  ;;  %v6725_v7 = vld [vmem:[#allocation55_spill] sm:$0xff] }
 0x389   : > { %4643 = vrcp.f32 %v2812_v19  ;;  %v2945_v4 = vrot.slane %v2944_v29, 1  ;;  %v2953_v45 = vadd.f32 %v2952_v0, %v2951_v15  ;;  %v4640_v20 = vpop.eup %4639  ;;  %v2961_v61 = vrot.slane %v2960_v2, 2  ;;  %v6726_v19 = vld [vmem:[#allocation56_spill] sm:$0xff] }
 0x38a   : > { %v3022_v10 = vrot.slane %v3021_v63, 4  ;;  %v6339_v17 = vsel %vm3241_vm10, %v3194_v18, %v3250_v1  ;;  %v3000_v3 = vadd.f32 %v2999_v24, %v6155_v41  ;;  %v3007_v39 = vadd.f32 %v3006_v32, %v6207_v9  ;;  %v6722_v41 = vld [vmem:[#allocation30_spill] sm:$0xff]  ;;  %v6724_v9 = vld [vmem:[#allocation73_spill] sm:$0xff] }
 0x38b   : > { %v2857_v22 = vmul.f32 %v4640_v20, %v6236_v27  ;;  %v2858_v25 = vmul.f32 %v4640_v20, %v6243_v48  ;;  %v2946_v50 = vadd.f32 %v2945_v4, %v2944_v29  ;;  %v2954_v36 = vrot.slane %v2953_v45, 1 }
 0x38c   : > { %v2962_v14 = vadd.f32 %v2961_v61, %v2960_v2  ;;  %v3008_v35 = vrot.slane %v3007_v39, 1  ;;  %v3016_v57 = vadd.f32 %v3015_v52, %v6265_v34  ;;  %v3023_v54 = vadd.f32 %v3022_v10, %v3021_v63  ;;  %v6728_v10 = vld [vmem:[#allocation32_spill] sm:$0xff] }
 0x38d   : > { %v3065_v46 = vmul.f32 %v2857_v22, %v6721_v49  ;;  %v3066_v5 = vmul.f32 %v2858_v25, %v6722_v41  ;;  %v2955_v53 = vadd.f32 %v2954_v36, %v2953_v45  ;;  %v3355_v32 = vsel %vm3233_vm6, %v6724_v9, %v6723_v12 }
 0x38e   : > { %v2963_v38 = vrot.slane %v2962_v14, 1  ;;  %v3009_v27 = vadd.f32 %v3008_v35, %v3007_v39  ;;  %v3017_v11 = vrot.slane %v3016_v57, 1  ;;  %v3024_v48 = vrot.slane %v3023_v54, 2 }
 0x38f   : > { %v3195_v28 = vsel %vm894_vm4, %v3065_v46, 0.0  ;;  %v3196_v6 = vsel %vm894_vm4, %v3066_v5, 0.0  ;;  %v3356_v34 = vsel %vm3235_vm7, %v6299_v43, %v3355_v32  ;;  %v3362_v1 = vsel %vm3233_vm6, %v6084_v33, %v6031_v23 }
 0x390   : > { %v3197_v62 = vadd.f32 %v3196_v6, %v3195_v28  ;;  %v2964_v26 = vadd.f32 %v2963_v38, %v2962_v14  ;;  %v3018_v51 = vadd.f32 %v3017_v11, %v3016_v57  ;;  %v3025_v59 = vadd.f32 %v3024_v48, %v3023_v54  ;;  %v3213_v6 = vld [vmem:[%s6483_s8] sm:$0xff] }
 0x391   : > { %v4642_v44 = vpop.eup %4641  ;;  %v3357_v13 = vsel %vm3237_vm8, %v6313_v60, %v3356_v34  ;;  %v3363_v58 = vsel %vm3235_vm7, %v2991_v21, %v3362_v1  ;;  %v6727_v21 = vld [vmem:[#allocation31_spill] sm:$0xff]  ;;  %v3464_v34 = vpop.permute.xlu1 %3463 }
 0x392   : > { %v2427_v37 = vmul.f32 %v4642_v44, %v6263_v16  ;;  %v2428_v55 = vmul.f32 %v4642_v44, %v6269_v47  ;;  %v3198_v43 = vrot.slane %v3197_v62, 4  ;;  %v3026_v8 = vrot.slane %v3025_v59, 1  ;;  %v3459_v44 = vpop.permute.xlu0 %3458 }
 0x393   : > { %v4644_v15 = vpop.eup %4643  ;;  %v3358_v23 = vsel %vm3239_vm9, %v6321_v56, %v3357_v13  ;;  %v3364_v33 = vsel %vm3237_vm8, %v3000_v3, %v3363_v58 }
 0x394   : > { %v2891_v42 = vmul.f32 %v2427_v37, %v6725_v7  ;;  %v2892_v63 = vmul.f32 %v2428_v55, %v6726_v19  ;;  %v2859_v16 = vmul.f32 %v4644_v15, %v6273_v30  ;;  %v2860_v47 = vmul.f32 %v4644_v15, %v6279_v40 }
 0x395   : > { %v3199_v18 = vadd.f32 %v3198_v43, %v3197_v62  ;;  %v3027_v60 = vadd.f32 %v3026_v8, %v3025_v59  ;;  %v3359_v29 = vsel %vm3241_vm10, %v2946_v50, %v3358_v23  ;;  %v3365_v0 = vsel %vm3239_vm9, %v3009_v27, %v3364_v33 }
 0x396   : > { %v3028_v2 = vsel %vm1216_vm5, %v2891_v42, 0.0  ;;  %v3029_v56 = vsel %vm1216_vm5, %v2892_v63, 0.0  ;;  %v3067_v24 = vmul.f32 %v2859_v16, %v6727_v21  ;;  %v3068_v4 = vmul.f32 %v2860_v47, %v6728_v10 }
 0x397   : > { %v3030_v45 = vadd.f32 %v3029_v56, %v3028_v2  ;;  %v3200_v20 = vrot.slane %v3199_v18, 2  ;;  %v3360_v30 = vsel %vm3243_vm11, %v2955_v53, %v3359_v29  ;;  %v3366_v40 = vsel %vm3241_vm10, %v3018_v51, %v3365_v0 }
 0x398   : > { %v3204_v61 = vsel %vm894_vm4, %v3067_v24, 0.0  ;;  %v3205_v3 = vsel %vm894_vm4, %v3068_v4, 0.0  ;;  %v3361_v39 = vsel %vm3245_vm12, %v2964_v26, %v3360_v30  ;;  %v3367_v52 = vsel %vm3243_vm11, %v3027_v60, %v3366_v40 }
 0x399   : > { %v3206_v22 = vadd.f32 %v3205_v3, %v3204_v61  ;;  %v3201_v25 = vadd.f32 %v3200_v20, %v3199_v18  ;;  %v3031_v50 = vrot.slane %v3030_v45, 4 }
 0x39b   : > { %v3202_v36 = vrot.slane %v3201_v25, 1  ;;  %v3207_v14 = vrot.slane %v3206_v22, 4  ;;  %v3032_v35 = vadd.f32 %v3031_v50, %v3030_v45 }
 0x39d   : > { %v3203_v57 = vadd.f32 %v3202_v36, %v3201_v25  ;;  %v3208_v54 = vadd.f32 %v3207_v14, %v3206_v22  ;;  %v3033_v49 = vrot.slane %v3032_v35, 2 }
 0x39f   : > { %v3209_v46 = vrot.slane %v3208_v54, 2  ;;  %v3252_v41 = vsel %vm3243_vm11, %v3203_v57, %v6339_v17  ;;  %v3034_v5 = vadd.f32 %v3033_v49, %v3032_v35  ;;  %v3216_v17 = vld [vmem:[%s6484_s9 + $0x8] sm:$0xff] }
 0x3a1   : > { %v3210_v53 = vadd.f32 %v3209_v46, %v3208_v54  ;;  %v3035_v12 = vrot.slane %v3034_v5, 1 }
 0x3a3   : > { %v3211_v9 = vrot.slane %v3210_v53, 1  ;;  %v3036_v32 = vadd.f32 %v3035_v12, %v3034_v5 }
 0x3a5   : > { %v3212_v38 = vadd.f32 %v3211_v9, %v3210_v53  ;;  %v3368_v27 = vsel %vm3245_vm12, %v3036_v32, %v3367_v52 }
 0x3a6   : > { %v4317_v11 = vpack.c.bf16 %v3368_v27, %v3361_v39 }
 0x3a7   : > { %v3253_v48 = vsel %vm3245_vm12, %v3212_v38, %v3252_v41 }
 0x3a8   : > { %v4311_v28 = vpack.c.bf16 %v3253_v48, %v6318_v31  ;;  %v3214_v31 = vld [vmem:[%s6483_s8 + $0x8] sm:$0xff] }
 0x3aa   : > { %4313 = vmatprep.subr.msk.bf16.mxu1 %vm4312_vm13, %v4311_v28 }
 0x3ab   : > { %4316 = vmatpush3.bf16.xpose.msk.msra.mxu1 %vm4312_vm13, %v4311_v28 }
 0x3ac   : > { %4319 = vmatprep.subr.msk.bf16.mxu1 %vm4318_vm14, %v4317_v11 }
 0x3b2   : > { %4264 = vmatmul.mubr.msk.f32.vlgmr.msra.gmra.mrb[36].mxu1 %vm894_vm4, %v3216_v17 }
 0x3b3   : > { %4322 = vmatpush3.bf16.xpose.msk.msra.mxu1 %vm4318_vm14, %v4317_v11  ;;  %4270 = vmatprep.mubr.msk.f32.mxu1 %vm1216_vm5, %v3213_v6 }
 0x3ba   : > { %4271 = vmatmul.mubr.msk.f32.vlgmr.msra.gmra.mrb[36].mxu1 %vm1216_vm5, %v3214_v31 }
 0x48d   : > { %v4272_v1 = vpop.f32.mrb[36].mxu1 }
 0x48e   : > { %v3467_v62 = vadd.f32 %v4272_v1, %v3464_v34  ;;  %v3445_v26 = vpop.f32.mrb[37].mxu1 }
 0x48f   : > { %v3466_v51 = vadd.f32 %v3459_v44, %v3445_v26 }
 0x490   : > { %3470 = vst.msk [vmem:[%s489_s21 + $0x8] sm:$0xff] %vm3468_vm15, %v3467_v62  ;;  %v3474_v59 = vsel %vm3468_vm15, %v3467_v62, 0.0  ;;  %v3481_v58 = vmul.f32 %v3467_v62, %v3467_v62 }
 0x491   : > { %3469 = vst.msk [vmem:[%s489_s21] sm:$0xff] %vm3468_vm15, %v3466_v51  ;;  %3475 = vadd.xlane.f32.xlu1 %v3474_v59  ;;  %v3471_v37 = vsel %vm3468_vm15, %v3466_v51, 0.0  ;;  %v3480_v55 = vmul.f32 %v3466_v51, %v3466_v51  ;;  %s4651_s21 = scalar_lea.vmem %s4650_s27, 512 }
 0x492   : > { %3472 = vadd.xlane.f32.xlu0 %v3471_v37  ;;  %v3485_v15 = vsel %vm3468_vm15, %v3481_v58, 0.0  ;;  %p4653_p2 = scmp.lt.s32.totalorder %s4651_s21, %s4645_s16 }
 0x493   : > { %v3482_v13 = vsel %vm3468_vm15, %v3480_v55, 0.0 }
 0x494   : > { %p4654_p3 = por %p4653_p2, %p4652_p1 }
 0x496   : > { %3483 = vadd.xlane.f32.xlu0 %v3482_v13  ;;  %p4655_p5 = pnand %p4654_p3, %p4648_p0 }
 0x49a   : > { %3486 = vadd.xlane.f32.xlu0 %v3485_v15 }
 0x49b   : > { %4658 = shalt.err (!%p4655_p5)
}
 0x49c   : > { %s4659_s28 = scalar_lea.hbm %s6419_s0, 256  ;;  %s4663_s19 = scalar_lea.hbm %s6486_s11, 512 }
 0x49d   : > { %p4660_p6 = scmp.ne.s32.totalorder %s6419_s0, %s4659_s28  ;;  %p4664_p10 = scmp.lt.u32.totalorder %s6419_s0, %s6486_s11 }
 0x49e   : > { %p4665_p11 = scmp.lt.u32.totalorder %s4663_s19, %s4659_s28  ;;  %p4667_p13 = scmp.lt.u32.totalorder %s4659_s28, %s6419_s0 }
 0x49f   : > { %p4661_p7 = pnand %p4660_p6, %p4841_p4 }
 0x4a0   : > { %p4666_p12 = por %p4665_p11, %p4664_p10 }
 0x4a1   : > { %p4662_p9 = pneg %p4661_p7 }
 0x4a2   : > { %p4668_p0 = por %p4667_p13, %p4666_p12 }
 0x4a4   : > { %p4669_p1 = pnand %p4668_p0, %p4662_p9 }
 0x4a6   : > { %4672 = shalt.err (!%p4669_p1)
}
 0x4a7   : > { %s4729_s16 = smov 128   ;;  %s4730_s27 = smov 8   ;;  %vm3477_vm0 = vcmask 7168  }
 0x4a8   : > { %4391 = dma.vmem_to_hbm [thread:$0]  (%p4841_p4), %s6413_s15, 256, %s6419_s0, %s6421_s24, %s4729_s16, %s4729_s16, %s4730_s27  }
 0x4a9   : > { %s540_s17 = scalar_lea.vmem %s6487_s12, %s4921_s29  ;;  %s549_s23 = scalar_lea.vmem %s6488_s13, %s4921_s29 }
 0x51e   : > { %v3476_v43 = vpop.xlane.xlu1 %3475 }
 0x51f   : > { %3479 = vst.msk [vmem:[%s540_s17 + $0x8] sm:$0xff] %vm3477_vm0, %v3476_v43  ;;  %v3473_v8 = vpop.xlane.xlu0 %3472 }
 0x520   : > { %3478 = vst.msk [vmem:[%s540_s17] sm:$0xff] %vm3477_vm0, %v3473_v8 }
 0x523   : > { %v3484_v23 = vpop.xlane.xlu0 %3483 }
 0x524   : > { %3488 = vst.msk [vmem:[%s549_s23] sm:$0xff] %vm3477_vm0, %v3484_v23 }
 0x527   : > { %v3487_v33 = vpop.xlane.xlu0 %3486 }
 0x528   : > { %3489 = vst.msk [vmem:[%s549_s23 + $0x8] sm:$0xff] %vm3477_vm0, %v3487_v33 }
 0x529 PF: > { %p4397_p4 = scmp.ge.s32.totalorder %s4723_s30, 2  ;;  %s3544_s18 = sand.u32 1, %s4703_s25  }
 0x52a   : > { %s3545_s15 = scalar_lea.sflag [#allocation3], %s3544_s18 }
 0x52b   : > { %p4394_p2 = pnand %p4397_p4, %p4848_p8 }
 0x52d   : > { %4698 = dma.done.wait (!%p4394_p2), %s3545_s15, 256  }
 0x52e   : > { %4700 = vsyncadd (!%p4394_p2), %s3545_s15, 4294967040  ;;  %s27_s30 = sadd.s32 1, %s4723_s30   ;;  %s6729_s29 = sld [smem:[#allocation5_spill]] }
 0x52f   : > { %p24_p3 = scmp.ge.s32.totalorder %s27_s30, 4   ;;  %s6730_s27 = sld [smem:[#allocation8_spill]] }
 0x530   : > { %s6731_s28 = sld [smem:[#allocation6_spill]]  ;;  %s6732_s0 = sld [smem:[#allocation7_spill]] }
 0x531   : > { %s6733_s25 = smov %s4707_s26  ;;  %26 = sbr.rel (!%p24_p3) target bundleno = 6 (0x6), region = 126 }
 0x534   : > { %s6734_s26 = smov %s6729_s29 }
 0x536   : > { %s6735_s29 = smov %s6732_s0 }
 0x538   :  { %3574 = vsyncpa [#allocation3], 1 }
 0x539   :  { %3576 = vsyncpa [#allocation3 + $0x1], 1 }

</bundles_post_ra>
